<compile_context>
chip_gen: v7x
topology: tpu7x:2x2x1
jax: 0.10.0
libtpu: 0.0.40
codegen_flags: <defaults>
</compile_context>

<pallas_src>
import jax
import jax.numpy as jnp
from jax.experimental import pallas as pl
from jax.experimental.pallas import tpu as pltpu

LEAKY_SLOPE = 0.01  # torch.nn.LeakyReLU default


def _leaky(v):
    return jnp.where(v > 0, v, LEAKY_SLOPE * v)


def _round_up(x, m):
    return ((x + m - 1) // m) * m


# ----------------------------------------------------------------------------
# Fused kernel: conv1 + LeakyReLU + conv2 + LeakyReLU + dense1 + ReLU + dense2
# ----------------------------------------------------------------------------
def _fused_kernel(x_ref, m1_ref, b1_ref, m2_ref, b2_ref,
                  d1w_ref, d1b_ref, d2w_ref, d2b_ref, o_ref):
    # x_ref  : (nb, H, W*Cin)        one block of images (f32)
    # m1_ref : (kh, W*Cin, P1)       block-Toeplitz conv1 weights (bf16), P1=pad128(Wo1*C1)
    # m2_ref : (kh, P1, P2)          block-Toeplitz conv2 weights (bf16), P2=pad128(Wo2*C2)
    # d1w_ref: (Ho2, P2, DN)         dense1 weights, NCHW flatten folded in (bf16)
    # d2w_ref: (DN, DOUT)            dense2 weights (bf16)
    # o_ref  : (nb, DOUT)            f32 output block
    nb, h, wc = x_ref.shape
    kh, _, p1 = m1_ref.shape
    p2 = m2_ref.shape[2]
    ho1 = h - kh + 1
    ho2 = ho1 - kh + 1
    f32, bf16 = jnp.float32, jnp.bfloat16

    # ---- conv1: one batched row-band matmul per kernel row, M = nb*ho1 ----
    x = x_ref[...]                                            # (nb, h, wc) f32
    acc1 = None
    for di in range(kh):
        lhs = x[:, di:di + ho1, :].reshape(nb * ho1, wc).astype(bf16)
        part = jnp.dot(lhs, m1_ref[di], preferred_element_type=f32)
        acc1 = part if acc1 is None else acc1 + part
    a1 = _leaky(acc1 + b1_ref[...]).reshape(nb, ho1, p1)      # f32, lane-aligned

    # ---- conv2: same trick on conv1's activation slab, M = nb*ho2 ----
    acc2 = None
    for di in range(kh):
        lhs = a1[:, di:di + ho2, :].reshape(nb * ho2, p1).astype(bf16)
        part = jnp.dot(lhs, m2_ref[di], preferred_element_type=f32)
        acc2 = part if acc2 is None else acc2 + part
    a2 = _leaky(acc2 + b2_ref[...]).reshape(nb, ho2, p2)      # f32, lane-aligned

    # ---- dense1 (+ReLU): one M=nb dot per conv output row (NCHW flatten is
    #      already folded into d1w at prep time) ----
    accd = None
    for i2 in range(ho2):
        lhs = a2[:, i2:i2 + 1, :].reshape(nb, p2).astype(bf16)
        part = jnp.dot(lhs, d1w_ref[i2], preferred_element_type=f32)
        accd = part if accd is None else accd + part
    h1 = jnp.maximum(accd + d1b_ref[...], 0.0).astype(bf16)   # (nb, DN)

    # ---- dense2: single dot + single full-block store ----
    o_ref[...] = (jnp.dot(h1, d2w_ref[...], preferred_element_type=f32)
                  + d2b_ref[...])


# ----------------------------------------------------------------------------
# One-time weight preparation (pure JAX, outside the hot path)
# ----------------------------------------------------------------------------
def prepare_params(params, in_h, in_w):
    """Build kernel-side weights:
    * m1/m2: block-Toeplitz conv matrices, one (K, Wo*Cout) slab per kernel
      row, zero-padded in the lane dimension to multiples of 128.
    * d1w:   dense1 weight permuted to the kernel's (row, col*chan) activation
      layout (PyTorch NCHW flatten folded in), padded rows zeroed.
    * Matmul weights are cast to bf16 (MXU-native); biases stay f32."""
    w1, b1 = params["conv1_w"], params["conv1_b"]   # (kh,kw,cin,c1), (c1,)
    w2, b2 = params["conv2_w"], params["conv2_b"]   # (kh,kw,c1,c2),  (c2,)
    kh, kw, cin, c1 = w1.shape
    c2 = w2.shape[3]
    ho1, wo1 = in_h - kh + 1, in_w - kw + 1
    ho2, wo2 = ho1 - kh + 1, wo1 - kw + 1
    p1 = _round_up(wo1 * c1, 128)
    p2 = _round_up(wo2 * c2, 128)

    m1 = jnp.zeros((kh, in_w * cin, p1), jnp.float32)
    for di in range(kh):
        for j1 in range(wo1):
            for dj in range(kw):
                wc = j1 + dj
                m1 = m1.at[di, wc * cin:(wc + 1) * cin,
                           j1 * c1:(j1 + 1) * c1].set(w1[di, dj])

    m2 = jnp.zeros((kh, p1, p2), jnp.float32)
    for di in range(kh):
        for j2 in range(wo2):
            for dj in range(kw):
                j1 = j2 + dj
                m2 = m2.at[di, j1 * c1:(j1 + 1) * c1,
                           j2 * c2:(j2 + 1) * c2].set(w2[di, dj])

    b1p = jnp.zeros((1, p1), jnp.float32).at[0, :wo1 * c1].set(jnp.tile(b1, wo1))
    b2p = jnp.zeros((1, p2), jnp.float32).at[0, :wo2 * c2].set(jnp.tile(b2, wo2))

    d1w = params["dense1_w"]                        # (c2*ho2*wo2, dn), NCHW rows
    dn = d1w.shape[1]
    d1w = d1w.reshape(c2, ho2, wo2, dn).transpose(1, 2, 0, 3).reshape(
        ho2, wo2 * c2, dn)
    d1w = jnp.pad(d1w, ((0, 0), (0, p2 - wo2 * c2), (0, 0)))   # (ho2, p2, dn)

    return {
        "m1": m1.astype(jnp.bfloat16), "b1": b1p,
        "m2": m2.astype(jnp.bfloat16), "b2": b2p,
        "d1w": d1w.astype(jnp.bfloat16),
        "d1b": params["dense1_b"].reshape(1, -1).astype(jnp.float32),
        "d2w": params["out_w"].astype(jnp.bfloat16),
        "d2b": params["out_b"].reshape(1, -1).astype(jnp.float32),
    }


# ----------------------------------------------------------------------------
# Batch-block selection: big blocks, >=2 grid steps, prefer divisors of n
# ----------------------------------------------------------------------------
def _pick_batch_block(n, per_img_act_bytes, target, act_budget=8 << 20):
    nb = max(1, min(target, n, act_budget // max(per_img_act_bytes, 1)))
    if n >= 2:
        nb = min(nb, (n + 1) // 2)       # keep >= 2 grid steps (v7x megacore)
    nb = max(nb, 1)
    lo = max(1, (3 * nb) // 4)
    for cand in range(nb, lo - 1, -1):   # prefer a divisor of n: no host pad
        if n % cand == 0:
            return cand
    return nb                            # rare: fall back to padding the tail


# ----------------------------------------------------------------------------
# ConvLayers forward (conv='small', out_dense_n=64, out_dense_depth=1, out=32)
# ----------------------------------------------------------------------------
def conv_layers_forward(x, prepped, block_n=128):
    if x.ndim < 4:
        raise Exception("The dimension of input should be greater than or equal to 4")
    batch = x.shape[:-3]
    h, w, cin = x.shape[-3:]
    x = x.reshape((-1, h, w * cin)).astype(jnp.float32)   # free reshape: (N,H,W*C)
    n = x.shape[0]

    m1, b1 = prepped["m1"], prepped["b1"]
    m2, b2 = prepped["m2"], prepped["b2"]
    d1w, d1b = prepped["d1w"], prepped["d1b"]
    d2w, d2b = prepped["d2w"], prepped["d2b"]
    kh = m1.shape[0]
    p1, p2 = m1.shape[2], m2.shape[2]
    ho1 = h - kh + 1
    ho2 = d1w.shape[0]
    dout = d2w.shape[1]

    # Conservative per-image live-activation estimate (f32 accum + bf16 copies).
    per_img_act = 10 * ho1 * p1 + 10 * ho2 * p2 + 6 * h * w * cin
    nb = _pick_batch_block(n, per_img_act, block_n)
    num_blocks = pl.cdiv(n, nb)
    n_pad = num_blocks * nb
    if n_pad != n:
        # Rare fallback (nb usually divides n).  Padded rows produce garbage
        # outputs that are sliced off below; rows are fully independent.
        x = jnp.pad(x, ((0, n_pad - n), (0, 0), (0, 0)))

    def full(a):
        nd = a.ndim
        return pl.BlockSpec(a.shape, lambda i, nd=nd: (0,) * nd)

    # Only raise the scoped VMEM limit if the estimate would exceed the default.
    weight_bytes = sum(int(a.size) * a.dtype.itemsize
                       for a in (m1, b1, m2, b2, d1w, d1b, d2w, d2b))
    x_block_bytes = nb * h * (w * cin) * 4
    vmem_est = 2 * (weight_bytes + x_block_bytes) + nb * per_img_act + 2 * nb * dout * 4
    cparams = {"dimension_semantics": ("parallel",)}
    if vmem_est > 14 * (1 << 20):
        cparams["vmem_limit_bytes"] = min(int(vmem_est * 5 // 4), 64 * (1 << 20))

    out = pl.pallas_call(
        _fused_kernel,
        out_shape=jax.ShapeDtypeStruct((num_blocks, nb, dout), jnp.float32),
        grid=(num_blocks,),
        in_specs=[
            pl.BlockSpec((nb, h, w * cin), lambda i: (i, 0, 0)),
            full(m1), full(b1), full(m2), full(b2),
            full(d1w), full(d1b), full(d2w), full(d2b),
        ],
        out_specs=pl.BlockSpec((None, nb, dout), lambda i: (i, 0, 0)),
        compiler_params=pltpu.CompilerParams(**cparams),
    )(x, m1, b1, m2, b2, d1w, d1b, d2w, d2b)

    out = out.reshape(n_pad, dout)[:n]
    return out.reshape(batch + (dout,))


# ----------------------------------------------------------------------------
# Deterministic parameter construction + pure-JAX f32 reference
# ----------------------------------------------------------------------------
def make_params(key, in_channels, h, w, dense_n=64, output_size=32):
    ks = jax.random.split(key, 6)
    c1, c2 = 35, 144
    ho2, wo2 = h - 4, w - 4  # two 3x3/stride-1 valid convs
    conv_out = ho2 * wo2 * c2

    def xavier(k, shape):
        fan_in, fan_out = shape[0], shape[1]
        limit = (6.0 / (fan_in + fan_out)) ** 0.5
        return jax.random.uniform(k, shape, jnp.float32, -limit, limit)

    return {
        "conv1_w": 0.1 * jax.random.normal(ks[0], (3, 3, in_channels, c1), jnp.float32),
        "conv1_b": 0.1 * jax.random.normal(ks[1], (c1,), jnp.float32),
        "conv2_w": 0.05 * jax.random.normal(ks[2], (3, 3, c1, c2), jnp.float32),
        "conv2_b": 0.1 * jax.random.normal(ks[3], (c2,), jnp.float32),
        "dense1_w": xavier(ks[4], (conv_out, dense_n)),
        "dense1_b": jnp.zeros((dense_n,), jnp.float32),   # torch.zero_(bias)
        "out_w": xavier(ks[5], (dense_n, output_size)),
        "out_b": jnp.zeros((output_size,), jnp.float32),
    }


def reference_forward(x, params):
    batch = x.shape[:-3]
    x = x.reshape((-1,) + x.shape[-3:]).astype(jnp.float32)

    def conv(x, w, b):
        y = jax.lax.conv_general_dilated(
            x, w, window_strides=(1, 1), padding="VALID",
            dimension_numbers=("NHWC", "HWIO", "NHWC"))
        y = y + b
        return jnp.where(y > 0, y, LEAKY_SLOPE * y)

    hdn = conv(x, params["conv1_w"], params["conv1_b"])
    hdn = conv(hdn, params["conv2_w"], params["conv2_b"])
    n, ho, wo, c = hdn.shape
    hdn = jnp.transpose(hdn, (0, 3, 1, 2)).reshape(n, c * ho * wo)   # NCHW flatten
    hdn = jnp.maximum(hdn @ params["dense1_w"] + params["dense1_b"], 0.0)
    hdn = hdn @ params["out_w"] + params["out_b"]
    return hdn.reshape(batch + (hdn.shape[-1],))


if __name__ == "__main__":
    key = jax.random.PRNGKey(0)
    kx, kp = jax.random.split(key)

    B, H, W, C = 8, 8, 8, 4            # input is (*batch, H, W, C), like the module
    x = jax.random.normal(kx, (B, H, W, C), jnp.float32)
    params = make_params(kp, C, H, W, dense_n=64, output_size=32)
    prepped = prepare_params(params, H, W)   # one-time weight prep (bf16, padded)

    out = conv_layers_forward(x, prepped)
    out = jax.block_until_ready(out)

    ref = reference_forward(x, params)
    assert out.shape == (B, 32), out.shape
    # bf16 matmul operands (f32 accumulation) -> loosened tolerance vs f32 ref.
    assert jnp.allclose(out, ref, atol=3e-2, rtol=3e-2), "mismatch vs reference"

    print("KERNEL_OK")
</pallas_src>

<mosaic_0001>
module attributes {stable_mosaic.version = 11 : i64} {
  func.func @_fused_kernel(%arg0: i32, %arg1: memref<4x8x32xf32, #tpu.memory_space<vmem>>, %arg2: memref<3x32x256xbf16, #tpu.memory_space<vmem>>, %arg3: memref<1x256xf32, #tpu.memory_space<vmem>>, %arg4: memref<3x256x640xbf16, #tpu.memory_space<vmem>>, %arg5: memref<1x640xf32, #tpu.memory_space<vmem>>, %arg6: memref<4x640x64xbf16, #tpu.memory_space<vmem>>, %arg7: memref<1x64xf32, #tpu.memory_space<vmem>>, %arg8: memref<64x32xbf16, #tpu.memory_space<vmem>>, %arg9: memref<1x32xf32, #tpu.memory_space<vmem>>, %arg10: memref<1x4x32xf32, #tpu.memory_space<vmem>>) attributes {dimension_semantics = [#tpu.dimension_semantics<parallel>], iteration_bounds = array<i64: 2>, scalar_prefetch = 0 : i64, scratch_operands = 0 : i64, tpu.core_type = #tpu.core_type<tc>, window_params = [{transform_indices = @transform_0, window_bounds = array<i64: 4, 8, 32>}, {pipeline_mode = #tpu.pipeline_mode<synchronous>, transform_indices = @transform_1, window_bounds = array<i64: 3, 32, 256>}, {pipeline_mode = #tpu.pipeline_mode<synchronous>, transform_indices = @transform_2, window_bounds = array<i64: 1, 256>}, {pipeline_mode = #tpu.pipeline_mode<synchronous>, transform_indices = @transform_3, window_bounds = array<i64: 3, 256, 640>}, {pipeline_mode = #tpu.pipeline_mode<synchronous>, transform_indices = @transform_4, window_bounds = array<i64: 1, 640>}, {pipeline_mode = #tpu.pipeline_mode<synchronous>, transform_indices = @transform_5, window_bounds = array<i64: 4, 640, 64>}, {pipeline_mode = #tpu.pipeline_mode<synchronous>, transform_indices = @transform_6, window_bounds = array<i64: 1, 64>}, {pipeline_mode = #tpu.pipeline_mode<synchronous>, transform_indices = @transform_7, window_bounds = array<i64: 64, 32>}, {pipeline_mode = #tpu.pipeline_mode<synchronous>, transform_indices = @transform_8, window_bounds = array<i64: 1, 32>}, {transform_indices = @transform_9, window_bounds = array<i64: 1, 4, 32>}]} {
    %c0 = arith.constant 0 : index
    %c0_0 = arith.constant 0 : index
    %c0_1 = arith.constant 0 : index
    %0 = vector.load %arg1[%c0, %c0_0, %c0_1] : memref<4x8x32xf32, #tpu.memory_space<vmem>>, vector<4x8x32xf32>
    %1 = vector.extract_strided_slice %0 {offsets = [0, 0, 0], sizes = [4, 6, 32], strides = [1, 1, 1]} : vector<4x8x32xf32> to vector<4x6x32xf32>
    %2 = vector.shape_cast %1 : vector<4x6x32xf32> to vector<24x32xf32>
    %3 = arith.truncf %2 : vector<24x32xf32> to vector<24x32xbf16>
    %c0_2 = arith.constant 0 : index
    %c0_3 = arith.constant 0 : index
    %c0_4 = arith.constant 0 : index
    %4 = vector.load %arg2[%c0_2, %c0_3, %c0_4] : memref<3x32x256xbf16, #tpu.memory_space<vmem>>, vector<1x32x256xbf16>
    %5 = vector.shape_cast %4 : vector<1x32x256xbf16> to vector<32x256xbf16>
    %cst = arith.constant dense<0.000000e+00> : vector<24x256xf32>
    %6 = tpu.matmul %3, %5, %cst {dimension_numbers = #tpu.dot_dimension_numbers<[1], [0], [0], [1], [0, 0, 1, 1], [], []>} : vector<24x32xbf16>, vector<32x256xbf16>, vector<24x256xf32> -> vector<24x256xf32>
    %7 = vector.extract_strided_slice %0 {offsets = [0, 1, 0], sizes = [4, 6, 32], strides = [1, 1, 1]} : vector<4x8x32xf32> to vector<4x6x32xf32>
    %8 = vector.shape_cast %7 : vector<4x6x32xf32> to vector<24x32xf32>
    %9 = arith.truncf %8 : vector<24x32xf32> to vector<24x32xbf16>
    %c1 = arith.constant 1 : index
    %c0_5 = arith.constant 0 : index
    %c0_6 = arith.constant 0 : index
    %10 = vector.load %arg2[%c1, %c0_5, %c0_6] : memref<3x32x256xbf16, #tpu.memory_space<vmem>>, vector<1x32x256xbf16>
    %11 = vector.shape_cast %10 : vector<1x32x256xbf16> to vector<32x256xbf16>
    %cst_7 = arith.constant dense<0.000000e+00> : vector<24x256xf32>
    %12 = tpu.matmul %9, %11, %cst_7 {dimension_numbers = #tpu.dot_dimension_numbers<[1], [0], [0], [1], [0, 0, 1, 1], [], []>} : vector<24x32xbf16>, vector<32x256xbf16>, vector<24x256xf32> -> vector<24x256xf32>
    %13 = arith.addf %6, %12 : vector<24x256xf32>
    %14 = vector.extract_strided_slice %0 {offsets = [0, 2, 0], sizes = [4, 6, 32], strides = [1, 1, 1]} : vector<4x8x32xf32> to vector<4x6x32xf32>
    %15 = vector.shape_cast %14 : vector<4x6x32xf32> to vector<24x32xf32>
    %16 = arith.truncf %15 : vector<24x32xf32> to vector<24x32xbf16>
    %c2 = arith.constant 2 : index
    %c0_8 = arith.constant 0 : index
    %c0_9 = arith.constant 0 : index
    %17 = vector.load %arg2[%c2, %c0_8, %c0_9] : memref<3x32x256xbf16, #tpu.memory_space<vmem>>, vector<1x32x256xbf16>
    %18 = vector.shape_cast %17 : vector<1x32x256xbf16> to vector<32x256xbf16>
    %cst_10 = arith.constant dense<0.000000e+00> : vector<24x256xf32>
    %19 = tpu.matmul %16, %18, %cst_10 {dimension_numbers = #tpu.dot_dimension_numbers<[1], [0], [0], [1], [0, 0, 1, 1], [], []>} : vector<24x32xbf16>, vector<32x256xbf16>, vector<24x256xf32> -> vector<24x256xf32>
    %20 = arith.addf %13, %19 : vector<24x256xf32>
    %c0_11 = arith.constant 0 : index
    %c0_12 = arith.constant 0 : index
    %21 = vector.load %arg3[%c0_11, %c0_12] : memref<1x256xf32, #tpu.memory_space<vmem>>, vector<1x256xf32>
    %22 = vector.broadcast %21 : vector<1x256xf32> to vector<24x256xf32>
    %23 = arith.addf %20, %22 : vector<24x256xf32>
    %cst_13 = arith.constant 0.000000e+00 : f32
    %24 = vector.broadcast %cst_13 : f32 to vector<24x256xf32>
    %25 = arith.cmpf ogt, %23, %24 : vector<24x256xf32>
    %cst_14 = arith.constant 0.00999999977 : f32
    %26 = vector.broadcast %cst_14 : f32 to vector<24x256xf32>
    %27 = arith.mulf %26, %23 : vector<24x256xf32>
    %28 = arith.select %25, %23, %27 : vector<24x256xi1>, vector<24x256xf32>
    %29 = vector.shape_cast %28 : vector<24x256xf32> to vector<4x6x256xf32>
    %30 = vector.extract_strided_slice %29 {offsets = [0, 0, 0], sizes = [4, 4, 256], strides = [1, 1, 1]} : vector<4x6x256xf32> to vector<4x4x256xf32>
    %31 = vector.shape_cast %30 : vector<4x4x256xf32> to vector<16x256xf32>
    %32 = arith.truncf %31 : vector<16x256xf32> to vector<16x256xbf16>
    %c0_15 = arith.constant 0 : index
    %c0_16 = arith.constant 0 : index
    %c0_17 = arith.constant 0 : index
    %33 = vector.load %arg4[%c0_15, %c0_16, %c0_17] : memref<3x256x640xbf16, #tpu.memory_space<vmem>>, vector<1x256x640xbf16>
    %34 = vector.shape_cast %33 : vector<1x256x640xbf16> to vector<256x640xbf16>
    %cst_18 = arith.constant dense<0.000000e+00> : vector<16x640xf32>
    %35 = tpu.matmul %32, %34, %cst_18 {dimension_numbers = #tpu.dot_dimension_numbers<[1], [0], [0], [1], [0, 0, 1, 1], [], []>} : vector<16x256xbf16>, vector<256x640xbf16>, vector<16x640xf32> -> vector<16x640xf32>
    %36 = vector.extract_strided_slice %29 {offsets = [0, 1, 0], sizes = [4, 4, 256], strides = [1, 1, 1]} : vector<4x6x256xf32> to vector<4x4x256xf32>
    %37 = vector.shape_cast %36 : vector<4x4x256xf32> to vector<16x256xf32>
    %38 = arith.truncf %37 : vector<16x256xf32> to vector<16x256xbf16>
    %c1_19 = arith.constant 1 : index
    %c0_20 = arith.constant 0 : index
    %c0_21 = arith.constant 0 : index
    %39 = vector.load %arg4[%c1_19, %c0_20, %c0_21] : memref<3x256x640xbf16, #tpu.memory_space<vmem>>, vector<1x256x640xbf16>
    %40 = vector.shape_cast %39 : vector<1x256x640xbf16> to vector<256x640xbf16>
    %cst_22 = arith.constant dense<0.000000e+00> : vector<16x640xf32>
    %41 = tpu.matmul %38, %40, %cst_22 {dimension_numbers = #tpu.dot_dimension_numbers<[1], [0], [0], [1], [0, 0, 1, 1], [], []>} : vector<16x256xbf16>, vector<256x640xbf16>, vector<16x640xf32> -> vector<16x640xf32>
    %42 = arith.addf %35, %41 : vector<16x640xf32>
    %43 = vector.extract_strided_slice %29 {offsets = [0, 2, 0], sizes = [4, 4, 256], strides = [1, 1, 1]} : vector<4x6x256xf32> to vector<4x4x256xf32>
    %44 = vector.shape_cast %43 : vector<4x4x256xf32> to vector<16x256xf32>
    %45 = arith.truncf %44 : vector<16x256xf32> to vector<16x256xbf16>
    %c2_23 = arith.constant 2 : index
    %c0_24 = arith.constant 0 : index
    %c0_25 = arith.constant 0 : index
    %46 = vector.load %arg4[%c2_23, %c0_24, %c0_25] : memref<3x256x640xbf16, #tpu.memory_space<vmem>>, vector<1x256x640xbf16>
    %47 = vector.shape_cast %46 : vector<1x256x640xbf16> to vector<256x640xbf16>
    %cst_26 = arith.constant dense<0.000000e+00> : vector<16x640xf32>
    %48 = tpu.matmul %45, %47, %cst_26 {dimension_numbers = #tpu.dot_dimension_numbers<[1], [0], [0], [1], [0, 0, 1, 1], [], []>} : vector<16x256xbf16>, vector<256x640xbf16>, vector<16x640xf32> -> vector<16x640xf32>
    %49 = arith.addf %42, %48 : vector<16x640xf32>
    %c0_27 = arith.constant 0 : index
    %c0_28 = arith.constant 0 : index
    %50 = vector.load %arg5[%c0_27, %c0_28] : memref<1x640xf32, #tpu.memory_space<vmem>>, vector<1x640xf32>
    %51 = vector.broadcast %50 : vector<1x640xf32> to vector<16x640xf32>
    %52 = arith.addf %49, %51 : vector<16x640xf32>
    %cst_29 = arith.constant 0.000000e+00 : f32
    %53 = vector.broadcast %cst_29 : f32 to vector<16x640xf32>
    %54 = arith.cmpf ogt, %52, %53 : vector<16x640xf32>
    %cst_30 = arith.constant 0.00999999977 : f32
    %55 = vector.broadcast %cst_30 : f32 to vector<16x640xf32>
    %56 = arith.mulf %55, %52 : vector<16x640xf32>
    %57 = arith.select %54, %52, %56 : vector<16x640xi1>, vector<16x640xf32>
    %58 = vector.shape_cast %57 : vector<16x640xf32> to vector<4x4x640xf32>
    %59 = vector.extract_strided_slice %58 {offsets = [0, 0, 0], sizes = [4, 1, 640], strides = [1, 1, 1]} : vector<4x4x640xf32> to vector<4x1x640xf32>
    %60 = vector.shape_cast %59 : vector<4x1x640xf32> to vector<4x640xf32>
    %61 = arith.truncf %60 : vector<4x640xf32> to vector<4x640xbf16>
    %c0_31 = arith.constant 0 : index
    %c0_32 = arith.constant 0 : index
    %c0_33 = arith.constant 0 : index
    %62 = vector.load %arg6[%c0_31, %c0_32, %c0_33] : memref<4x640x64xbf16, #tpu.memory_space<vmem>>, vector<1x640x64xbf16>
    %63 = vector.shape_cast %62 : vector<1x640x64xbf16> to vector<640x64xbf16>
    %cst_34 = arith.constant dense<0.000000e+00> : vector<4x64xf32>
    %64 = tpu.matmul %61, %63, %cst_34 {dimension_numbers = #tpu.dot_dimension_numbers<[1], [0], [0], [1], [0, 0, 1, 1], [], []>} : vector<4x640xbf16>, vector<640x64xbf16>, vector<4x64xf32> -> vector<4x64xf32>
    %65 = vector.extract_strided_slice %58 {offsets = [0, 1, 0], sizes = [4, 1, 640], strides = [1, 1, 1]} : vector<4x4x640xf32> to vector<4x1x640xf32>
    %66 = vector.shape_cast %65 : vector<4x1x640xf32> to vector<4x640xf32>
    %67 = arith.truncf %66 : vector<4x640xf32> to vector<4x640xbf16>
    %c1_35 = arith.constant 1 : index
    %c0_36 = arith.constant 0 : index
    %c0_37 = arith.constant 0 : index
    %68 = vector.load %arg6[%c1_35, %c0_36, %c0_37] : memref<4x640x64xbf16, #tpu.memory_space<vmem>>, vector<1x640x64xbf16>
    %69 = vector.shape_cast %68 : vector<1x640x64xbf16> to vector<640x64xbf16>
    %cst_38 = arith.constant dense<0.000000e+00> : vector<4x64xf32>
    %70 = tpu.matmul %67, %69, %cst_38 {dimension_numbers = #tpu.dot_dimension_numbers<[1], [0], [0], [1], [0, 0, 1, 1], [], []>} : vector<4x640xbf16>, vector<640x64xbf16>, vector<4x64xf32> -> vector<4x64xf32>
    %71 = arith.addf %64, %70 : vector<4x64xf32>
    %72 = vector.extract_strided_slice %58 {offsets = [0, 2, 0], sizes = [4, 1, 640], strides = [1, 1, 1]} : vector<4x4x640xf32> to vector<4x1x640xf32>
    %73 = vector.shape_cast %72 : vector<4x1x640xf32> to vector<4x640xf32>
    %74 = arith.truncf %73 : vector<4x640xf32> to vector<4x640xbf16>
    %c2_39 = arith.constant 2 : index
    %c0_40 = arith.constant 0 : index
    %c0_41 = arith.constant 0 : index
    %75 = vector.load %arg6[%c2_39, %c0_40, %c0_41] : memref<4x640x64xbf16, #tpu.memory_space<vmem>>, vector<1x640x64xbf16>
    %76 = vector.shape_cast %75 : vector<1x640x64xbf16> to vector<640x64xbf16>
    %cst_42 = arith.constant dense<0.000000e+00> : vector<4x64xf32>
    %77 = tpu.matmul %74, %76, %cst_42 {dimension_numbers = #tpu.dot_dimension_numbers<[1], [0], [0], [1], [0, 0, 1, 1], [], []>} : vector<4x640xbf16>, vector<640x64xbf16>, vector<4x64xf32> -> vector<4x64xf32>
    %78 = arith.addf %71, %77 : vector<4x64xf32>
    %79 = vector.extract_strided_slice %58 {offsets = [0, 3, 0], sizes = [4, 1, 640], strides = [1, 1, 1]} : vector<4x4x640xf32> to vector<4x1x640xf32>
    %80 = vector.shape_cast %79 : vector<4x1x640xf32> to vector<4x640xf32>
    %81 = arith.truncf %80 : vector<4x640xf32> to vector<4x640xbf16>
    %c3 = arith.constant 3 : index
    %c0_43 = arith.constant 0 : index
    %c0_44 = arith.constant 0 : index
    %82 = vector.load %arg6[%c3, %c0_43, %c0_44] : memref<4x640x64xbf16, #tpu.memory_space<vmem>>, vector<1x640x64xbf16>
    %83 = vector.shape_cast %82 : vector<1x640x64xbf16> to vector<640x64xbf16>
    %cst_45 = arith.constant dense<0.000000e+00> : vector<4x64xf32>
    %84 = tpu.matmul %81, %83, %cst_45 {dimension_numbers = #tpu.dot_dimension_numbers<[1], [0], [0], [1], [0, 0, 1, 1], [], []>} : vector<4x640xbf16>, vector<640x64xbf16>, vector<4x64xf32> -> vector<4x64xf32>
    %85 = arith.addf %78, %84 : vector<4x64xf32>
    %c0_46 = arith.constant 0 : index
    %c0_47 = arith.constant 0 : index
    %86 = vector.load %arg7[%c0_46, %c0_47] : memref<1x64xf32, #tpu.memory_space<vmem>>, vector<1x64xf32>
    %87 = vector.broadcast %86 : vector<1x64xf32> to vector<4x64xf32>
    %88 = arith.addf %85, %87 : vector<4x64xf32>
    %cst_48 = arith.constant 0.000000e+00 : f32
    %89 = vector.broadcast %cst_48 : f32 to vector<4x64xf32>
    %90 = arith.maximumf %88, %89 : vector<4x64xf32>
    %91 = arith.truncf %90 : vector<4x64xf32> to vector<4x64xbf16>
    %c0_49 = arith.constant 0 : index
    %c0_50 = arith.constant 0 : index
    %92 = vector.load %arg8[%c0_49, %c0_50] : memref<64x32xbf16, #tpu.memory_space<vmem>>, vector<64x32xbf16>
    %cst_51 = arith.constant dense<0.000000e+00> : vector<4x32xf32>
    %93 = tpu.matmul %91, %92, %cst_51 {dimension_numbers = #tpu.dot_dimension_numbers<[1], [0], [0], [1], [0, 0, 1, 1], [], []>} : vector<4x64xbf16>, vector<64x32xbf16>, vector<4x32xf32> -> vector<4x32xf32>
    %c0_52 = arith.constant 0 : index
    %c0_53 = arith.constant 0 : index
    %94 = vector.load %arg9[%c0_52, %c0_53] : memref<1x32xf32, #tpu.memory_space<vmem>>, vector<1x32xf32>
    %95 = vector.broadcast %94 : vector<1x32xf32> to vector<4x32xf32>
    %96 = arith.addf %93, %95 : vector<4x32xf32>
    %c0_54 = arith.constant 0 : index
    %c0_55 = arith.constant 0 : index
    %c0_56 = arith.constant 0 : index
    %97 = vector.load %arg10[%c0_54, %c0_55, %c0_56] : memref<1x4x32xf32, #tpu.memory_space<vmem>>, vector<1x4x32xf32>
    %98 = vector.shape_cast %97 : vector<1x4x32xf32> to vector<4x32xf32>
    %99 = vector.shape_cast %96 : vector<4x32xf32> to vector<1x4x32xf32>
    tpu.vector_store %arg10[%c0_54, %c0_55, %c0_56], %99 {strides = array<i32>} : memref<1x4x32xf32, #tpu.memory_space<vmem>>, vector<1x4x32xf32>,
    return
  }
  func.func @transform_0(%arg0: i32) -> (i32, i32, i32) {
    %c0_i32 = arith.constant 0 : i32
    %c0_i32_0 = arith.constant 0 : i32
    %c0_i32_1 = arith.constant 0 : i32
    return %arg0, %c0_i32, %c0_i32_0 : i32, i32, i32
  }
  func.func @transform_1(%arg0: i32) -> (i32, i32, i32) {
    %c0_i32 = arith.constant 0 : i32
    %c0_i32_0 = arith.constant 0 : i32
    %c0_i32_1 = arith.constant 0 : i32
    %c0_i32_2 = arith.constant 0 : i32
    return %c0_i32, %c0_i32_0, %c0_i32_1 : i32, i32, i32
  }
  func.func @transform_2(%arg0: i32) -> (i32, i32) {
    %c0_i32 = arith.constant 0 : i32
    %c0_i32_0 = arith.constant 0 : i32
    %c0_i32_1 = arith.constant 0 : i32
    return %c0_i32, %c0_i32_0 : i32, i32
  }
  func.func @transform_3(%arg0: i32) -> (i32, i32, i32) {
    %c0_i32 = arith.constant 0 : i32
    %c0_i32_0 = arith.constant 0 : i32
    %c0_i32_1 = arith.constant 0 : i32
    %c0_i32_2 = arith.constant 0 : i32
    return %c0_i32, %c0_i32_0, %c0_i32_1 : i32, i32, i32
  }
  func.func @transform_4(%arg0: i32) -> (i32, i32) {
    %c0_i32 = arith.constant 0 : i32
    %c0_i32_0 = arith.constant 0 : i32
    %c0_i32_1 = arith.constant 0 : i32
    return %c0_i32, %c0_i32_0 : i32, i32
  }
  func.func @transform_5(%arg0: i32) -> (i32, i32, i32) {
    %c0_i32 = arith.constant 0 : i32
    %c0_i32_0 = arith.constant 0 : i32
    %c0_i32_1 = arith.constant 0 : i32
    %c0_i32_2 = arith.constant 0 : i32
    return %c0_i32, %c0_i32_0, %c0_i32_1 : i32, i32, i32
  }
  func.func @transform_6(%arg0: i32) -> (i32, i32) {
    %c0_i32 = arith.constant 0 : i32
    %c0_i32_0 = arith.constant 0 : i32
    %c0_i32_1 = arith.constant 0 : i32
    return %c0_i32, %c0_i32_0 : i32, i32
  }
  func.func @transform_7(%arg0: i32) -> (i32, i32) {
    %c0_i32 = arith.constant 0 : i32
    %c0_i32_0 = arith.constant 0 : i32
    %c0_i32_1 = arith.constant 0 : i32
    return %c0_i32, %c0_i32_0 : i32, i32
  }
  func.func @transform_8(%arg0: i32) -> (i32, i32) {
    %c0_i32 = arith.constant 0 : i32
    %c0_i32_0 = arith.constant 0 : i32
    %c0_i32_1 = arith.constant 0 : i32
    return %c0_i32, %c0_i32_0 : i32, i32
  }
  func.func @transform_9(%arg0: i32) -> (i32, i32, i32) {
    %c0_i32 = arith.constant 0 : i32
    %c0_i32_0 = arith.constant 0 : i32
    %c0_i32_1 = arith.constant 0 : i32
    return %arg0, %c0_i32, %c0_i32_0 : i32, i32, i32
  }
}

</mosaic_0001>

<bundles_post_ra>
// kernel: tpu_custom_call.1
= control target key start
LH: loop header
LB: loop body
LE: loop exit
PB: predicated region body
PF: predicated region fallthrough
CT: control target
= control target key end

     0   :  { %14 = vsyncpa [#allocation3], 0  ;;  %s10056_s0 = inlined_call_operand.hbm [shape: f32[8,8,32], index: 0, kind: input, shape index: {}]   ;;  %s10057_s1 = inlined_call_operand.hbm [shape: bf16[3,32,256], index: 1, kind: input, shape index: {}]   ;;  %s10058_s2 = inlined_call_operand.vmem [shape: f32[1,256], index: 2, kind: input, shape index: {}]   ;;  %s10059_s3 = inlined_call_operand.vmem [shape: bf16[3,256,640], index: 3, kind: input, shape index: {}]   ;;  %s10060_s4 = inlined_call_operand.vmem [shape: f32[1,640], index: 4, kind: input, shape index: {}]   ;;  %s10061_s5 = inlined_call_operand.vmem [shape: bf16[4,640,64], index: 5, kind: input, shape index: {}]   ;;  %s10062_s6 = inlined_call_operand.vmem [shape: f32[1,64], index: 6, kind: input, shape index: {}]   ;;  %s10063_s7 = inlined_call_operand.vmem [shape: bf16[64,32], index: 7, kind: input, shape index: {}]   ;;  %s10064_s8 = inlined_call_operand.vmem [shape: f32[1,32], index: 8, kind: input, shape index: {}]   ;;  %s10065_s9 = inlined_call_operand.hbm [shape: f32[2,4,32], index: 9, kind: output, shape index: {}]  }
   0x1   :  { %16 = vsyncpa [#allocation3 + $0x1], 0 }
   0x2   :  { %17 = vsyncpa [#allocation6], 0 }
   0x3   :  { %18 = vsyncpa [#allocation4], 0 }
   0x4   :  { %20 = vsyncpa [#allocation4 + $0x1], 0  ;;  %s7989_s30 = smov 0   ;;  %s7991_s10 = smov 0  }
   0x5   :  { %s7993_s11 = smov 0   ;;  %s7995_s12 = smov 0  }
   0x6 LB: > { %s8010_s13 = sadd.s32 4294967295, %s7928_s12   ;;  %s5933_s14 = sadd.s32 4294967294, %s7928_s12   ;;  %s7928_s12 = sphi %s7995_s12, %s10092_s12   ;;  %s7924_s11 = sphi %s7993_s11, %s10095_s11   ;;  %s7920_s10 = sphi %s7991_s10, %s10094_s10   ;;  %s7916_s30 = sphi %s7989_s30, %s10093_s30  }
   0x7   : > { %p46_p0 = scmp.ne.s32.totalorder %s7920_s10, %s7916_s30  ;;  %p10066_p1 = scmp.eq.s32.totalorder %s8010_s13, 0 }
   0x8   : > { %p244_p3 = scmp.eq.s32.totalorder %s5933_s14, 1  ;;  %p5934_p5 = scmp.ge.s32.totalorder %s7928_s12, 1 }
   0x9   : > { %p8019_p4 = por %p10066_p1, %p46_p0  ;;  %p251_p7 = scmp.lt.s32.totalorder %s7928_s12, 3 }
   0xa   : > { %p8024_p6 = por %p244_p3, %p46_p0  ;;  %s7930_s18 = smov [#allocation5]  }
   0xb   : > { %s10073_s15 = scalar_select %p8019_p4, 1, 0 }
   0xc   : > { %s10074_s16 = scalar_select %p8024_p6, 1, 0 }
   0xd   : > { %p8029_p8 = pnand %p5934_p5, %p251_p7  ;;  %s263_s19 = sshll.u32 %s7930_s18, 4  ;;  %s8033_s19 = int_to_ptr.vmem [resolvable:$true] %s263_s19 }
   0xe   : > { %10075 = sst [smem:[#allocation11_spill]] %s10074_s16  ;;  %s8045_s21 = sadd.s32 1, %s7928_s12  }
   0xf   : > { %s10076_s17 = scalar_select %p8029_p8, 1, 0 }
  0x10   : > { %p7223_p9 = pneg %p8029_p8  ;;  %10078 = sst [smem:[#allocation12_spill]] %s8045_s21 }
  0x11   : > { %s33_s22 = sadd.s32 1, %s7924_s11  ;;  %s30_s23 = ssub.s32 %s7928_s12, %s8045_s21 }
  0x12   : > { %p8040_p11 = pnand %p7223_p9, %p10066_p1  ;;  %s7800_s26 = scalar_lea.hbm %s10057_s1, 1536 }
  0x13   : > { %p7801_p12 = scmp.ne.s32.totalorder %s10057_s1, %s7800_s26  ;;  %p7807_p5 = scmp.lt.u32.totalorder %s7800_s26, %s10057_s1 }
  0x14   : > { %p7802_p13 = pneg %p8040_p11 }
  0x16   : > { %p7803_p0 = pnand %p7802_p13, %p7801_p12 }
  0x18   : > { %p7804_p3 = pneg %p7803_p0 }
  0x1a   : > { %p7809_p7 = pnand %p7807_p5, %p7804_p3 }
  0x1c   : > { %7812 = shalt.err (!%p7809_p7)
}
  0x1d   : > { %s7813_s18 = scalar_lea.vmem %s8033_s19, 1536  ;;  %p7821_p2 = scmp.lt.s32.totalorder %s8033_s19, %s8033_s19 }
  0x1e   : > { %p7814_p9 = scmp.ne.s32.totalorder %s8033_s19, %s7813_s18  ;;  %p7822_p6 = scmp.lt.s32.totalorder %s7813_s18, %s7813_s18 }
  0x20   : > { %p7816_p10 = pnand %p7814_p9, %p7802_p13  ;;  %p7823_p4 = por %p7822_p6, %p7821_p2 }
  0x22   : > { %p7817_p1 = pneg %p7816_p10 }
  0x24   : > { %p7824_p8 = pnand %p7823_p4, %p7817_p1 }
  0x26   : > { %7827 = shalt.err (!%p7824_p8)
}
  0x27   : > { %s10072_s24 = smov 128   ;;  %s7932_s25 = smov 8  }
  0x28   : > { %7226 = dma.hbm_to_vmem [thread:$0]  (!%p8040_p11), %s10057_s1, 1536, %s8033_s19, [#allocation6], %s10072_s24, %s10072_s24, %s7932_s25  }
  0x29   : > { %p31_p1 = scmp.eq.s32.totalorder %s30_s23, 0  ;;  %p40_p2 = scmp.ne.s32.totalorder %s7924_s11, %s7920_s10 }
  0x2a   : > { %p41_p4 = scmp.eq.s32.totalorder %s7928_s12, 0  ;;  %p7236_p6 = scmp.lt.s32.totalorder %s7928_s12, 2 }
  0x2b   : > { %s8079_s28 = scalar_select %p31_p1, %s7924_s11, %s33_s22  }
  0x2c   : > { %p42_p8 = por %p41_p4, %p40_p2  ;;  %p10079_p10 = scmp.eq.s32.totalorder %s8010_s13, 1 }
  0x2d   : > { %s298_s20 = sand.u32 1, %s7924_s11   ;;  %s6815_s14 = sshll.u32 %s7928_s12, 9 }
  0x2e   : > { %p8083_p12 = por %p10079_p10, %p40_p2  ;;  %s5937_s18 = sshll.u32 %s298_s20, 5 }
  0x2f   : > { %s8092_s26 = scalar_lea.hbm %s10056_s0, %s6815_s14  ;;  %s302_s19 = scalar_lea.vmem [#allocation2], %s5937_s18 }
  0x30   : > { %s309_s22 = sshll.u32 %s302_s19, 4  ;;  %p8094_p11 = pnand %p7236_p6, %p42_p8  ;;  %s8098_s22 = int_to_ptr.vmem [resolvable:$true] %s309_s22 }
  0x31   : > { %s8100_s27 = scalar_lea.sflag [#allocation3], %s298_s20  ;;  %s7828_s24 = scalar_lea.hbm %s8092_s26, 512 }
  0x32   : > { %p7829_p13 = scmp.ne.s32.totalorder %s8092_s26, %s7828_s24  ;;  %p7830_p0 = pneg %p8094_p11 }
  0x33   : > { %s7833_s14 = scalar_lea.hbm %s10056_s0, 1024  ;;  %p7834_p7 = scmp.lt.u32.totalorder %s8092_s26, %s10056_s0 }
  0x34   : > { %p7831_p3 = pnand %p7830_p0, %p7829_p13  ;;  %p7835_p9 = scmp.lt.u32.totalorder %s7833_s14, %s7828_s24 }
  0x35   : > { %p7837_p2 = scmp.lt.u32.totalorder %s7828_s24, %s8092_s26 }
  0x36   : > { %p7832_p5 = pneg %p7831_p3  ;;  %p7836_p1 = por %p7835_p9, %p7834_p7 }
  0x38   : > { %p7838_p4 = por %p7837_p2, %p7836_p1 }
  0x3a   : > { %p7839_p6 = pnand %p7838_p4, %p7832_p5 }
  0x3c   : > { %7842 = shalt.err (!%p7839_p6)
}
  0x3d   : > { %s7843_s20 = scalar_lea.vmem %s8098_s22, 512  ;;  %s7933_s16 = smov [#allocation2]  }
  0x3e   : > { %p7844_p8 = scmp.ne.s32.totalorder %s8098_s22, %s7843_s20  ;;  %s7848_s21 = sshll.u32 %s7933_s16, 4  ;;  %s7849_s21 = int_to_ptr.vmem [resolvable:$false] %s7848_s21 }
  0x3f   : > { %s7850_s18 = scalar_lea.vmem %s7849_s21, 1024  ;;  %p7851_p3 = scmp.lt.s32.totalorder %s8098_s22, %s7849_s21 }
  0x40   : > { %p7846_p10 = pnand %p7844_p8, %p7830_p0  ;;  %p7852_p7 = scmp.lt.s32.totalorder %s7850_s18, %s7843_s20 }
  0x42   : > { %p7847_p13 = pneg %p7846_p10  ;;  %p7853_p9 = por %p7852_p7, %p7851_p3 }
  0x44   : > { %p7854_p1 = pnand %p7853_p9, %p7847_p13 }
  0x46   : > { %7857 = shalt.err (!%p7854_p1)
}
  0x47   : > { %s10082_s24 = smov 128   ;;  %p10083_p0 = scmp.ne.s32.totalorder %s10076_s17, 0 }
  0x48   : > { %7230 = dma.hbm_to_vmem [thread:$0]  (!%p8094_p11), %s8092_s26, 512, %s8098_s22, %s8100_s27, %s10082_s24, %s10082_s24, %s7932_s25  }
  0x49   : > { %321 = sbr.rel (%p10083_p0) target bundleno = 1436 (0x59c), region = 56  ;;  %s8134_s14 = sand.u32 (!%p10083_p0), 1, %s7920_s10  }
  0x4a   : > { %s5941_s19 = sshll.u32 (!%p10083_p0), %s8134_s14, 5  ;;  %s324_s20 = scalar_lea.sflag (!%p10083_p0), [#allocation3], %s8134_s14 }
  0x4b   : > { %s8138_s16 = scalar_lea.vmem (!%p10083_p0), [#allocation2], %s5941_s19  ;;  %p10084_p5 = scmp.ne.s32.totalorder (!%p10083_p0), %s10073_s15, 0 }
  0x50   : > { %7903 = dma.done.wait (%p10084_p5), %s324_s20, 512  }
  0x51   : > { %7905 = vsyncadd (%p10084_p5), %s324_s20, 4294966784  ;;  %p10085_p11 = scmp.eq.s32.totalorder %s8010_s13, 0 }
  0x53   : > { %7907 = dma.done.wait (%p10085_p11), [#allocation6], 1536   ;;  %p10086_p2 = pmov %p10085_p11 }
  0x54   : > { %v380_v0 = vlaneseq  ;;  %v7934_v1 = vmov 0   ;;  %v7935_v2 = vmov 1983009808   ;;  %vm504_vm0 = vcmask 1040384   ;;  %v7278_v6 = vld [vmem:[#allocation5 + $0x24] ss:$8 sps:$4 sm:$0xff]  }
  0x55   : > { %7909 = vsyncadd (%p10086_p2), [#allocation6], 4294965760  ;;  %671 = vmatprep.mubr.bf16.mxu0 %v7934_v1  ;;  %v378_v3 = vunpack.c.l.s4 %v7935_v2  ;;  %vm505_vm1 = vcmask 1042434   ;;  %v7280_v7 = vld [vmem:[#allocation5 + $0x20] ss:$8 sps:$4 sm:$0xff]   ;;  %639 = vmatprep.subr.bf16.mxu0 %v7278_v6  ;;  %vm507_vm3 = vcmask 1044484  }
  0x56   : > { %v8149_v5 = vshrl.u32 %v380_v0, 7  ;;  %v7281_v9 = vld [vmem:[#allocation5 + $0x34] ss:$8 sps:$4 sm:$0xff]   ;;  %vm506_vm2 = vmor %vm504_vm0, %vm505_vm1  ;;  %640 = vmatpush1.bf16.msra.mxu0 %v7280_v7  ;;  %v7283_v10 = vld [vmem:[#allocation5 + $0x30] ss:$8 sps:$4 sm:$0xff]   ;;  %vm509_vm4 = vcmask 1046534  }
  0x57   : > { %v379_v4 = vunpack.c.0.s8 %v378_v3  ;;  %v7286_v11 = vld [vmem:[#allocation5 + $0x4] ss:$8 sps:$4 sm:$0xff]   ;;  %641 = vmatprep.subr.bf16.mxu0 %v7281_v9  ;;  %v370_v14 = vld [vmem:[%s8138_s16 + $0x10] sm:$0xff]  ;;  %vm508_vm5 = vmor %vm506_vm2, %vm507_vm3  ;;  %vm632_vm7 = vcmask 261120   ;;  %vm3619_vm3 = vcmask 1041409   ;;  %s5943_s18 = sshll.u32 %s8134_s14, 2 }
  0x58   : > { %v368_v12 = vld [vmem:[%s8138_s16] sm:$0xff]  ;;  %v369_v13 = vld [vmem:[%s8138_s16 + $0x8] sm:$0xff]  ;;  %v408_v19 = vcombine.high %v370_v14, %v370_v14  ;;  %vm8185_vm6 = vmor %vm508_vm5, %vm509_vm4  ;;  %vm3624_vm4 = vcmask 1043459   ;;  %s6812_s20 = sshll.u32 %s8010_s13, 6  ;;  %s5840_s13 = scalar_lea.sflag [#allocation4], %s8134_s14 }
  0x59   : > { %v8152_v8 = vsub.s32 %v379_v4, %v8149_v5  ;;  %v376_v15 = vcombine.high %v368_v12, %v368_v12  ;;  %v392_v17 = vcombine.high %v369_v13, %v369_v13  ;;  %v7300_v37 = vld [vmem:[%s10059_s3 + $0x284] ss:$20 sps:$4 sm:$0xff]   ;;  %v7305_v50 = vld [vmem:[%s10059_s3 + $0x280] ss:$20 sps:$4 sm:$0xff]   ;;  %v7311_v0 = vld [vmem:[%s10059_s3 + $0x2a8] ss:$20 sps:$4 sm:$0xff]   ;;  %s10012_s26 = scalar_lea.hbm %s10065_s9, %s6812_s20 }
  0x5a   : > { %642 = vmatpush1.bf16.msra.mxu0 %v7283_v10  ;;  %1728 = vmatprep.subr.bf16.mxu1 %v7300_v37  ;;  %v371_v49 = vld [vmem:[%s8138_s16 + $0x18] sm:$0xff]  ;;  %v7306_v55 = vld [vmem:[%s10059_s3 + $0x2ac] ss:$20 sps:$4 sm:$0xff]   ;;  %s365_s16 = scalar_lea.vmem [#allocation7], %s5943_s18  ;;  %s7938_s23 = smov [#allocation7]  }
  0x5b   : > { %v8159_v16 = vrot.slane %v368_v12, %v8152_v8  ;;  %v8162_v18 = vrot.slane %v369_v13, %v8152_v8  ;;  %v8165_v20 = vrot.slane %v370_v14, %v8152_v8  ;;  %v8168_v21 = vrot.slane %v376_v15, %v8152_v8  ;;  %716 = vmatprep.subr.bf16.mxu0 %v7286_v11  ;;  %s5853_s15 = sshll.u32 %s365_s16, 4  ;;  %s7862_s27 = sshll.u32 %s7938_s23, 4  ;;  %s10014_s15 = int_to_ptr.vmem [resolvable:$true] %s5853_s15  ;;  %s7863_s27 = int_to_ptr.vmem [resolvable:$false] %s7862_s27 }
  0x5c   : > { %v8175_v23 = vrot.slane %v392_v17, %v8152_v8  ;;  %v8182_v25 = vrot.slane %v408_v19, %v8152_v8  ;;  %1729 = vmatpush1.bf16.msra.mxu1 %v7305_v50  ;;  %v424_v61 = vcombine.high %v371_v49, %v371_v49  ;;  %v8235_v62 = vrot.slane %v371_v49, %v8152_v8  ;;  %s7858_s22 = scalar_lea.vmem %s10014_s15, 64  ;;  %s7864_s21 = scalar_lea.vmem %s7863_s27, 128 }
  0x5d   : > { %v8172_v22 = vcombine.high %v8159_v16, %v8159_v16  ;;  %v8179_v24 = vcombine.high %v8162_v18, %v8162_v18  ;;  %v5944_v27 = vrot.slane %v8159_v16, 9  ;;  %v5945_v28 = vrot.slane %v8162_v18, 9  ;;  %1730 = vmatprep.subr.bf16.mxu1 %v7306_v55  ;;  %p7859_p4 = scmp.ne.s32.totalorder %s10014_s15, %s7858_s22  ;;  %p7865_p10 = scmp.lt.s32.totalorder %s10014_s15, %s7863_s27 }
  0x5e   : > { %v8193_v29 = vcombine.high %v8165_v20, %v8165_v20  ;;  %v500_v30 = vcombine.high %v8168_v21, %v8168_v21  ;;  %v8199_v31 = vcombine.high %v8175_v23, %v8175_v23  ;;  %v516_v33 = vrot.slane %v8168_v21, 7  ;;  %p7866_p13 = scmp.lt.s32.totalorder %s7864_s21, %s7858_s22 }
  0x5f   : > { %v513_v32 = vrot.slane %v8172_v22, 7  ;;  %v523_v34 = vrot.slane %v8179_v24, 7  ;;  %v526_v35 = vrot.slane %v8175_v23, 7  ;;  %v5946_v36 = vrot.slane %v8165_v20, 9  ;;  %p7860_p6 = pnand %p7859_p4, %p8083_p12 }
  0x60   : > { %v519_v40 = vrot.slane %v500_v30, 7  ;;  %v529_v41 = vrot.slane %v8199_v31, 7  ;;  %v518_v42 = vrot.slane %v516_v33, 2  ;;  %v533_v47 = vrot.slane %v8193_v29, 7  ;;  %1731 = vmatpush1.bf16.msra.mxu1 %v7311_v0  ;;  %p7867_p3 = por %p7866_p13, %p7865_p10 }
  0x61   : > { %v514_v38 = vsel %vm8185_vm6, %v5944_v27, %v513_v32  ;;  %v515_v39 = vrot.slane %v513_v32, 2  ;;  %v524_v43 = vsel %vm8185_vm6, %v5945_v28, %v523_v34  ;;  %v525_v44 = vrot.slane %v523_v34, 2  ;;  %v7284_v27 = vld [vmem:[#allocation5] ss:$8 sps:$4 sm:$0xff]   ;;  %v7292_v32 = vld [vmem:[#allocation5 + $0x14] ss:$8 sps:$4 sm:$0xff]   ;;  %p7861_p8 = pneg %p7860_p6 }
  0x62   : > { %v528_v45 = vrot.slane %v526_v35, 2  ;;  %v536_v48 = vrot.slane %v8182_v25, 7  ;;  %v520_v51 = vsel %vm8185_vm6, %v518_v42, %v519_v40  ;;  %v534_v56 = vsel %vm8185_vm6, %v5946_v36, %v533_v47 }
  0x63   : > { %v517_v46 = vsel %vm8185_vm6, %v515_v39, %v516_v33  ;;  %v527_v52 = vsel %vm8185_vm6, %v525_v44, %v526_v35  ;;  %v535_v57 = vrot.slane %v533_v47, 2  ;;  %v552_v58 = vcombine.low %v520_v51, %v524_v43  ;;  %p7868_p7 = pnand %p7867_p3, %p7861_p8 }
  0x64   : > { %v530_v53 = vsel %vm8185_vm6, %v528_v45, %v529_v41  ;;  %v551_v54 = vcombine.low %v514_v38, %v517_v46  ;;  %v502_v63 = vcombine.high %v8182_v25, %v8182_v25  ;;  %v538_v6 = vrot.slane %v536_v48, 2  ;;  %v7290_v41 = vld [vmem:[#allocation5 + $0x10] ss:$8 sps:$4 sm:$0xff]   ;;  %v7296_v46 = vld [vmem:[#allocation5 + $0x44] ss:$8 sps:$4 sm:$0xff]  }
  0x65   : > { %v568_v59 = vcombine.low %v527_v52, %v530_v53  ;;  %v537_v2 = vsel %vm8185_vm6, %v535_v57, %v536_v48  ;;  %v566_v3 = vrot.slane %v552_v58, %v8152_v8  ;;  %v8247_v9 = vrot.slane %v424_v61, %v8152_v8  ;;  %v7294_v57 = vld [vmem:[#allocation5 + $0x40] ss:$8 sps:$4 sm:$0xff]  }
  0x66   : > { %v559_v60 = vrot.slane %v551_v54, %v8152_v8  ;;  %v569_v7 = vcombine.low %v534_v56, %v537_v2  ;;  %v439_v10 = vcombine.high %v8235_v62, %v8235_v62  ;;  %v539_v11 = vrot.slane %v502_v63, 7  ;;  %v7297_v63 = vld [vmem:[#allocation5 + $0x50] ss:$8 sps:$4 sm:$0xff]  }
  0x67   : > { %v576_v4 = vrot.slane %v568_v59, %v8152_v8  ;;  %v5947_v13 = vrot.slane %v8235_v62, 9  ;;  %v8255_v15 = vcombine.high %v8247_v9, %v8247_v9  ;;  %v546_v28 = vrot.slane %v8247_v9, 7  ;;  %v7299_v59 = vld [vmem:[#allocation5 + $0x54] ss:$8 sps:$4 sm:$0xff]  }
  0x68   : > { %v567_v12 = vcombine.low %v559_v60, %v566_v3  ;;  %v583_v14 = vrot.slane %v569_v7, %v8152_v8  ;;  %v540_v17 = vsel %vm8185_vm6, %v538_v6, %v539_v11  ;;  %v543_v19 = vrot.slane %v439_v10, 7  ;;  %v7304_v7 = vld [vmem:[%s10059_s3 + $0x28c] ss:$20 sps:$4 sm:$0xff]  }
  0x69   : > { %v549_v35 = vrot.slane %v8255_v15, 7  ;;  %v548_v36 = vrot.slane %v546_v28, 2  ;;  %v457_v40 = vcombine.low %v8179_v24, %v8175_v23  ;;  %v440_v43 = vcombine.low %v8159_v16, %v8172_v22 }
  0x6a   : > { %v584_v30 = vcombine.low %v576_v4, %v583_v14  ;;  %v544_v33 = vsel %vm8185_vm6, %v5947_v13, %v543_v19  ;;  %v545_v34 = vrot.slane %v543_v19, 2  ;;  %v441_v47 = vcombine.low %v8168_v21, %v8162_v18  ;;  %v7302_v13 = vld [vmem:[%s10059_s3 + $0x288] ss:$20 sps:$4 sm:$0xff]  }
  0x6b   : > { %v585_v37 = vcombine.low %v540_v17, %v544_v33  ;;  %v550_v42 = vsel %vm8185_vm6, %v548_v36, %v549_v35  ;;  %v458_v48 = vcombine.low %v8165_v20, %v8193_v29  ;;  %v448_v16 = vrot.slane %v440_v43, %v8152_v8  ;;  %v7320_v33 = vld [vmem:[%s10059_s3 + $0x300] ss:$20 sps:$4 sm:$0xff]   ;;  %v7323_v35 = vld [vmem:[%s10059_s3 + $0x2f8] ss:$20 sps:$4 sm:$0xff]   ;;  %v7335_v43 = vld [vmem:[%s10059_s3 + $0x348] ss:$20 sps:$4 sm:$0xff]  }
  0x6c   : > { %v605_v38 = vpack.c.bf16 %v584_v30, %v567_v12  ;;  %v547_v39 = vsel %vm8185_vm6, %v545_v34, %v546_v28  ;;  %v455_v50 = vrot.slane %v441_v47, %v8152_v8  ;;  %v465_v51 = vrot.slane %v457_v40, %v8152_v8  ;;  %v7316_v28 = vld [vmem:[%s10059_s3 + $0x2dc] ss:$20 sps:$4 sm:$0xff]   ;;  %v7314_v30 = vld [vmem:[%s10059_s3 + $0x2d8] ss:$20 sps:$4 sm:$0xff]  }
  0x6d   : > { %v586_v44 = vcombine.low %v547_v39, %v550_v42  ;;  %v593_v45 = vrot.slane %v585_v37, %v8152_v8  ;;  %v472_v52 = vrot.slane %v458_v48, %v8152_v8  ;;  %v474_v55 = vcombine.low %v8182_v25, %v8235_v62  ;;  %v7322_v34 = vld [vmem:[%s10059_s3 + $0x304] ss:$20 sps:$4 sm:$0xff]   ;;  %v7326_v37 = vld [vmem:[%s10059_s3 + $0x328] ss:$20 sps:$4 sm:$0xff]   ;;  %v7329_v39 = vld [vmem:[%s10059_s3 + $0x320] ss:$20 sps:$4 sm:$0xff]  }
  0x6e   : > { %5952 = vmatmul.mubr.msk.bf16.vlgmr.msra.gmra.mrb[0].mxu0 %vm632_vm7, %v605_v38  ;;  %v456_v20 = vcombine.low %v448_v16, %v455_v50  ;;  %v475_v56 = vcombine.low %v439_v10, %v8247_v9  ;;  %v767_v0 = vcombine.low %v8172_v22, %v8168_v21  ;;  %v784_v2 = vcombine.low %v8175_v23, %v8199_v31  ;;  %v7324_v36 = vld [vmem:[%s10059_s3 + $0x324] ss:$20 sps:$4 sm:$0xff]   ;;  %v7328_v38 = vld [vmem:[%s10059_s3 + $0x32c] ss:$20 sps:$4 sm:$0xff]   ;;  %v7342_v48 = vld [vmem:[%s10059_s3 + $0x39c] ss:$20 sps:$4 sm:$0xff]  }
  0x6f   : > { %717 = vmatpush1.bf16.msra.mxu0 %v7284_v27  ;;  %681 = vmatprep.mubr.bf16.mxu0 %v7934_v1  ;;  %v600_v24 = vrot.slane %v586_v44, %v8152_v8  ;;  %v473_v54 = vcombine.low %v465_v51, %v472_v52  ;;  %v482_v60 = vrot.slane %v474_v55, %v8152_v8  ;;  %v7310_v27 = vld [vmem:[%s10059_s3 + $0x2b4] ss:$20 sps:$4 sm:$0xff]   ;;  %v7330_v40 = vld [vmem:[%s10059_s3 + $0x34c] ss:$20 sps:$4 sm:$0xff]   ;;  %v7332_v42 = vld [vmem:[%s10059_s3 + $0x350] ss:$20 sps:$4 sm:$0xff]  }
  0x70   : > { %718 = vmatprep.subr.bf16.mxu0 %v7292_v32  ;;  %v489_v61 = vrot.slane %v475_v56, %v8152_v8  ;;  %v5960_v4 = vcombine.high %v8168_v21, %v8162_v18  ;;  %v785_v6 = vcombine.low %v8193_v29, %v8182_v25  ;;  %v775_v22 = vrot.slane %v767_v0, %v8152_v8  ;;  %v7318_v32 = vld [vmem:[%s10059_s3 + $0x2fc] ss:$20 sps:$4 sm:$0xff]   ;;  %v7336_v44 = vld [vmem:[%s10059_s3 + $0x374] ss:$20 sps:$4 sm:$0xff]   ;;  %v7346_v16 = vld [vmem:[%s10059_s3 + $0x3a4] ss:$20 sps:$4 sm:$0xff]  }
  0x71   : > { %v601_v49 = vcombine.low %v593_v45, %v600_v24  ;;  %v494_v58 = vpack.c.bf16 %v473_v54, %v456_v20  ;;  %v792_v10 = vrot.slane %v784_v2, %v8152_v8  ;;  %v5961_v11 = vcombine.high %v8182_v25, %v8235_v62  ;;  %v7308_v25 = vld [vmem:[%s10059_s3 + $0x2b0] ss:$20 sps:$4 sm:$0xff]   ;;  %v7344_v24 = vld [vmem:[%s10059_s3 + $0x3a0] ss:$20 sps:$4 sm:$0xff]   ;;  %v7350_v52 = vld [vmem:[%s10059_s3 + $0x3c8] ss:$20 sps:$4 sm:$0xff]  }
  0x72   : > { %v490_v3 = vcombine.low %v482_v60, %v489_v61  ;;  %v782_v31 = vrot.slane %v5960_v4, %v8152_v8  ;;  %v799_v18 = vrot.slane %v785_v6, %v8152_v8  ;;  %v802_v12 = vcombine.low %v8247_v9, %v8255_v15  ;;  %v7312_v15 = vld [vmem:[%s10059_s3 + $0x2d4] ss:$20 sps:$4 sm:$0xff]   ;;  %v7340_v45 = vld [vmem:[%s10059_s3 + $0x37c] ss:$20 sps:$4 sm:$0xff]   ;;  %v7348_v50 = vld [vmem:[%s10059_s3 + $0x3c4] ss:$20 sps:$4 sm:$0xff]  }
  0x73   : > { %719 = vmatpush1.bf16.msra.mxu0 %v7290_v41  ;;  %v606_v53 = vpack.c.bf16 %v601_v49, %v601_v49  ;;  %v809_v17 = vrot.slane %v5961_v11, %v8152_v8  ;;  %1732 = vmatprep.subr.bf16.mxu1 %v7312_v15  ;;  %v7334_v41 = vld [vmem:[%s10059_s3 + $0x354] ss:$20 sps:$4 sm:$0xff]   ;;  %v7341_v47 = vld [vmem:[%s10059_s3 + $0x370] ss:$20 sps:$4 sm:$0xff]   ;;  %v7347_v49 = vld [vmem:[%s10059_s3 + $0x398] ss:$20 sps:$4 sm:$0xff]  }
  0x74   : > { %854 = vmatprep.subr.bf16.mxu0 %v7296_v46  ;;  %v495_v23 = vpack.c.bf16 %v490_v3, %v490_v3  ;;  %v783_v21 = vcombine.low %v775_v22, %v782_v31  ;;  %v800_v29 = vcombine.low %v792_v10, %v799_v18  ;;  %v816_v19 = vrot.slane %v802_v12, %v8152_v8  ;;  %v7338_v46 = vld [vmem:[%s10059_s3 + $0x378] ss:$20 sps:$4 sm:$0xff]   ;;  %v7358_v54 = vld [vmem:[%s10059_s3 + $0x3f4] ss:$20 sps:$4 sm:$0xff]   ;;  %v7356_v55 = vld [vmem:[%s10059_s3 + $0x3f0] ss:$20 sps:$4 sm:$0xff]  }
  0x75   : > { %v7352_v51 = vld [vmem:[%s10059_s3 + $0x3cc] ss:$20 sps:$4 sm:$0xff]   ;;  %v7359_v56 = vld [vmem:[%s10059_s3 + $0x3e8] ss:$20 sps:$4 sm:$0xff]   ;;  %v7365_v60 = vld [vmem:[%s10059_s3 + $0x410] ss:$20 sps:$4 sm:$0xff]  }
  0x76   : > { %5953 = vmatmul.mubr.msk.bf16.gmra.mrb[4].mxu0 %vm632_vm7, %v606_v53  ;;  %v821_v14 = vpack.c.bf16 %v800_v29, %v783_v21  ;;  %v817_v62 = vcombine.low %v809_v17, %v816_v19  ;;  %v7353_v53 = vld [vmem:[%s10059_s3 + $0x3c0] ss:$20 sps:$4 sm:$0xff]   ;;  %v7366_v61 = vld [vmem:[%s10059_s3 + $0x43c] ss:$20 sps:$4 sm:$0xff]   ;;  %v7371_v2 = vld [vmem:[%s10059_s3 + $0x438] ss:$20 sps:$4 sm:$0xff]  }
  0x77   : > { %748 = vmatprep.mubr.bf16.mxu0 %v7934_v1  ;;  %v7354_v20 = vld [vmem:[%s10059_s3 + $0x3ec] ss:$20 sps:$4 sm:$0xff]   ;;  %v7372_v3 = vld [vmem:[%s10059_s3 + $0x464] ss:$20 sps:$4 sm:$0xff]   ;;  %v7374_v6 = vld [vmem:[%s10059_s3 + $0x468] ss:$20 sps:$4 sm:$0xff]  }
  0x78   : > { %v822_v9 = vpack.c.bf16 %v817_v62, %v817_v62  ;;  %v7368_v0 = vld [vmem:[%s10059_s3 + $0x440] ss:$20 sps:$4 sm:$0xff]   ;;  %v7383_v10 = vld [vmem:[%s10059_s3 + $0x488] ss:$20 sps:$4 sm:$0xff]   ;;  %v7386_v21 = vld [vmem:[%s10059_s3 + $0x4b8] ss:$20 sps:$4 sm:$0xff]  }
  0x79   : > { %v7376_v4 = vld [vmem:[%s10059_s3 + $0x46c] ss:$20 sps:$4 sm:$0xff]   ;;  %v7382_v31 = vld [vmem:[%s10059_s3 + $0x494] ss:$20 sps:$4 sm:$0xff]   ;;  %v7388_v29 = vld [vmem:[%s10059_s3 + $0x4bc] ss:$20 sps:$4 sm:$0xff]  }
  0x7a   : > { %v7378_v22 = vld [vmem:[%s10059_s3 + $0x48c] ss:$20 sps:$4 sm:$0xff]   ;;  %v7384_v18 = vld [vmem:[%s10059_s3 + $0x4b4] ss:$20 sps:$4 sm:$0xff]   ;;  %v7389_v11 = vld [vmem:[%s10059_s3 + $0x4b0] ss:$20 sps:$4 sm:$0xff]  }
  0x7b   : > { %v7390_v12 = vld [vmem:[%s10059_s3 + $0x4dc] ss:$20 sps:$4 sm:$0xff]   ;;  %v7395_v17 = vld [vmem:[%s10059_s3 + $0x4d8] ss:$20 sps:$4 sm:$0xff]  }
  0x7c   : > { %v7396_v19 = vld [vmem:[%s10059_s3 + $0x3d0] ss:$20 sps:$4 sm:$0xff]  }
  0x7e   : > { %5958 = vmatmul.mubr.msk.bf16.vlgmr.msra.gmra.mrb[0].mxu0 %vm632_vm7, %v494_v58  ;;  %v7364_v58 = vld [vmem:[%s10059_s3 + $0x41c] ss:$20 sps:$4 sm:$0xff]  }
  0x7f   : > { %855 = vmatpush1.bf16.msra.mxu0 %v7294_v57  ;;  %758 = vmatprep.mubr.bf16.mxu0 %v7934_v1  ;;  %v7360_v57 = vld [vmem:[%s10059_s3 + $0x414] ss:$20 sps:$4 sm:$0xff]  }
  0x80   : > { %856 = vmatprep.subr.bf16.mxu0 %v7299_v59  ;;  %v7362_v59 = vld [vmem:[%s10059_s3 + $0x418] ss:$20 sps:$4 sm:$0xff]  }
  0x83   : > { %857 = vmatpush1.bf16.msra.mxu0 %v7297_v63  ;;  %v7370_v63 = vld [vmem:[%s10059_s3 + $0x444] ss:$20 sps:$4 sm:$0xff]  }
  0x84   : > { %1771 = vmatprep.subr.bf16.mxu0 %v7304_v7  ;;  %v7377_v7 = vld [vmem:[%s10059_s3 + $0x460] ss:$20 sps:$4 sm:$0xff]  }
  0x86   : > { %5959 = vmatmul.mubr.msk.bf16.gmra.mrb[8].mxu0 %vm632_vm7, %v495_v23  ;;  %v7380_v23 = vld [vmem:[%s10059_s3 + $0x490] ss:$20 sps:$4 sm:$0xff]  }
  0x87   : > { %886 = vmatprep.mubr.bf16.mxu0 %v7934_v1 }
  0x8e   : > { %5966 = vmatmul.mubr.msk.bf16.vlgmr.msra.gmra.mrb[0].mxu0 %vm632_vm7, %v821_v14  ;;  %v7392_v14 = vld [vmem:[%s10059_s3 + $0x4e0] ss:$20 sps:$4 sm:$0xff]  }
  0x8f   : > { %896 = vmatprep.mubr.bf16.mxu0 %v7934_v1  ;;  %1772 = vmatpush1.bf16.msra.mxu0 %v7302_v13  ;;  %v7317_v1 = vld [vmem:[%s10059_s3 + $0x2d0] ss:$20 sps:$4 sm:$0xff]  }
  0x90   : > { %1773 = vmatprep.subr.bf16.mxu0 %v7310_v27  ;;  %1733 = vmatpush1.bf16.msra.mxu1 %v7317_v1  ;;  %v7394_v13 = vld [vmem:[%s10059_s3 + $0x4e4] ss:$20 sps:$4 sm:$0xff]   ;;  %v7399_v27 = vld [vmem:[%s10059_s3 + $0xc] ss:$20 sps:$4 sm:$0xff]  }
  0x91   : > { %1734 = vmatprep.subr.bf16.mxu1 %v7318_v32  ;;  %v8502_v32 = vsub.s32 0, %v8149_v5 }
  0x93   : > { %1774 = vmatpush1.bf16.msra.mxu0 %v7308_v25 }
  0x94   : > { %1775 = vmatprep.subr.bf16.mxu0 %v7316_v28  ;;  %1735 = vmatpush1.bf16.msra.mxu1 %v7323_v35  ;;  %v911_v35 = vld [vmem:[%s10058_s2] sm:$0x3] }
  0x95   : > { %1736 = vmatprep.subr.bf16.mxu1 %v7324_v36  ;;  %v8508_v36 = vsub.s32 1, %v8149_v5 }
  0x96   : > { %5967 = vmatmul.mubr.msk.bf16.gmra.mrb[12].mxu0 %vm632_vm7, %v822_v9 }
  0x97   : > { %1776 = vmatpush1.bf16.msra.mxu0 %v7314_v30 }
  0x98   : > { %1777 = vmatprep.subr.bf16.mxu0 %v7322_v34  ;;  %1737 = vmatpush1.bf16.msra.mxu1 %v7329_v39  ;;  %v920_v39 = vrot.slane %v911_v35, %v8508_v36 }
  0x99   : > { %1738 = vmatprep.subr.bf16.mxu1 %v7330_v40 }
  0x9b   : > { %1778 = vmatpush1.bf16.msra.mxu0 %v7320_v33 }
  0x9c   : > { %1779 = vmatprep.subr.bf16.mxu0 %v7328_v38  ;;  %1739 = vmatpush1.bf16.msra.mxu1 %v7335_v43  ;;  %v916_v38 = vrot.slane %v911_v35, %v8502_v32 }
  0x9d   : > { %1740 = vmatprep.subr.bf16.mxu1 %v7336_v44 }
  0x9f   : > { %1780 = vmatpush1.bf16.msra.mxu0 %v7326_v37 }
  0xa0   : > { %1781 = vmatprep.subr.bf16.mxu0 %v7334_v41  ;;  %1741 = vmatpush1.bf16.msra.mxu1 %v7341_v47 }
  0xa1   : > { %1742 = vmatprep.subr.bf16.mxu1 %v7342_v48 }
  0xa3   : > { %1782 = vmatpush1.bf16.msra.mxu0 %v7332_v42 }
  0xa4   : > { %1783 = vmatprep.subr.bf16.mxu0 %v7340_v45  ;;  %1743 = vmatpush1.bf16.msra.mxu1 %v7347_v49 }
  0xa5   : > { %1744 = vmatprep.subr.bf16.mxu1 %v7348_v50 }
  0xa7   : > { %1784 = vmatpush1.bf16.msra.mxu0 %v7338_v46 }
  0xa8   : > { %1785 = vmatprep.subr.bf16.mxu0 %v7346_v16  ;;  %1745 = vmatpush1.bf16.msra.mxu1 %v7353_v53 }
  0xa9   : > { %1746 = vmatprep.subr.bf16.mxu1 %v7354_v20 }
  0xab   : > { %1786 = vmatpush1.bf16.msra.mxu0 %v7344_v24 }
  0xac   : > { %1787 = vmatprep.subr.bf16.mxu0 %v7352_v51  ;;  %1747 = vmatpush1.bf16.msra.mxu1 %v7359_v56 }
  0xad   : > { %1748 = vmatprep.subr.bf16.mxu1 %v7360_v57 }
  0xaf   : > { %1788 = vmatpush1.bf16.msra.mxu0 %v7350_v52 }
  0xb0   : > { %1789 = vmatprep.subr.bf16.mxu0 %v7358_v54  ;;  %1749 = vmatpush1.bf16.msra.mxu1 %v7365_v60 }
  0xb1   : > { %1750 = vmatprep.subr.bf16.mxu1 %v7366_v61 }
  0xb3   : > { %1790 = vmatpush1.bf16.msra.mxu0 %v7356_v55 }
  0xb4   : > { %1791 = vmatprep.subr.bf16.mxu0 %v7364_v58  ;;  %1751 = vmatpush1.bf16.msra.mxu1 %v7371_v2 }
  0xb5   : > { %1752 = vmatprep.subr.bf16.mxu1 %v7372_v3 }
  0xb7   : > { %1792 = vmatpush1.bf16.msra.mxu0 %v7362_v59 }
  0xb8   : > { %1793 = vmatprep.subr.bf16.mxu0 %v7370_v63  ;;  %1753 = vmatpush1.bf16.msra.mxu1 %v7377_v7 }
  0xb9   : > { %1754 = vmatprep.subr.bf16.mxu1 %v7378_v22 }
  0xbb   : > { %1794 = vmatpush1.bf16.msra.mxu0 %v7368_v0 }
  0xbc   : > { %1795 = vmatprep.subr.bf16.mxu0 %v7376_v4  ;;  %1755 = vmatpush1.bf16.msra.mxu1 %v7383_v10 }
  0xbd   : > { %1756 = vmatprep.subr.bf16.mxu1 %v7384_v18 }
  0xbf   : > { %1796 = vmatpush1.bf16.msra.mxu0 %v7374_v6 }
  0xc0   : > { %1797 = vmatprep.subr.bf16.mxu0 %v7382_v31  ;;  %1757 = vmatpush1.bf16.msra.mxu1 %v7389_v11 }
  0xc1   : > { %1758 = vmatprep.subr.bf16.mxu1 %v7390_v12 }
  0xc3   : > { %1798 = vmatpush1.bf16.msra.mxu0 %v7380_v23 }
  0xc4   : > { %1799 = vmatprep.subr.bf16.mxu0 %v7388_v29  ;;  %1759 = vmatpush1.bf16.msra.mxu1 %v7395_v17 }
  0xc5   : > { %6816 = vmatprep.subr.bf16.mxu1 %v7396_v19 }
  0xc7   : > { %1800 = vmatpush1.bf16.msra.mxu0 %v7386_v21 }
  0xc8   : > { %1801 = vmatprep.subr.bf16.mxu0 %v7394_v13 }
  0xcb   : > { %1802 = vmatpush1.bf16.msra.mxu0 %v7392_v14 }
  0xcc   : > { %2314 = vmatprep.subr.bf16.mxu0 %v7399_v27 }
 0x149   : > { %v683_v25 = vpop.f32.mrb[4].mxu0 }
 0x14a   : > { %v685_v62 = vpop.f32.mrb[5].mxu0 }
 0x14b   : > { %v687_v9 = vpop.f32.mrb[6].mxu0 }
 0x14c   : > { %v688_v15 = vpop.f32.mrb[7].mxu0 }
 0x159   : > { %v760_v28 = vpop.f32.mrb[8].mxu0 }
 0x15a   : > { %v761_v30 = vadd.f32 %v760_v28, %v683_v25  ;;  %v762_v1 = vpop.f32.mrb[9].mxu0 }
 0x15b   : > { %v763_v33 = vadd.f32 %v762_v1, %v685_v62  ;;  %v764_v34 = vpop.f32.mrb[10].mxu0 }
 0x15c   : > { %v765_v37 = vpop.f32.mrb[11].mxu0 }
 0x161   : > { %v888_v40 = vpop.f32.mrb[0].mxu0 }
 0x162   : > { %v923_v41 = vadd.f32 %v916_v38, %v888_v40  ;;  %v890_v42 = vpop.f32.mrb[1].mxu0 }
 0x163   : > { %v924_v43 = vadd.f32 %v920_v39, %v890_v42  ;;  %v892_v44 = vpop.f32.mrb[2].mxu0 }
 0x164   : > { %vm929_vm8 = vcmp.gt.f32.partialorder %v923_v41, 0.0  ;;  %v935_v45 = vmul.f32 0.01, %v923_v41  ;;  %v925_v46 = vadd.f32 %v916_v38, %v892_v44  ;;  %v894_v47 = vpop.f32.mrb[3].mxu0 }
 0x165   : > { %vm930_vm9 = vcmp.gt.f32.partialorder %v924_v43, 0.0  ;;  %v936_v48 = vmul.f32 0.01, %v924_v43  ;;  %v926_v24 = vadd.f32 %v920_v39, %v894_v47 }
 0x166   : > { %v941_v16 = vsel %vm929_vm8, %v923_v41, %v935_v45  ;;  %vm931_vm10 = vcmp.gt.f32.partialorder %v925_v46, 0.0  ;;  %v937_v49 = vmul.f32 0.01, %v925_v46 }
 0x167   : > { %v942_v50 = vsel %vm930_vm9, %v924_v43, %v936_v48  ;;  %vm932_vm11 = vcmp.gt.f32.partialorder %v926_v24, 0.0  ;;  %v938_v51 = vmul.f32 0.01, %v926_v24 }
 0x168   : > { %v953_v52 = vcombine.low %v941_v16, %v942_v50  ;;  %v954_v53 = vcombine.high %v941_v16, %v942_v50  ;;  %v943_v20 = vsel %vm931_vm10, %v925_v46, %v937_v49 }
 0x169   : > { %v944_v54 = vsel %vm932_vm11, %v926_v24, %v938_v51  ;;  %v898_v55 = vpop.f32.mrb[12].mxu0  ;;  %vm7937_vm11 = vmmov 0  }
 0x16a   : > { %v961_v56 = vrot.slane %v953_v52, %v8152_v8  ;;  %v968_v57 = vrot.slane %v954_v53, %v8152_v8  ;;  %v971_v58 = vcombine.low %v943_v20, %v944_v54  ;;  %v972_v59 = vcombine.high %v943_v20, %v944_v54  ;;  %v900_v60 = vpop.f32.mrb[13].mxu0 }
 0x16b   : > { %v909_v61 = vadd.f32 %v898_v55, %v761_v30  ;;  %v910_v63 = vadd.f32 %v900_v60, %v763_v33  ;;  %v902_v0 = vpop.f32.mrb[14].mxu0 }
 0x16c   : > { %v969_v2 = vcombine.high %v961_v56, %v961_v56  ;;  %v970_v3 = vcombine.high %v968_v57, %v968_v57  ;;  %v5968_v4 = vrot.slane %v961_v56, 9  ;;  %v903_v6 = vpop.f32.mrb[15].mxu0  ;;  %v979_v7 = vrot.slane %v971_v58, %v8152_v8 }
 0x16d   : > { %v8516_v22 = vrot.slane %v972_v59, %v8152_v8  ;;  %v927_v23 = vadd.f32 %v916_v38, %v909_v61  ;;  %v928_v31 = vadd.f32 %v920_v39, %v910_v63  ;;  %v1150_v10 = vrot.slane %v968_v57, 7 }
 0x16e   : > { %v5969_v18 = vrot.slane %v970_v3, 9  ;;  %v1147_v21 = vrot.slane %v969_v2, 7  ;;  %v2398_v29 = vcombine.low %v969_v2, %v968_v57  ;;  %v987_v11 = vcombine.high %v979_v7, %v979_v7 }
 0x16f   : > { %v988_v12 = vcombine.high %v8516_v22, %v8516_v22  ;;  %vm933_vm12 = vcmp.gt.f32.partialorder %v927_v23, 0.0  ;;  %v1007_v13 = vcombine.low %v961_v56, %v969_v2  ;;  %v5970_v14 = vrot.slane %v8516_v22, 9 }
 0x170   : > { %v939_v17 = vmul.f32 0.01, %v927_v23  ;;  %vm934_vm13 = vcmp.gt.f32.partialorder %v928_v31, 0.0  ;;  %v940_v19 = vmul.f32 0.01, %v928_v31  ;;  %v1148_v27 = vsel %vm8185_vm6, %v5968_v4, %v1147_v21 }
 0x171   : > { %v1149_v25 = vrot.slane %v1147_v21, 2  ;;  %v1154_v62 = vrot.slane %v979_v7, 7  ;;  %v1161_v9 = vrot.slane %v988_v12, 7  ;;  %v1157_v30 = vrot.slane %v987_v11, 7 }
 0x172   : > { %v945_v15 = vsel %vm933_vm12, %v927_v23, %v939_v17  ;;  %v946_v28 = vsel %vm934_vm13, %v928_v31, %v940_v19  ;;  %v1008_v1 = vcombine.low %v970_v3, %v979_v7  ;;  %v1015_v41 = vrot.slane %v1007_v13, %v8152_v8 }
 0x173   : > { %v989_v33 = vcombine.low %v945_v15, %v946_v28  ;;  %v990_v34 = vcombine.high %v945_v15, %v946_v28  ;;  %v1151_v35 = vsel %vm8185_vm6, %v1149_v25, %v1150_v10  ;;  %v1155_v37 = vsel %vm8185_vm6, %v5969_v18, %v1154_v62 }
 0x174   : > { %v1156_v38 = vrot.slane %v1154_v62, 2  ;;  %v1162_v39 = vsel %vm8185_vm6, %v5970_v14, %v1161_v9  ;;  %v1173_v40 = vcombine.low %v1148_v27, %v1151_v35  ;;  %v1163_v44 = vrot.slane %v1161_v9, 2  ;;  %v7402_v35 = vld [vmem:[%s10059_s3 + $0x30] ss:$20 sps:$4 sm:$0xff]  }
 0x175   : > { %v997_v42 = vrot.slane %v989_v33, %v8152_v8  ;;  %v1004_v43 = vrot.slane %v990_v34, %v8152_v8  ;;  %v1022_v45 = vrot.slane %v1008_v1, %v8152_v8  ;;  %v1025_v48 = vcombine.low %v8516_v22, %v988_v12  ;;  %v7400_v1 = vld [vmem:[%s10059_s3 + $0x290] ss:$20 sps:$4 sm:$0xff]   ;;  %v7401_v33 = vld [vmem:[%s10059_s3 + $0x3f8] ss:$20 sps:$4 sm:$0xff]   ;;  %v7404_v34 = vld [vmem:[%s10059_s3 + $0x34] ss:$20 sps:$4 sm:$0xff]  }
 0x176   : > { %v1158_v46 = vsel %vm8185_vm6, %v1156_v38, %v1157_v30  ;;  %v1181_v47 = vrot.slane %v1173_v40, %v8152_v8  ;;  %v2399_v24 = vcombine.low %v979_v7, %v987_v11  ;;  %v2406_v54 = vrot.slane %v2398_v29, %v8152_v8  ;;  %v7406_v38 = vld [vmem:[%s10059_s3 + $0x420] ss:$20 sps:$4 sm:$0xff]   ;;  %v7407_v40 = vld [vmem:[%s10059_s3 + $0x58] ss:$20 sps:$4 sm:$0xff]  }
 0x177   : > { %v1005_v16 = vcombine.high %v997_v42, %v997_v42  ;;  %v1164_v49 = vrot.slane %v997_v42, 7  ;;  %v1006_v50 = vcombine.high %v1004_v43, %v1004_v43  ;;  %v1168_v51 = vrot.slane %v1004_v43, 7 }
 0x178   : > { %v1174_v52 = vcombine.low %v1155_v37, %v1158_v46  ;;  %v1024_v53 = vcombine.high %v1015_v41, %v1022_v45  ;;  %v1023_v20 = vcombine.low %v1015_v41, %v1022_v45  ;;  %v2413_v63 = vrot.slane %v2399_v24, %v8152_v8  ;;  %v7405_v37 = vld [vmem:[%s10059_s3 + $0x2b8] ss:$20 sps:$4 sm:$0xff]   ;;  %v7410_v41 = vld [vmem:[%s10059_s3 + $0x2e0] ss:$20 sps:$4 sm:$0xff]   ;;  %v7415_v45 = vld [vmem:[%s10059_s3 + $0x308] ss:$20 sps:$4 sm:$0xff]  }
 0x179   : > { %v1165_v55 = vsel %vm8185_vm6, %v1163_v44, %v1164_v49  ;;  %v5971_v56 = vrot.slane %v1005_v16, 9  ;;  %v1170_v57 = vrot.slane %v1168_v51, 2  ;;  %v1171_v58 = vrot.slane %v1006_v50, 7  ;;  %v7412_v44 = vld [vmem:[%s10059_s3 + $0x80] ss:$20 sps:$4 sm:$0xff]  }
 0x17a   : > { %v1188_v59 = vrot.slane %v1174_v52, %v8152_v8  ;;  %v1191_v60 = vcombine.low %v1162_v39, %v1165_v55  ;;  %v1026_v61 = vcombine.low %v1005_v16, %v1004_v43  ;;  %v2416_v3 = vcombine.low %v988_v12, %v997_v42  ;;  %v7409_v39 = vld [vmem:[%s10059_s3 + $0x5c] ss:$20 sps:$4 sm:$0xff]   ;;  %v7421_v16 = vld [vmem:[%s10059_s3 + $0x498] ss:$20 sps:$4 sm:$0xff]   ;;  %v7424_v49 = vld [vmem:[%s10059_s3 + $0xd4] ss:$20 sps:$4 sm:$0xff]  }
 0x17b   : > { %v1169_v0 = vsel %vm8185_vm6, %v5971_v56, %v1168_v51  ;;  %v1172_v2 = vsel %vm8185_vm6, %v1170_v57, %v1171_v58  ;;  %v2417_v4 = vcombine.low %v1004_v43, %v1006_v50  ;;  %v1033_v23 = vrot.slane %v1025_v48, %v8152_v8  ;;  %v7411_v42 = vld [vmem:[%s10059_s3 + $0x448] ss:$20 sps:$4 sm:$0xff]   ;;  %v7414_v43 = vld [vmem:[%s10059_s3 + $0x84] ss:$20 sps:$4 sm:$0xff]   ;;  %v7426_v52 = vld [vmem:[%s10059_s3 + $0x4c0] ss:$20 sps:$4 sm:$0xff]  }
 0x17c   : > { %v1190_v6 = vcombine.high %v1181_v47, %v1188_v59  ;;  %v1192_v7 = vcombine.low %v1169_v0, %v1172_v2  ;;  %v1189_v22 = vcombine.low %v1181_v47, %v1188_v59  ;;  %v1040_v31 = vrot.slane %v1026_v61, %v8152_v8  ;;  %v7416_v46 = vld [vmem:[%s10059_s3 + $0x470] ss:$20 sps:$4 sm:$0xff]   ;;  %v7419_v47 = vld [vmem:[%s10059_s3 + $0xac] ss:$20 sps:$4 sm:$0xff]   ;;  %v7417_v48 = vld [vmem:[%s10059_s3 + $0xa8] ss:$20 sps:$4 sm:$0xff]  }
 0x17d   : > { %v2415_v10 = vcombine.high %v2406_v54, %v2413_v63  ;;  %v2424_v18 = vrot.slane %v2416_v3, %v8152_v8  ;;  %v2431_v21 = vrot.slane %v2417_v4, %v8152_v8  ;;  %v1199_v29 = vrot.slane %v1191_v60, %v8152_v8  ;;  %v7420_v24 = vld [vmem:[%s10059_s3 + $0x330] ss:$20 sps:$4 sm:$0xff]   ;;  %v7425_v51 = vld [vmem:[%s10059_s3 + $0x358] ss:$20 sps:$4 sm:$0xff]   ;;  %v7431_v55 = vld [vmem:[%s10059_s3 + $0x4e8] ss:$20 sps:$4 sm:$0xff]  }
 0x17e   : > { %v1206_v11 = vrot.slane %v1192_v7, %v8152_v8  ;;  %v2414_v26 = vcombine.low %v2406_v54, %v2413_v63  ;;  %v1042_v13 = vcombine.high %v1033_v23, %v1040_v31  ;;  %v1041_v12 = vcombine.low %v1033_v23, %v1040_v31  ;;  %v7397_v8 = vld [vmem:[%s10059_s3 + $0x8] ss:$20 sps:$4 sm:$0xff]   ;;  %v7422_v50 = vld [vmem:[%s10059_s3 + $0xd0] ss:$20 sps:$4 sm:$0xff]   ;;  %v7430_v54 = vld [vmem:[%s10059_s3 + $0x380] ss:$20 sps:$4 sm:$0xff]  }
 0x17f   : > { %v2433_v14 = vcombine.high %v2424_v18, %v2431_v21  ;;  %v2432_v17 = vcombine.low %v2424_v18, %v2431_v21  ;;  %v7434_v56 = vld [vmem:[%s10059_s3 + $0x124] ss:$20 sps:$4 sm:$0xff]   ;;  %v7432_v57 = vld [vmem:[%s10059_s3 + $0x120] ss:$20 sps:$4 sm:$0xff]   ;;  %v7435_v58 = vld [vmem:[%s10059_s3 + $0x3a8] ss:$20 sps:$4 sm:$0xff]  }
 0x180   : > { %v1208_v19 = vcombine.high %v1199_v29, %v1206_v11  ;;  %v1207_v27 = vcombine.low %v1199_v29, %v1206_v11  ;;  %v8552_v25 = vpack.c.bf16 %v1042_v13, %v1024_v53  ;;  %v8554_v62 = vpack.c.bf16 %v1041_v12, %v1023_v20  ;;  %v7429_v53 = vld [vmem:[%s10059_s3 + $0xfc] ss:$20 sps:$4 sm:$0xff]   ;;  %v7427_v20 = vld [vmem:[%s10059_s3 + $0xf8] ss:$20 sps:$4 sm:$0xff]   ;;  %v7436_v61 = vld [vmem:[%s10059_s3] ss:$20 sps:$4 sm:$0xff]  }
 0x181   : > { %v8556_v9 = vpack.c.bf16 %v2433_v14, %v2415_v10  ;;  %v8558_v15 = vpack.c.bf16 %v2432_v17, %v2414_v26  ;;  %v7438_v59 = vld [vmem:[%s10059_s3 + $0x4] ss:$20 sps:$4 sm:$0xff]   ;;  %v7441_v60 = vld [vmem:[%s10059_s3 + $0x14c] ss:$20 sps:$4 sm:$0xff]   ;;  %v7439_v63 = vld [vmem:[%s10059_s3 + $0x148] ss:$20 sps:$4 sm:$0xff]  }
 0x182   : > { %v1214_v28 = vpack.c.bf16 %v1208_v19, %v1190_v6  ;;  %v8563_v30 = vpack.c.bf16 %v1207_v27, %v1189_v22  ;;  %v7444_v0 = vld [vmem:[%s10059_s3 + $0x2c] ss:$20 sps:$4 sm:$0xff]   ;;  %v7447_v2 = vld [vmem:[%s10059_s3 + $0x174] ss:$20 sps:$4 sm:$0xff]   ;;  %v7445_v4 = vld [vmem:[%s10059_s3 + $0x170] ss:$20 sps:$4 sm:$0xff]  }
 0x183   : > { %v7442_v3 = vld [vmem:[%s10059_s3 + $0x28] ss:$20 sps:$4 sm:$0xff]   ;;  %v7448_v22 = vld [vmem:[%s10059_s3 + $0x50] ss:$20 sps:$4 sm:$0xff]   ;;  %v7451_v23 = vld [vmem:[%s10059_s3 + $0x198] ss:$20 sps:$4 sm:$0xff]  }
 0x184   : > { %1760 = vmatprep.mubr.bf16.mxu1 %v1214_v28  ;;  %1803 = vmatprep.mubr.bf16.mxu0 %v1214_v28  ;;  %v7450_v6 = vld [vmem:[%s10059_s3 + $0x54] ss:$20 sps:$4 sm:$0xff]   ;;  %v7453_v7 = vld [vmem:[%s10059_s3 + $0x19c] ss:$20 sps:$4 sm:$0xff]   ;;  %v7459_v10 = vld [vmem:[%s10059_s3 + $0x1c4] ss:$20 sps:$4 sm:$0xff]  }
 0x185   : > { %1761 = vmatmul.mubr.bf16.vlgmr.msra.gmra.mrb[0].mxu1 %v8563_v30  ;;  %1804 = vmatmul.mubr.bf16.vlgmr.msra.gmra.mrb[16].mxu0 %v8563_v30  ;;  %v7456_v31 = vld [vmem:[%s10059_s3 + $0x7c] ss:$20 sps:$4 sm:$0xff]   ;;  %v7454_v18 = vld [vmem:[%s10059_s3 + $0x78] ss:$20 sps:$4 sm:$0xff]   ;;  %v7457_v21 = vld [vmem:[%s10059_s3 + $0x1c0] ss:$20 sps:$4 sm:$0xff]  }
 0x186   : > { %6817 = vmatpush3.bf16.msra.mxu1 %v7400_v1  ;;  %2315 = vmatpush1.bf16.msra.mxu0 %v7397_v8  ;;  %v7462_v29 = vld [vmem:[%s10059_s3 + $0xa4] ss:$20 sps:$4 sm:$0xff]   ;;  %v7465_v11 = vld [vmem:[%s10059_s3 + $0x1ec] ss:$20 sps:$4 sm:$0xff]   ;;  %v7463_v13 = vld [vmem:[%s10059_s3 + $0x1e8] ss:$20 sps:$4 sm:$0xff]  }
 0x187   : > { %1846 = vmatprep.mubr.bf16.mxu1 %v1214_v28  ;;  %2346 = vmatprep.mubr.bf16.mxu0 %v8552_v25  ;;  %v7460_v26 = vld [vmem:[%s10059_s3 + $0xa0] ss:$20 sps:$4 sm:$0xff]   ;;  %v7466_v17 = vld [vmem:[%s10059_s3 + $0xc8] ss:$20 sps:$4 sm:$0xff]   ;;  %v7469_v19 = vld [vmem:[%s10059_s3 + $0x210] ss:$20 sps:$4 sm:$0xff]  }
 0x188   : > { %6818 = vmatprep.subr.bf16.mxu1 %v7401_v33  ;;  %2316 = vmatprep.subr.bf16.mxu0 %v7404_v34  ;;  %v7468_v12 = vld [vmem:[%s10059_s3 + $0xcc] ss:$20 sps:$4 sm:$0xff]   ;;  %v7471_v14 = vld [vmem:[%s10059_s3 + $0x214] ss:$20 sps:$4 sm:$0xff]   ;;  %v7477_v28 = vld [vmem:[%s10059_s3 + $0x23c] ss:$20 sps:$4 sm:$0xff]  }
 0x189   : > { %v7474_v27 = vld [vmem:[%s10059_s3 + $0xf4] ss:$20 sps:$4 sm:$0xff]   ;;  %v7472_v8 = vld [vmem:[%s10059_s3 + $0xf0] ss:$20 sps:$4 sm:$0xff]   ;;  %v7478_v34 = vld [vmem:[%s10059_s3 + $0x118] ss:$20 sps:$4 sm:$0xff]  }
 0x18a   : > { %6819 = vmatpush3.bf16.msra.mxu1 %v7405_v37  ;;  %2317 = vmatpush1.bf16.msra.mxu0 %v7402_v35  ;;  %v7480_v1 = vld [vmem:[%s10059_s3 + $0x11c] ss:$20 sps:$4 sm:$0xff]   ;;  %v7483_v33 = vld [vmem:[%s10059_s3 + $0x264] ss:$20 sps:$4 sm:$0xff]   ;;  %v7481_v35 = vld [vmem:[%s10059_s3 + $0x260] ss:$20 sps:$4 sm:$0xff]  }
 0x18b   : > { %6820 = vmatprep.subr.bf16.mxu1 %v7406_v38  ;;  %2318 = vmatprep.subr.bf16.mxu0 %v7409_v39  ;;  %v7486_v37 = vld [vmem:[%s10059_s3 + $0x144] ss:$20 sps:$4 sm:$0xff]   ;;  %v7489_v38 = vld [vmem:[%s10059_s3 + $0x50c] ss:$20 sps:$4 sm:$0xff]   ;;  %vm5837_vm12 = vcmask 257024  }
 0x18c   : > { %v7484_v39 = vld [vmem:[%s10059_s3 + $0x140] ss:$20 sps:$4 sm:$0xff]  }
 0x18e   : > { %6821 = vmatpush3.bf16.msra.mxu1 %v7410_v41  ;;  %2319 = vmatpush1.bf16.msra.mxu0 %v7407_v40  ;;  %v7487_v40 = vld [vmem:[%s10059_s3 + $0x508] ss:$20 sps:$4 sm:$0xff]   ;;  %v7492_v41 = vld [vmem:[%s10059_s3 + $0x16c] ss:$20 sps:$4 sm:$0xff]  }
 0x18f   : > { %6822 = vmatprep.subr.bf16.mxu1 %v7411_v42  ;;  %2320 = vmatprep.subr.bf16.mxu0 %v7414_v43  ;;  %v7495_v42 = vld [vmem:[%s10059_s3 + $0x534] ss:$20 sps:$4 sm:$0xff]  }
 0x190   : > { %v7490_v43 = vld [vmem:[%s10059_s3 + $0x168] ss:$20 sps:$4 sm:$0xff]  }
 0x192   : > { %6823 = vmatpush3.bf16.msra.mxu1 %v7415_v45  ;;  %2321 = vmatpush1.bf16.msra.mxu0 %v7412_v44  ;;  %v7493_v44 = vld [vmem:[%s10059_s3 + $0x530] ss:$20 sps:$4 sm:$0xff]   ;;  %v7498_v45 = vld [vmem:[%s10059_s3 + $0x194] ss:$20 sps:$4 sm:$0xff]  }
 0x193   : > { %6824 = vmatprep.subr.bf16.mxu1 %v7416_v46  ;;  %2322 = vmatprep.subr.bf16.mxu0 %v7419_v47  ;;  %v7501_v46 = vld [vmem:[%s10059_s3 + $0x55c] ss:$20 sps:$4 sm:$0xff]  }
 0x194   : > { %v7496_v47 = vld [vmem:[%s10059_s3 + $0x190] ss:$20 sps:$4 sm:$0xff]  }
 0x196   : > { %6825 = vmatpush3.bf16.msra.mxu1 %v7420_v24  ;;  %2323 = vmatpush1.bf16.msra.mxu0 %v7417_v48  ;;  %v7499_v48 = vld [vmem:[%s10059_s3 + $0x558] ss:$20 sps:$4 sm:$0xff]   ;;  %v7504_v24 = vld [vmem:[%s10059_s3 + $0x1bc] ss:$20 sps:$4 sm:$0xff]  }
 0x197   : > { %6826 = vmatprep.subr.bf16.mxu1 %v7421_v16  ;;  %2324 = vmatprep.subr.bf16.mxu0 %v7424_v49  ;;  %v7507_v16 = vld [vmem:[%s10059_s3 + $0x584] ss:$20 sps:$4 sm:$0xff]  }
 0x198   : > { %v7502_v49 = vld [vmem:[%s10059_s3 + $0x1b8] ss:$20 sps:$4 sm:$0xff]  }
 0x19a   : > { %6827 = vmatpush3.bf16.msra.mxu1 %v7425_v51  ;;  %2325 = vmatpush1.bf16.msra.mxu0 %v7422_v50  ;;  %v7505_v50 = vld [vmem:[%s10059_s3 + $0x580] ss:$20 sps:$4 sm:$0xff]   ;;  %v7510_v51 = vld [vmem:[%s10059_s3 + $0x1e4] ss:$20 sps:$4 sm:$0xff]  }
 0x19b   : > { %6828 = vmatprep.subr.bf16.mxu1 %v7426_v52  ;;  %2326 = vmatprep.subr.bf16.mxu0 %v7429_v53  ;;  %v7513_v52 = vld [vmem:[%s10059_s3 + $0x5ac] ss:$20 sps:$4 sm:$0xff]  }
 0x19c   : > { %v7508_v53 = vld [vmem:[%s10059_s3 + $0x1e0] ss:$20 sps:$4 sm:$0xff]  }
 0x19e   : > { %6829 = vmatpush3.bf16.msra.mxu1 %v7430_v54  ;;  %2327 = vmatpush1.bf16.msra.mxu0 %v7427_v20  ;;  %v7511_v20 = vld [vmem:[%s10059_s3 + $0x5a8] ss:$20 sps:$4 sm:$0xff]   ;;  %v7516_v54 = vld [vmem:[%s10059_s3 + $0x20c] ss:$20 sps:$4 sm:$0xff]  }
 0x19f   : > { %6830 = vmatprep.subr.bf16.mxu1 %v7431_v55  ;;  %2328 = vmatprep.subr.bf16.mxu0 %v7434_v56  ;;  %v7519_v55 = vld [vmem:[%s10059_s3 + $0x5d4] ss:$20 sps:$4 sm:$0xff]  }
 0x1a0   : > { %v7514_v56 = vld [vmem:[%s10059_s3 + $0x208] ss:$20 sps:$4 sm:$0xff]  }
 0x1a2   : > { %6831 = vmatpush3.bf16.msra.mxu1 %v7435_v58  ;;  %2329 = vmatpush1.bf16.msra.mxu0 %v7432_v57  ;;  %v7517_v57 = vld [vmem:[%s10059_s3 + $0x5d0] ss:$20 sps:$4 sm:$0xff]   ;;  %v7522_v58 = vld [vmem:[%s10059_s3 + $0x234] ss:$20 sps:$4 sm:$0xff]  }
 0x1a3   : > { %2271 = vmatprep.subr.bf16.mxu1 %v7438_v59  ;;  %2330 = vmatprep.subr.bf16.mxu0 %v7441_v60  ;;  %v7525_v59 = vld [vmem:[%s10059_s3 + $0x5fc] ss:$20 sps:$4 sm:$0xff]  }
 0x1a4   : > { %v7520_v60 = vld [vmem:[%s10059_s3 + $0x230] ss:$20 sps:$4 sm:$0xff]  }
 0x1a5   : > { %1847 = vmatmul.mubr.bf16.vlgmr.msra.gmra.mrb[4].mxu1 %v8563_v30  ;;  %v7475_v30 = vld [vmem:[%s10059_s3 + $0x238] ss:$20 sps:$4 sm:$0xff]  }
 0x1a6   : > { %2272 = vmatpush1.bf16.msra.mxu1 %v7436_v61  ;;  %2303 = vmatprep.mubr.bf16.mxu1 %v8552_v25  ;;  %v7523_v61 = vld [vmem:[%s10059_s3 + $0x5f8] ss:$20 sps:$4 sm:$0xff]  }
 0x1a7   : > { %2331 = vmatpush1.bf16.msra.mxu0 %v7439_v63  ;;  %2273 = vmatprep.subr.bf16.mxu1 %v7444_v0  ;;  %v7528_v63 = vld [vmem:[%s10059_s3 + $0x25c] ss:$20 sps:$4 sm:$0xff]   ;;  %v7531_v0 = vld [vmem:[%s10059_s3 + $0x624] ss:$20 sps:$4 sm:$0xff]  }
 0x1a8   : > { %2332 = vmatprep.subr.bf16.mxu0 %v7447_v2  ;;  %v7526_v2 = vld [vmem:[%s10059_s3 + $0x258] ss:$20 sps:$4 sm:$0xff]  }
 0x1aa   : > { %2274 = vmatpush1.bf16.msra.mxu1 %v7442_v3  ;;  %v7529_v3 = vld [vmem:[%s10059_s3 + $0x620] ss:$20 sps:$4 sm:$0xff]  }
 0x1ab   : > { %2333 = vmatpush1.bf16.msra.mxu0 %v7445_v4  ;;  %2275 = vmatprep.subr.bf16.mxu1 %v7450_v6  ;;  %v7532_v4 = vld [vmem:[%s10059_s3 + $0x150] ss:$20 sps:$4 sm:$0xff]   ;;  %v7535_v6 = vld [vmem:[%s10059_s3 + $0x64c] ss:$20 sps:$4 sm:$0xff]  }
 0x1ac   : > { %2334 = vmatprep.subr.bf16.mxu0 %v7453_v7  ;;  %v7536_v7 = vld [vmem:[%s10059_s3 + $0x10] ss:$20 sps:$4 sm:$0xff]  }
 0x1ae   : > { %2276 = vmatpush1.bf16.msra.mxu1 %v7448_v22  ;;  %v7533_v22 = vld [vmem:[%s10059_s3 + $0x648] ss:$20 sps:$4 sm:$0xff]  }
 0x1af   : > { %2335 = vmatpush1.bf16.msra.mxu0 %v7451_v23  ;;  %2277 = vmatprep.subr.bf16.mxu1 %v7456_v31  ;;  %v7537_v23 = vld [vmem:[%s10059_s3 + $0x178] ss:$20 sps:$4 sm:$0xff]   ;;  %v7540_v31 = vld [vmem:[%s10059_s3 + $0x674] ss:$20 sps:$4 sm:$0xff]  }
 0x1b0   : > { %2336 = vmatprep.subr.bf16.mxu0 %v7459_v10  ;;  %v7541_v10 = vld [vmem:[%s10059_s3 + $0x38] ss:$20 sps:$4 sm:$0xff]  }
 0x1b2   : > { %2278 = vmatpush1.bf16.msra.mxu1 %v7454_v18  ;;  %v7538_v18 = vld [vmem:[%s10059_s3 + $0x670] ss:$20 sps:$4 sm:$0xff]  }
 0x1b3   : > { %2337 = vmatpush1.bf16.msra.mxu0 %v7457_v21  ;;  %2279 = vmatprep.subr.bf16.mxu1 %v7462_v29  ;;  %v7542_v21 = vld [vmem:[%s10059_s3 + $0x1a0] ss:$20 sps:$4 sm:$0xff]   ;;  %v7545_v29 = vld [vmem:[%s10059_s3 + $0x69c] ss:$20 sps:$4 sm:$0xff]  }
 0x1b4   : > { %2338 = vmatprep.subr.bf16.mxu0 %v7465_v11  ;;  %v7543_v11 = vld [vmem:[%s10059_s3 + $0x698] ss:$20 sps:$4 sm:$0xff]  }
 0x1b6   : > { %2280 = vmatpush1.bf16.msra.mxu1 %v7460_v26  ;;  %v7547_v26 = vld [vmem:[%s10059_s3 + $0x1c8] ss:$20 sps:$4 sm:$0xff]  }
 0x1b7   : > { %2339 = vmatpush1.bf16.msra.mxu0 %v7463_v13  ;;  %2281 = vmatprep.subr.bf16.mxu1 %v7468_v12  ;;  %v7550_v13 = vld [vmem:[%s10059_s3 + $0x6c4] ss:$20 sps:$4 sm:$0xff]   ;;  %v7551_v12 = vld [vmem:[%s10059_s3 + $0x88] ss:$20 sps:$4 sm:$0xff]  }
 0x1b8   : > { %2340 = vmatprep.subr.bf16.mxu0 %v7471_v14  ;;  %v7548_v14 = vld [vmem:[%s10059_s3 + $0x6c0] ss:$20 sps:$4 sm:$0xff]  }
 0x1ba   : > { %2282 = vmatpush1.bf16.msra.mxu1 %v7466_v17  ;;  %v7552_v17 = vld [vmem:[%s10059_s3 + $0x1f0] ss:$20 sps:$4 sm:$0xff]  }
 0x1bb   : > { %2341 = vmatpush1.bf16.msra.mxu0 %v7469_v19  ;;  %2283 = vmatprep.subr.bf16.mxu1 %v7474_v27  ;;  %v7555_v19 = vld [vmem:[%s10059_s3 + $0x6ec] ss:$20 sps:$4 sm:$0xff]   ;;  %v7556_v27 = vld [vmem:[%s10059_s3 + $0xb0] ss:$20 sps:$4 sm:$0xff]  }
 0x1bc   : > { %2342 = vmatprep.subr.bf16.mxu0 %v7477_v28  ;;  %v7553_v28 = vld [vmem:[%s10059_s3 + $0x6e8] ss:$20 sps:$4 sm:$0xff]  }
 0x1be   : > { %2284 = vmatpush1.bf16.msra.mxu1 %v7472_v8  ;;  %v7557_v8 = vld [vmem:[%s10059_s3 + $0x218] ss:$20 sps:$4 sm:$0xff]  }
 0x1bf   : > { %2343 = vmatpush1.bf16.msra.mxu0 %v7475_v30  ;;  %2285 = vmatprep.subr.bf16.mxu1 %v7480_v1  ;;  %v7560_v30 = vld [vmem:[%s10059_s3 + $0x714] ss:$20 sps:$4 sm:$0xff]   ;;  %v7561_v1 = vld [vmem:[%s10059_s3 + $0xd8] ss:$20 sps:$4 sm:$0xff]  }
 0x1c0   : > { %2344 = vmatprep.subr.bf16.mxu0 %v7483_v33  ;;  %v7558_v33 = vld [vmem:[%s10059_s3 + $0x710] ss:$20 sps:$4 sm:$0xff]  }
 0x1c2   : > { %2286 = vmatpush1.bf16.msra.mxu1 %v7478_v34  ;;  %v7562_v34 = vld [vmem:[%s10059_s3 + $0x240] ss:$20 sps:$4 sm:$0xff]  }
 0x1c3   : > { %2345 = vmatpush1.bf16.msra.mxu0 %v7481_v35  ;;  %2287 = vmatprep.subr.bf16.mxu1 %v7486_v37  ;;  %v7565_v35 = vld [vmem:[%s10059_s3 + $0x73c] ss:$20 sps:$4 sm:$0xff]   ;;  %v7566_v37 = vld [vmem:[%s10059_s3 + $0x100] ss:$20 sps:$4 sm:$0xff]  }
 0x1c4   : > { %2996 = vmatprep.subr.bf16.mxu0 %v7489_v38  ;;  %v7563_v38 = vld [vmem:[%s10059_s3 + $0x738] ss:$20 sps:$4 sm:$0xff]  }
 0x1c6   : > { %2347 = vmatmul.mubr.bf16.vlgmr.msra.gmra.mrb[16].mxu0 %v8554_v62  ;;  %2288 = vmatpush1.bf16.msra.mxu1 %v7484_v39  ;;  %v7567_v39 = vld [vmem:[%s10059_s3 + $0x268] ss:$20 sps:$4 sm:$0xff]  }
 0x1c7   : > { %2997 = vmatpush1.bf16.msra.mxu0 %v7487_v40  ;;  %3028 = vmatprep.mubr.bf16.mxu0 %v8556_v9  ;;  %v7570_v40 = vld [vmem:[%s10059_s3 + $0x764] ss:$20 sps:$4 sm:$0xff]  }
 0x1c8   : > { %2289 = vmatprep.subr.bf16.mxu1 %v7492_v41  ;;  %2998 = vmatprep.subr.bf16.mxu0 %v7495_v42  ;;  %v7571_v41 = vld [vmem:[%s10059_s3 + $0x128] ss:$20 sps:$4 sm:$0xff]   ;;  %v7568_v42 = vld [vmem:[%s10059_s3 + $0x760] ss:$20 sps:$4 sm:$0xff]  }
 0x1ca   : > { %2290 = vmatpush1.bf16.msra.mxu1 %v7490_v43  ;;  %v7574_v43 = vld [vmem:[%s10059_s3 + $0x504] ss:$20 sps:$4 sm:$0xff]  }
 0x1cb   : > { %2999 = vmatpush1.bf16.msra.mxu0 %v7493_v44  ;;  %2291 = vmatprep.subr.bf16.mxu1 %v7498_v45  ;;  %v7575_v44 = vld [vmem:[%s10059_s3 + $0x650] ss:$20 sps:$4 sm:$0xff]   ;;  %v7572_v45 = vld [vmem:[%s10059_s3 + $0x500] ss:$20 sps:$4 sm:$0xff]  }
 0x1cc   : > { %3000 = vmatprep.subr.bf16.mxu0 %v7501_v46  ;;  %v7576_v46 = vld [vmem:[%s10059_s3 + $0x510] ss:$20 sps:$4 sm:$0xff]  }
 0x1ce   : > { %2292 = vmatpush1.bf16.msra.mxu1 %v7496_v47  ;;  %v7579_v47 = vld [vmem:[%s10059_s3 + $0x52c] ss:$20 sps:$4 sm:$0xff]  }
 0x1cf   : > { %3001 = vmatpush1.bf16.msra.mxu0 %v7499_v48  ;;  %2293 = vmatprep.subr.bf16.mxu1 %v7504_v24  ;;  %v7580_v48 = vld [vmem:[%s10059_s3 + $0x678] ss:$20 sps:$4 sm:$0xff]   ;;  %v7577_v24 = vld [vmem:[%s10059_s3 + $0x528] ss:$20 sps:$4 sm:$0xff]  }
 0x1d0   : > { %3002 = vmatprep.subr.bf16.mxu0 %v7507_v16  ;;  %v7581_v16 = vld [vmem:[%s10059_s3 + $0x538] ss:$20 sps:$4 sm:$0xff]  }
 0x1d2   : > { %2294 = vmatpush1.bf16.msra.mxu1 %v7502_v49  ;;  %v7585_v49 = vld [vmem:[%s10059_s3 + $0x6a0] ss:$20 sps:$4 sm:$0xff]  }
 0x1d3   : > { %3003 = vmatpush1.bf16.msra.mxu0 %v7505_v50  ;;  %2295 = vmatprep.subr.bf16.mxu1 %v7510_v51  ;;  %v7582_v50 = vld [vmem:[%s10059_s3 + $0x550] ss:$20 sps:$4 sm:$0xff]   ;;  %v7586_v51 = vld [vmem:[%s10059_s3 + $0x560] ss:$20 sps:$4 sm:$0xff]  }
 0x1d4   : > { %3004 = vmatprep.subr.bf16.mxu0 %v7513_v52  ;;  %v7590_v52 = vld [vmem:[%s10059_s3 + $0x6c8] ss:$20 sps:$4 sm:$0xff]  }
 0x1d6   : > { %2296 = vmatpush1.bf16.msra.mxu1 %v7508_v53  ;;  %v7587_v53 = vld [vmem:[%s10059_s3 + $0x578] ss:$20 sps:$4 sm:$0xff]  }
 0x1d7   : > { %3005 = vmatpush1.bf16.msra.mxu0 %v7511_v20  ;;  %2297 = vmatprep.subr.bf16.mxu1 %v7516_v54  ;;  %v7591_v20 = vld [vmem:[%s10059_s3 + $0x588] ss:$20 sps:$4 sm:$0xff]   ;;  %v7594_v54 = vld [vmem:[%s10059_s3 + $0x5a4] ss:$20 sps:$4 sm:$0xff]  }
 0x1d8   : > { %3006 = vmatprep.subr.bf16.mxu0 %v7519_v55  ;;  %v7595_v55 = vld [vmem:[%s10059_s3 + $0x6f0] ss:$20 sps:$4 sm:$0xff]  }
 0x1da   : > { %2298 = vmatpush1.bf16.msra.mxu1 %v7514_v56  ;;  %v7592_v56 = vld [vmem:[%s10059_s3 + $0x5a0] ss:$20 sps:$4 sm:$0xff]  }
 0x1db   : > { %3007 = vmatpush1.bf16.msra.mxu0 %v7517_v57  ;;  %2299 = vmatprep.subr.bf16.mxu1 %v7522_v58  ;;  %v7596_v57 = vld [vmem:[%s10059_s3 + $0x5b0] ss:$20 sps:$4 sm:$0xff]   ;;  %v7599_v58 = vld [vmem:[%s10059_s3 + $0x5cc] ss:$20 sps:$4 sm:$0xff]  }
 0x1dc   : > { %3008 = vmatprep.subr.bf16.mxu0 %v7525_v59  ;;  %v7600_v59 = vld [vmem:[%s10059_s3 + $0x718] ss:$20 sps:$4 sm:$0xff]  }
 0x1de   : > { %2300 = vmatpush1.bf16.msra.mxu1 %v7520_v60  ;;  %v7597_v60 = vld [vmem:[%s10059_s3 + $0x5c8] ss:$20 sps:$4 sm:$0xff]  }
 0x1df   : > { %3009 = vmatpush1.bf16.msra.mxu0 %v7523_v61  ;;  %2301 = vmatprep.subr.bf16.mxu1 %v7528_v63  ;;  %v7601_v61 = vld [vmem:[%s10059_s3 + $0x5d8] ss:$20 sps:$4 sm:$0xff]   ;;  %v7604_v63 = vld [vmem:[%s10059_s3 + $0x5f4] ss:$20 sps:$4 sm:$0xff]  }
 0x1e0   : > { %3010 = vmatprep.subr.bf16.mxu0 %v7531_v0  ;;  %v7605_v0 = vld [vmem:[%s10059_s3 + $0x740] ss:$20 sps:$4 sm:$0xff]  }
 0x1e2   : > { %2302 = vmatpush1.bf16.msra.mxu1 %v7526_v2  ;;  %v7602_v2 = vld [vmem:[%s10059_s3 + $0x5f0] ss:$20 sps:$4 sm:$0xff]  }
 0x1e3   : > { %3011 = vmatpush1.bf16.msra.mxu0 %v7529_v3  ;;  %6838 = vmatprep.subr.bf16.mxu1 %v7532_v4  ;;  %v7606_v3 = vld [vmem:[%s10059_s3 + $0x600] ss:$20 sps:$4 sm:$0xff]   ;;  %v7609_v4 = vld [vmem:[%s10059_s3 + $0x61c] ss:$20 sps:$4 sm:$0xff]  }
 0x1e4   : > { %3012 = vmatprep.subr.bf16.mxu0 %v7535_v6  ;;  %v7610_v6 = vld [vmem:[%s10059_s3 + $0x768] ss:$20 sps:$4 sm:$0xff]  }
 0x1e5   : > { %2304 = vmatmul.mubr.bf16.vlgmr.msra.gmra.mrb[0].mxu1 %v8554_v62 }
 0x1e6   : > { %6839 = vmatpush3.bf16.msra.mxu1 %v7536_v7  ;;  %2389 = vmatprep.mubr.bf16.mxu1 %v8552_v25  ;;  %v7546_v25 = vld [vmem:[%s10059_s3 + $0x60] ss:$20 sps:$4 sm:$0xff]   ;;  %v7607_v7 = vld [vmem:[%s10059_s3 + $0x618] ss:$20 sps:$4 sm:$0xff]  }
 0x1e7   : > { %3013 = vmatpush1.bf16.msra.mxu0 %v7533_v22  ;;  %6840 = vmatprep.subr.bf16.mxu1 %v7537_v23  ;;  %v7611_v22 = vld [vmem:[%s10059_s3 + $0x628] ss:$20 sps:$4 sm:$0xff]   ;;  %v7614_v23 = vld [vmem:[%s10059_s3 + $0x644] ss:$20 sps:$4 sm:$0xff]  }
 0x1e8   : > { %3014 = vmatprep.subr.bf16.mxu0 %v7540_v31  ;;  %v7636_v31 = vld [vmem:[%s10061_s5 + $0x200] sm:$0xff]  }
 0x1ea   : > { %6841 = vmatpush3.bf16.msra.mxu1 %v7541_v10  ;;  %v7612_v10 = vld [vmem:[%s10059_s3 + $0x640] ss:$20 sps:$4 sm:$0xff]  }
 0x1eb   : > { %3015 = vmatpush1.bf16.msra.mxu0 %v7538_v18  ;;  %6842 = vmatprep.subr.bf16.mxu1 %v7542_v21  ;;  %v7617_v18 = vld [vmem:[%s10059_s3 + $0x66c] ss:$20 sps:$4 sm:$0xff]  }
 0x1ec   : > { %3016 = vmatprep.subr.bf16.mxu0 %v7545_v29  ;;  %v7637_v21 = vld [vmem:[%s10061_s5 + $0x1c0] sm:$0xff]   ;;  %v7638_v29 = vld [vmem:[%s10061_s5 + $0x208] sm:$0xff]  }
 0x1ee   : > { %6843 = vmatpush3.bf16.msra.mxu1 %v7546_v25  ;;  %v7615_v25 = vld [vmem:[%s10059_s3 + $0x668] ss:$20 sps:$4 sm:$0xff]  }
 0x1ef   : > { %3017 = vmatpush1.bf16.msra.mxu0 %v7543_v11  ;;  %6844 = vmatprep.subr.bf16.mxu1 %v7547_v26  ;;  %v7620_v11 = vld [vmem:[%s10059_s3 + $0x694] ss:$20 sps:$4 sm:$0xff]  }
 0x1f0   : > { %3018 = vmatprep.subr.bf16.mxu0 %v7550_v13  ;;  %v7639_v26 = vld [vmem:[%s10061_s5 + $0x1c8] sm:$0xff]   ;;  %v7618_v13 = vld [vmem:[%s10059_s3 + $0x690] ss:$20 sps:$4 sm:$0xff]  }
 0x1f2   : > { %6845 = vmatpush3.bf16.msra.mxu1 %v7551_v12  ;;  %v7623_v12 = vld [vmem:[%s10059_s3 + $0x6bc] ss:$20 sps:$4 sm:$0xff]  }
 0x1f3   : > { %3019 = vmatpush1.bf16.msra.mxu0 %v7548_v14  ;;  %6846 = vmatprep.subr.bf16.mxu1 %v7552_v17  ;;  %v7621_v14 = vld [vmem:[%s10059_s3 + $0x6b8] ss:$20 sps:$4 sm:$0xff]  }
 0x1f4   : > { %3020 = vmatprep.subr.bf16.mxu0 %v7555_v19  ;;  %v7626_v17 = vld [vmem:[%s10059_s3 + $0x6e4] ss:$20 sps:$4 sm:$0xff]   ;;  %v7624_v19 = vld [vmem:[%s10059_s3 + $0x6e0] ss:$20 sps:$4 sm:$0xff]  }
 0x1f6   : > { %6847 = vmatpush3.bf16.msra.mxu1 %v7556_v27  ;;  %v7629_v27 = vld [vmem:[%s10059_s3 + $0x70c] ss:$20 sps:$4 sm:$0xff]  }
 0x1f7   : > { %3021 = vmatpush1.bf16.msra.mxu0 %v7553_v28  ;;  %6848 = vmatprep.subr.bf16.mxu1 %v7557_v8  ;;  %v7627_v28 = vld [vmem:[%s10059_s3 + $0x708] ss:$20 sps:$4 sm:$0xff]  }
 0x1f8   : > { %3022 = vmatprep.subr.bf16.mxu0 %v7560_v30  ;;  %v7632_v8 = vld [vmem:[%s10059_s3 + $0x734] ss:$20 sps:$4 sm:$0xff]   ;;  %v7630_v30 = vld [vmem:[%s10059_s3 + $0x730] ss:$20 sps:$4 sm:$0xff]  }
 0x1fa   : > { %6849 = vmatpush3.bf16.msra.mxu1 %v7561_v1  ;;  %v7635_v1 = vld [vmem:[%s10059_s3 + $0x75c] ss:$20 sps:$4 sm:$0xff]  }
 0x1fb   : > { %3023 = vmatpush1.bf16.msra.mxu0 %v7558_v33  ;;  %6850 = vmatprep.subr.bf16.mxu1 %v7562_v34  ;;  %v7633_v33 = vld [vmem:[%s10059_s3 + $0x758] ss:$20 sps:$4 sm:$0xff]   ;;  %v7640_v34 = vld [vmem:[%s10061_s5 + $0x210] sm:$0xff]  }
 0x1fc   : > { %3024 = vmatprep.subr.bf16.mxu0 %v7565_v35  ;;  %v7641_v35 = vld [vmem:[%s10061_s5 + $0x1d0] sm:$0xff]  }
 0x1fe   : > { %6851 = vmatpush3.bf16.msra.mxu1 %v7566_v37  ;;  %v7642_v37 = vld [vmem:[%s10061_s5 + $0x218] sm:$0xff]  }
 0x1ff   : > { %3025 = vmatpush1.bf16.msra.mxu0 %v7563_v38  ;;  %6852 = vmatprep.subr.bf16.mxu1 %v7567_v39  ;;  %v7643_v38 = vld [vmem:[%s10061_s5 + $0x1d8] sm:$0xff]   ;;  %v7645_v39 = vld [vmem:[%s10061_s5 + $0x1e0] sm:$0xff]  }
 0x200   : > { %3026 = vmatprep.subr.bf16.mxu0 %v7570_v40  ;;  %v7646_v40 = vld [vmem:[%s10061_s5 + $0x228] sm:$0xff]  }
 0x202   : > { %6853 = vmatpush3.bf16.msra.mxu1 %v7571_v41  ;;  %v7647_v41 = vld [vmem:[%s10061_s5 + $0x1e8] sm:$0xff]  }
 0x203   : > { %3027 = vmatpush1.bf16.msra.mxu0 %v7568_v42  ;;  %2953 = vmatprep.subr.bf16.mxu1 %v7574_v43  ;;  %v7648_v42 = vld [vmem:[%s10061_s5 + $0x230] sm:$0xff]  }
 0x204   : > { %6860 = vmatprep.subr.bf16.mxu0 %v7575_v44  ;;  %v7649_v43 = vld [vmem:[%s10061_s5 + $0x1f0] sm:$0xff]   ;;  %v7650_v44 = vld [vmem:[%s10061_s5 + $0x238] sm:$0xff]  }
 0x205   : > { %2390 = vmatmul.mubr.bf16.vlgmr.msra.gmra.mrb[8].mxu1 %v8554_v62  ;;  %v7584_v62 = vld [vmem:[%s10059_s3 + $0x554] ss:$20 sps:$4 sm:$0xff]  }
 0x206   : > { %3029 = vmatmul.mubr.bf16.vlgmr.msra.gmra.mrb[16].mxu0 %v8558_v15  ;;  %2954 = vmatpush1.bf16.msra.mxu1 %v7572_v45  ;;  %v7651_v45 = vld [vmem:[%s10061_s5 + $0x1f8] sm:$0xff]  }
 0x207   : > { %2985 = vmatprep.mubr.bf16.mxu1 %v8556_v9  ;;  %6861 = vmatpush3.bf16.msra.mxu0 %v7576_v46 }
 0x208   : > { %3071 = vmatprep.mubr.bf16.mxu0 %v8556_v9  ;;  %2955 = vmatprep.subr.bf16.mxu1 %v7579_v47  ;;  %v7589_v9 = vld [vmem:[%s10059_s3 + $0x57c] ss:$20 sps:$4 sm:$0xff]  }
 0x209   : > { %6862 = vmatprep.subr.bf16.mxu0 %v7580_v48 }
 0x20a   : > { %2956 = vmatpush1.bf16.msra.mxu1 %v7577_v24 }
 0x20b   : > { %6863 = vmatpush3.bf16.msra.mxu0 %v7581_v16  ;;  %2957 = vmatprep.subr.bf16.mxu1 %v7584_v62 }
 0x20c   : > { %6864 = vmatprep.subr.bf16.mxu0 %v7585_v49  ;;  %v7652_v49 = vld [vmem:[%s10061_s5 + $0x180] sm:$0xff]  }
 0x20e   : > { %2958 = vmatpush1.bf16.msra.mxu1 %v7582_v50  ;;  %v7653_v50 = vld [vmem:[%s10061_s5 + $0x40] sm:$0xff]  }
 0x20f   : > { %6865 = vmatpush3.bf16.msra.mxu0 %v7586_v51  ;;  %2959 = vmatprep.subr.bf16.mxu1 %v7589_v9  ;;  %v7654_v51 = vld [vmem:[%s10061_s5 + $0x140] sm:$0xff]   ;;  %v7656_v9 = vld [vmem:[%s10061_s5 + $0x188] sm:$0xff]  }
 0x210   : > { %6866 = vmatprep.subr.bf16.mxu0 %v7590_v52  ;;  %v7658_v52 = vld [vmem:[%s10061_s5 + $0x148] sm:$0xff]  }
 0x212   : > { %2960 = vmatpush1.bf16.msra.mxu1 %v7587_v53  ;;  %v7660_v53 = vld [vmem:[%s10061_s5 + $0x190] sm:$0xff]  }
 0x213   : > { %6867 = vmatpush3.bf16.msra.mxu0 %v7591_v20  ;;  %2961 = vmatprep.subr.bf16.mxu1 %v7594_v54  ;;  %v7662_v20 = vld [vmem:[%s10061_s5 + $0x150] sm:$0xff]   ;;  %v7664_v54 = vld [vmem:[%s10061_s5 + $0x198] sm:$0xff]  }
 0x214   : > { %6868 = vmatprep.subr.bf16.mxu0 %v7595_v55  ;;  %v7666_v55 = vld [vmem:[%s10061_s5 + $0x158] sm:$0xff]  }
 0x216   : > { %2962 = vmatpush1.bf16.msra.mxu1 %v7592_v56  ;;  %v7668_v56 = vld [vmem:[%s10061_s5 + $0x1a0] sm:$0xff]  }
 0x217   : > { %6869 = vmatpush3.bf16.msra.mxu0 %v7596_v57  ;;  %2963 = vmatprep.subr.bf16.mxu1 %v7599_v58  ;;  %v7670_v57 = vld [vmem:[%s10061_s5 + $0x160] sm:$0xff]   ;;  %v7672_v58 = vld [vmem:[%s10061_s5 + $0x1a8] sm:$0xff]  }
 0x218   : > { %6870 = vmatprep.subr.bf16.mxu0 %v7600_v59  ;;  %v7674_v59 = vld [vmem:[%s10061_s5 + $0x168] sm:$0xff]  }
 0x21a   : > { %2964 = vmatpush1.bf16.msra.mxu1 %v7597_v60  ;;  %v7676_v60 = vld [vmem:[%s10061_s5 + $0x1b0] sm:$0xff]  }
 0x21b   : > { %6871 = vmatpush3.bf16.msra.mxu0 %v7601_v61  ;;  %2965 = vmatprep.subr.bf16.mxu1 %v7604_v63  ;;  %v7678_v61 = vld [vmem:[%s10061_s5 + $0x170] sm:$0xff]   ;;  %v7680_v63 = vld [vmem:[%s10061_s5 + $0x1b8] sm:$0xff]  }
 0x21c   : > { %6872 = vmatprep.subr.bf16.mxu0 %v7605_v0  ;;  %v7682_v0 = vld [vmem:[%s10061_s5 + $0x178] sm:$0xff]  }
 0x21e   : > { %2966 = vmatpush1.bf16.msra.mxu1 %v7602_v2  ;;  %v7936_v2 = vmov 0.0  }
 0x21f   : > { %6873 = vmatpush3.bf16.msra.mxu0 %v7606_v3  ;;  %2967 = vmatprep.subr.bf16.mxu1 %v7609_v4  ;;  %v9202_v3 = vsub.s32 2, %v8149_v5  ;;  %v9207_v4 = vld [vmem:[%s10060_s4] sm:$0x1f] }
 0x220   : > { %6874 = vmatprep.subr.bf16.mxu0 %v7610_v6  ;;  %v9210_v6 = vsub.s32 3, %v8149_v5 }
 0x222   : > { %2968 = vmatpush1.bf16.msra.mxu1 %v7607_v7  ;;  %v3103_v7 = vrot.slane %v9207_v4, %v9202_v3 }
 0x223   : > { %6875 = vmatpush3.bf16.msra.mxu0 %v7611_v22  ;;  %2969 = vmatprep.subr.bf16.mxu1 %v7614_v23  ;;  %v3107_v22 = vrot.slane %v9207_v4, %v9210_v6 }
 0x224   : > { %6904 = vmatprep.subr.bf16.mxu0 %v7636_v31 }
 0x226   : > { %3072 = vmatmul.mubr.bf16.vlgmr.msra.gmra.mrb[20].mxu0 %v8558_v15  ;;  %2970 = vmatpush1.bf16.msra.mxu1 %v7612_v10 }
 0x227   : > { %2971 = vmatprep.subr.bf16.mxu1 %v7617_v18  ;;  %6905 = vmatpush3.bf16.msra.mxu0 %v7637_v21 }
 0x228   : > { %6906 = vmatprep.subr.bf16.mxu0 %v7638_v29 }
 0x22a   : > { %2972 = vmatpush1.bf16.msra.mxu1 %v7615_v25 }
 0x22b   : > { %2973 = vmatprep.subr.bf16.mxu1 %v7620_v11  ;;  %6907 = vmatpush3.bf16.msra.mxu0 %v7639_v26 }
 0x22c   : > { %6908 = vmatprep.subr.bf16.mxu0 %v7640_v34  ;;  %v9222_v34 = vsub.s32 4, %v8149_v5 }
 0x22e   : > { %2974 = vmatpush1.bf16.msra.mxu1 %v7618_v13 }
 0x22f   : > { %2975 = vmatprep.subr.bf16.mxu1 %v7623_v12  ;;  %6909 = vmatpush3.bf16.msra.mxu0 %v7641_v35  ;;  %v9217_v12 = vsub.s32 5, %v8149_v5 }
 0x230   : > { %6910 = vmatprep.subr.bf16.mxu0 %v7642_v37 }
 0x232   : > { %2976 = vmatpush1.bf16.msra.mxu1 %v7621_v14 }
 0x233   : > { %2977 = vmatprep.subr.bf16.mxu1 %v7626_v17  ;;  %6911 = vmatpush3.bf16.msra.mxu0 %v7643_v38 }
 0x236   : > { %2978 = vmatpush1.bf16.msra.mxu1 %v7624_v19 }
 0x237   : > { %2979 = vmatprep.subr.bf16.mxu1 %v7629_v27 }
 0x23a   : > { %2980 = vmatpush1.bf16.msra.mxu1 %v7627_v28 }
 0x23b   : > { %2981 = vmatprep.subr.bf16.mxu1 %v7632_v8 }
 0x23e   : > { %2982 = vmatpush1.bf16.msra.mxu1 %v7630_v30 }
 0x23f   : > { %2983 = vmatprep.subr.bf16.mxu1 %v7635_v1 }
 0x242   : > { %2984 = vmatpush1.bf16.msra.mxu1 %v7633_v33 }
 0x243   : > { %6882 = vmatprep.subr.bf16.mxu1 %v7652_v49 }
 0x245   : > { %2986 = vmatmul.mubr.bf16.vlgmr.msra.gmra.mrb[0].mxu1 %v8558_v15  ;;  %v7644_v15 = vld [vmem:[%s10061_s5 + $0x220] sm:$0xff]  }
 0x246   : > { %6912 = vmatprep.subr.bf16.mxu0 %v7644_v15  ;;  %6883 = vmatpush3.bf16.msra.mxu1 %v7654_v51 }
 0x247   : > { %6913 = vmatpush3.bf16.msra.mxu0 %v7645_v39  ;;  %6884 = vmatprep.subr.bf16.mxu1 %v7656_v9 }
 0x248   : > { %6914 = vmatprep.subr.bf16.mxu0 %v7646_v40 }
 0x24a   : > { %6885 = vmatpush3.bf16.msra.mxu1 %v7658_v52 }
 0x24b   : > { %6915 = vmatpush3.bf16.msra.mxu0 %v7647_v41  ;;  %6886 = vmatprep.subr.bf16.mxu1 %v7660_v53 }
 0x24c   : > { %6916 = vmatprep.subr.bf16.mxu0 %v7648_v42  ;;  %v9232_v42 = vsub.s32 6, %v8149_v5 }
 0x24e   : > { %6887 = vmatpush3.bf16.msra.mxu1 %v7662_v20 }
 0x24f   : > { %6917 = vmatpush3.bf16.msra.mxu0 %v7649_v43  ;;  %6888 = vmatprep.subr.bf16.mxu1 %v7664_v54 }
 0x250   : > { %6918 = vmatprep.subr.bf16.mxu0 %v7650_v44 }
 0x252   : > { %6889 = vmatpush3.bf16.msra.mxu1 %v7666_v55 }
 0x253   : > { %6919 = vmatpush3.bf16.msra.mxu0 %v7651_v45  ;;  %6890 = vmatprep.subr.bf16.mxu1 %v7668_v56 }
 0x254   : > { %6935 = vmatprep.subr.bf16.mxu0 %v7653_v50 }
 0x256   : > { %6891 = vmatpush3.bf16.msra.mxu1 %v7670_v57 }
 0x257   : > { %6892 = vmatprep.subr.bf16.mxu1 %v7672_v58 }
 0x25a   : > { %6893 = vmatpush3.bf16.msra.mxu1 %v7674_v59 }
 0x25b   : > { %6894 = vmatprep.subr.bf16.mxu1 %v7676_v60 }
 0x25e   : > { %6895 = vmatpush3.bf16.msra.mxu1 %v7678_v61 }
 0x25f   : > { %6896 = vmatprep.subr.bf16.mxu1 %v7680_v63 }
 0x262   : > { %6897 = vmatpush3.bf16.msra.mxu1 %v7682_v0 }
 0x263   : > { %7099 = vmatprep.subr.bf16.mxu1 %v7936_v2 }
 0x278   : > { %v6832_v46 = vpop.f32.mrb[4].mxu1 }
 0x279   : > { %v6833_v47 = vpop.f32.mrb[5].mxu1 }
 0x27a   : > { %v6834_v48 = vadd.f32 %v6833_v47, %v6832_v46  ;;  %v6835_v24 = vpop.f32.mrb[6].mxu1 }
 0x27b   : > { %v6836_v16 = vpop.f32.mrb[7].mxu1 }
 0x27c   : > { %v9147_v62 = vadd.f32 %v6836_v16, %v6835_v24 }
 0x2d8   : > { %v6854_v23 = vpop.f32.mrb[8].mxu1 }
 0x2d9   : > { %v3030_v31 = vpop.f32.mrb[16].mxu0  ;;  %v6855_v10 = vpop.f32.mrb[9].mxu1 }
 0x2da   : > { %v3119_v18 = vadd.f32 %v3103_v7, %v3030_v31  ;;  %v6856_v21 = vadd.f32 %v6855_v10, %v6854_v23  ;;  %v3032_v29 = vpop.f32.mrb[17].mxu0  ;;  %v6857_v25 = vpop.f32.mrb[10].mxu1 }
 0x2db   : > { %v3120_v11 = vadd.f32 %v3107_v22, %v3032_v29  ;;  %v3034_v26 = vpop.f32.mrb[18].mxu0  ;;  %v6858_v13 = vpop.f32.mrb[11].mxu1 }
 0x2dc   : > { %vm3129_vm14 = vcmp.gt.f32.partialorder %v3119_v18, 0.0  ;;  %v3139_v14 = vmul.f32 0.01, %v3119_v18  ;;  %v9219_v17 = vadd.f32 %v6856_v21, %v6834_v48  ;;  %v3124_v19 = vadd.f32 %v3103_v7, %v3034_v26  ;;  %v3036_v27 = vpop.f32.mrb[19].mxu0 }
 0x2dd   : > { %vm3130_vm15 = vcmp.gt.f32.partialorder %v3120_v11, 0.0  ;;  %v3140_v28 = vmul.f32 0.01, %v3120_v11  ;;  %v6859_v8 = vadd.f32 %v6858_v13, %v6857_v25  ;;  %v3125_v30 = vadd.f32 %v3107_v22, %v3036_v27 }
 0x2de   : > { %v3149_v1 = vsel %vm3129_vm14, %v3119_v18, %v3139_v14  ;;  %vm3134_vm0 = vcmp.gt.f32.partialorder %v3124_v19, 0.0  ;;  %v3144_v33 = vmul.f32 0.01, %v3124_v19 }
 0x2df   : > { %v3150_v35 = vsel %vm3130_vm15, %v3120_v11, %v3140_v28  ;;  %v9225_v37 = vadd.f32 %v6859_v8, %v9147_v62  ;;  %vm3135_vm2 = vcmp.gt.f32.partialorder %v3125_v30, 0.0  ;;  %v3145_v38 = vmul.f32 0.01, %v3125_v30 }
 0x2e0   : > { %v9227_v15 = vcombine.low %v3149_v1, %v3150_v35  ;;  %v9229_v39 = vcombine.high %v3149_v1, %v3150_v35  ;;  %v3154_v40 = vsel %vm3134_vm0, %v3124_v19, %v3144_v33 }
 0x2e1   : > { %v3155_v41 = vsel %vm3135_vm2, %v3125_v30, %v3145_v38 }
 0x2e2   : > { %v9234_v43 = vcombine.low %v3154_v40, %v3155_v41  ;;  %v9236_v44 = vcombine.high %v3154_v40, %v3155_v41  ;;  %v3392_v45 = vrot.slane %v9227_v15, %v9217_v12  ;;  %v3412_v46 = vrot.slane %v9229_v39, %v9217_v12 }
 0x2e3   : > { %v3388_v47 = vrot.slane %v9227_v15, %v8508_v36  ;;  %v3408_v48 = vrot.slane %v9229_v39, %v8508_v36  ;;  %v3192_v24 = vrot.slane %v9227_v15, %v9222_v34  ;;  %v3212_v16 = vrot.slane %v9229_v39, %v9222_v34 }
 0x2e4   : > { %v3432_v62 = vrot.slane %v9234_v43, %v9217_v12  ;;  %v3452_v49 = vrot.slane %v9236_v44, %v9217_v12  ;;  %v3480_v50 = vpack.c.bf16 %v3392_v45, %v3392_v45  ;;  %v3485_v51 = vpack.c.bf16 %v3412_v46, %v3412_v46  ;;  %v7655_v45 = vld [vmem:[%s10061_s5] sm:$0xff]  }
 0x2e5   : > { %v3428_v9 = vrot.slane %v9234_v43, %v8508_v36  ;;  %v3448_v52 = vrot.slane %v9236_v44, %v8508_v36  ;;  %v3479_v53 = vpack.c.bf16 %v3388_v47, %v3388_v47  ;;  %v3484_v20 = vpack.c.bf16 %v3408_v48, %v3408_v48 }
 0x2e6   : > { %v3490_v54 = vpack.c.bf16 %v3432_v62, %v3432_v62  ;;  %v3495_v55 = vpack.c.bf16 %v3452_v49, %v3452_v49  ;;  %v3601_v56 = vunpack.c.l.b16 %v3480_v50  ;;  %v3606_v57 = vunpack.c.l.b16 %v3485_v51 }
 0x2e7   : > { %v3489_v58 = vpack.c.bf16 %v3428_v9, %v3428_v9  ;;  %v3494_v59 = vpack.c.bf16 %v3448_v52, %v3448_v52  ;;  %v3600_v60 = vunpack.c.l.b16 %v3479_v53  ;;  %v3605_v61 = vunpack.c.l.b16 %v3484_v20 }
 0x2e8   : > { %v3611_v63 = vunpack.c.l.b16 %v3490_v54  ;;  %v3616_v0 = vunpack.c.l.b16 %v3495_v55  ;;  %v3638_v7 = vrot.slane %v3601_v56, 1  ;;  %v3232_v22 = vrot.slane %v9234_v43, %v9222_v34  ;;  %v7659_v56 = vld [vmem:[%s10061_s5 + $0x8] sm:$0xff]  }
 0x2e9   : > { %v3610_v23 = vunpack.c.l.b16 %v3489_v58  ;;  %v3615_v31 = vunpack.c.l.b16 %v3494_v59  ;;  %v3632_v10 = vrot.slane %v3600_v60, 1  ;;  %v3252_v18 = vrot.slane %v9236_v44, %v9222_v34 }
 0x2ea   : > { %v3639_v21 = vsel %vm3619_vm3, %v3606_v57, %v3638_v7  ;;  %v3640_v29 = vrot.slane %v3611_v63, 7  ;;  %v3642_v25 = vrot.slane %v3616_v0, 6  ;;  %v3280_v11 = vpack.c.bf16 %v3192_v24, %v3192_v24  ;;  %v7657_v24 = vld [vmem:[%s10061_s5 + $0x48] sm:$0xff]  }
 0x2eb   : > { %v3633_v26 = vsel %vm3619_vm3, %v3605_v61, %v3632_v10  ;;  %v3634_v13 = vrot.slane %v3610_v23, 7  ;;  %v3636_v14 = vrot.slane %v3615_v31, 6  ;;  %v3285_v19 = vpack.c.bf16 %v3212_v16, %v3212_v16  ;;  %v7661_v61 = vld [vmem:[%s10061_s5 + $0x50] sm:$0xff]  }
 0x2ec   : > { %v3641_v27 = vsel %vm505_vm1, %v3640_v29, %v3639_v21  ;;  %v3290_v28 = vpack.c.bf16 %v3232_v22, %v3232_v22  ;;  %v3295_v8 = vpack.c.bf16 %v3252_v18, %v3252_v18  ;;  %v4043_v30 = vunpack.c.l.b16 %v3280_v11 }
 0x2ed   : > { %v3643_v1 = vsel %vm3624_vm4, %v3642_v25, %v3641_v27  ;;  %v3635_v33 = vsel %vm505_vm1, %v3634_v13, %v3633_v26  ;;  %v4048_v35 = vunpack.c.l.b16 %v3285_v19  ;;  %v4475_v38 = vrot.slane %v9227_v15, %v9232_v42  ;;  %v7663_v26 = vld [vmem:[%s10061_s5 + $0x10] sm:$0xff]   ;;  %v7665_v27 = vld [vmem:[%s10061_s5 + $0x58] sm:$0xff]  }
 0x2ee   : > { %v3653_v40 = vpack.c.b16 %v3643_v1, %v3643_v1  ;;  %v3637_v41 = vsel %vm3624_vm4, %v3636_v14, %v3635_v33  ;;  %v4053_v46 = vunpack.c.l.b16 %v3290_v28  ;;  %v4058_v47 = vunpack.c.l.b16 %v3295_v8 }
 0x2ef   : > { %v3652_v48 = vpack.c.b16 %v3637_v41, %v3637_v41  ;;  %v4078_v16 = vrot.slane %v4048_v35, 7  ;;  %v4495_v62 = vrot.slane %v9229_v39, %v9232_v42  ;;  %v4515_v49 = vrot.slane %v9234_v43, %v9232_v42 }
 0x2f0   : > { %3972 = vmatprep.mubr.bf16.mxu0 %v3653_v40  ;;  %v4080_v50 = vrot.slane %v4053_v46, 6  ;;  %v4082_v51 = vrot.slane %v4058_v47, 5  ;;  %v4535_v9 = vrot.slane %v9236_v44, %v9232_v42  ;;  %v4563_v52 = vpack.c.bf16 %v4475_v38, %v4475_v38 }
 0x2f1   : > { %3973 = vmatmul.mubr.bf16.vlgmr.msra.gmra.mrb[24].mxu0 %v3652_v48  ;;  %v4079_v53 = vsel %vm3619_vm3, %v4078_v16, %v4043_v30  ;;  %v4568_v20 = vpack.c.bf16 %v4495_v62, %v4495_v62  ;;  %v4573_v54 = vpack.c.bf16 %v4515_v49, %v4515_v49  ;;  %v3188_v55 = vrot.slane %v9227_v15, %v8502_v32  ;;  %v7667_v62 = vld [vmem:[%s10061_s5 + $0x18] sm:$0xff]  }
 0x2f2   : > { %6936 = vmatpush3.bf16.msra.mxu0 %v7655_v45  ;;  %v4081_v57 = vsel %vm505_vm1, %v4080_v50, %v4079_v53  ;;  %v4578_v58 = vpack.c.bf16 %v4535_v9, %v4535_v9  ;;  %v4684_v59 = vunpack.c.l.b16 %v4563_v52  ;;  %v3208_v60 = vrot.slane %v9229_v39, %v8502_v32  ;;  %v7669_v53 = vld [vmem:[%s10061_s5 + $0x60] sm:$0xff]  }
 0x2f3   : > { %6937 = vmatprep.subr.bf16.mxu0 %v7657_v24  ;;  %v9295_v63 = vsel %vm3624_vm4, %v4082_v51, %v4081_v57  ;;  %v4689_v0 = vunpack.c.l.b16 %v4568_v20  ;;  %v3228_v7 = vrot.slane %v9234_v43, %v8502_v32  ;;  %v9300_v22 = vsub.s32 7, %v8149_v5 }
 0x2f4   : > { %v4694_v23 = vunpack.c.l.b16 %v4573_v54  ;;  %v4699_v31 = vunpack.c.l.b16 %v4578_v58  ;;  %v4719_v10 = vrot.slane %v4684_v59, 2  ;;  %v3248_v18 = vrot.slane %v9236_v44, %v8502_v32 }
 0x2f5   : > { %v4720_v21 = vrot.slane %v4689_v0, 1  ;;  %v3279_v29 = vpack.c.bf16 %v3188_v55, %v3188_v55  ;;  %v3284_v25 = vpack.c.bf16 %v3208_v60, %v3208_v60  ;;  %v3289_v11 = vpack.c.bf16 %v3228_v7, %v3228_v7 }
 0x2f6   : > { %6938 = vmatpush3.bf16.msra.mxu0 %v7659_v56  ;;  %v4723_v13 = vrot.slane %v4699_v31, 7  ;;  %v3294_v14 = vpack.c.bf16 %v3248_v18, %v3248_v18  ;;  %v4471_v5 = vrot.slane %v9227_v15, %v9202_v3  ;;  %v4491_v19 = vrot.slane %v9229_v39, %v9202_v3  ;;  %v7671_v31 = vld [vmem:[%s10061_s5 + $0x20] sm:$0xff]  }
 0x2f7   : > { %6939 = vmatprep.subr.bf16.mxu0 %v7661_v61  ;;  %v4721_v28 = vsel %vm3619_vm3, %v4720_v21, %v4719_v10  ;;  %v4042_v8 = vunpack.c.l.b16 %v3279_v29  ;;  %v4047_v30 = vunpack.c.l.b16 %v3284_v25  ;;  %v4052_v1 = vunpack.c.l.b16 %v3289_v11 }
 0x2f8   : > { %v4722_v33 = vsel %vm505_vm1, %v4694_v23, %v4721_v28  ;;  %v4057_v35 = vunpack.c.l.b16 %v3294_v14  ;;  %v4511_v38 = vrot.slane %v9234_v43, %v9202_v3  ;;  %v4531_v40 = vrot.slane %v9236_v44, %v9202_v3  ;;  %v7675_v28 = vld [vmem:[%s10061_s5 + $0x28] sm:$0xff]  }
 0x2f9   : > { %v6876_v41 = vpop.f32.mrb[20].mxu0  ;;  %v9321_v45 = vsel %vm3624_vm4, %v4723_v13, %v4722_v33  ;;  %v4072_v46 = vrot.slane %v4047_v30, 7  ;;  %v4074_v47 = vrot.slane %v4052_v1, 6  ;;  %v4562_v48 = vpack.c.bf16 %v4471_v5, %v4471_v5 }
 0x2fa   : > { %v6877_v24 = vpop.f32.mrb[21].mxu0  ;;  %v3111_v16 = vrot.slane %v9207_v4, %v9222_v34  ;;  %6940 = vmatpush3.bf16.msra.mxu0 %v7663_v26  ;;  %v4076_v49 = vrot.slane %v4057_v35, 5  ;;  %v4567_v50 = vpack.c.bf16 %v4491_v19, %v4491_v19  ;;  %v4572_v51 = vpack.c.bf16 %v4511_v38, %v4511_v38  ;;  %v7677_v35 = vld [vmem:[%s10061_s5 + $0x70] sm:$0xff]  }
 0x2fb   : > { %v6878_v9 = vadd.f32 %v6877_v24, %v6876_v41  ;;  %v6879_v52 = vpop.f32.mrb[22].mxu0  ;;  %6941 = vmatprep.subr.bf16.mxu0 %v7665_v27  ;;  %v4073_v20 = vsel %vm3619_vm3, %v4072_v46, %v4042_v8  ;;  %v4577_v54 = vpack.c.bf16 %v4531_v40, %v4531_v40  ;;  %v4683_v55 = vunpack.c.l.b16 %v4562_v48 }
 0x2fc   : > { %v6880_v56 = vpop.f32.mrb[23].mxu0  ;;  %v4075_v57 = vsel %vm505_vm1, %v4074_v47, %v4073_v20  ;;  %v4688_v58 = vunpack.c.l.b16 %v4567_v50  ;;  %v4693_v59 = vunpack.c.l.b16 %v4572_v51  ;;  %v5117_v60 = vrot.slane %v9227_v15, %v9300_v22 }
 0x2fd   : > { %v3084_v61 = vadd.f32 %v6878_v9, %v9219_v17  ;;  %v6881_v0 = vadd.f32 %v6880_v56, %v6879_v52  ;;  %v9337_v7 = vsel %vm3624_vm4, %v4076_v49, %v4075_v57  ;;  %v4698_v23 = vunpack.c.l.b16 %v4577_v54  ;;  %v7673_v17 = vld [vmem:[%s10061_s5 + $0x68] sm:$0xff]   ;;  %v7679_v9 = vld [vmem:[%s10061_s5 + $0x30] sm:$0xff]  }
 0x2fe   : > { %6942 = vmatpush3.bf16.msra.mxu0 %v7667_v62  ;;  %v4713_v10 = vrot.slane %v4683_v55, 2  ;;  %v4714_v18 = vrot.slane %v4688_v58, 1  ;;  %v5137_v21 = vrot.slane %v9229_v39, %v9300_v22  ;;  %v5157_v26 = vrot.slane %v9234_v43, %v9300_v22  ;;  %v7681_v55 = vld [vmem:[%s10061_s5 + $0x78] sm:$0xff]  }
 0x2ff   : > { %v3121_v29 = vadd.f32 %v3111_v16, %v3084_v61  ;;  %v3089_v25 = vadd.f32 %v6881_v0, %v9225_v37  ;;  %6943 = vmatprep.subr.bf16.mxu0 %v7669_v53  ;;  %v4717_v11 = vrot.slane %v4698_v23, 7  ;;  %v5205_v14 = vpack.c.bf16 %v5117_v60, %v5117_v60 }
 0x300   : > { %v4715_v13 = vsel %vm3619_vm3, %v4714_v18, %v4713_v10  ;;  %v9354_v37 = vrot.slane %v9207_v4, %v8502_v32  ;;  %v5210_v30 = vpack.c.bf16 %v5137_v21, %v5137_v21  ;;  %v5215_v38 = vpack.c.bf16 %v5157_v26, %v5157_v26  ;;  %v7683_v10 = vld [vmem:[%s10061_s5 + $0x38] sm:$0xff]  }
 0x301   : > { %vm3131_vm5 = vcmp.gt.f32.partialorder %v3121_v29, 0.0  ;;  %v3141_v5 = vmul.f32 0.01, %v3121_v29  ;;  %v3126_v19 = vadd.f32 %v3111_v16, %v3089_v25  ;;  %v4716_v27 = vsel %vm505_vm1, %v4693_v59, %v4715_v13 }
 0x302   : > { %6944 = vmatpush3.bf16.msra.mxu0 %v7671_v31  ;;  %v9360_v8 = vsel %vm3624_vm4, %v4717_v11, %v4716_v27  ;;  %v9370_v47 = vrot.slane %v9236_v44, %v9300_v22  ;;  %v9377_v62 = vunpack.c.l.b16 %v5205_v14  ;;  %v9382_v52 = vunpack.c.l.b16 %v5210_v30 }
 0x303   : > { %v3151_v1 = vsel %vm3131_vm5, %v3121_v29, %v3141_v5  ;;  %vm3136_vm6 = vcmp.gt.f32.partialorder %v3126_v19, 0.0  ;;  %v3146_v33 = vmul.f32 0.01, %v3126_v19  ;;  %6945 = vmatprep.subr.bf16.mxu0 %v7673_v17  ;;  %v9389_v56 = vunpack.c.l.b16 %v5215_v38 }
 0x304   : > { %v3196_v40 = vrot.slane %v3151_v1, %v8502_v32  ;;  %v3396_v41 = vrot.slane %v3151_v1, %v8508_v36  ;;  %v4479_v46 = vrot.slane %v3151_v1, %v9202_v3  ;;  %v9372_v48 = vcombine.high %v3151_v1, %v3151_v1 }
 0x305   : > { %v9375_v24 = vrot.slane %v3151_v1, %v9210_v6  ;;  %v3156_v16 = vsel %vm3136_vm6, %v3126_v19, %v3146_v33 }
 0x306   : > { %v3481_v49 = vpack.c.bf16 %v3396_v41, %v3396_v41  ;;  %v4564_v50 = vpack.c.bf16 %v4479_v46, %v4479_v46  ;;  %v3176_v51 = vcombine.high %v3156_v16, %v3156_v16  ;;  %6946 = vmatpush3.bf16.msra.mxu0 %v7675_v28  ;;  %v3281_v53 = vpack.c.bf16 %v3196_v40, %v3196_v40 }
 0x307   : > { %v3236_v20 = vrot.slane %v3156_v16, %v8502_v32  ;;  %v3436_v54 = vrot.slane %v3156_v16, %v8508_v36  ;;  %6947 = vmatprep.subr.bf16.mxu0 %v7677_v35  ;;  %v5206_v59 = vpack.c.bf16 %v9375_v24, %v9375_v24  ;;  %v4519_v60 = vrot.slane %v3156_v16, %v9202_v3 }
 0x308   : > { %v3602_v57 = vunpack.c.l.b16 %v3481_v49  ;;  %v4685_v58 = vunpack.c.l.b16 %v4564_v50  ;;  %v5161_v61 = vrot.slane %v3156_v16, %v9210_v6  ;;  %v3416_v0 = vrot.slane %v9372_v48, %v8508_v36 }
 0x309   : > { %v3456_v23 = vrot.slane %v3176_v51, %v8508_v36  ;;  %v3491_v31 = vpack.c.bf16 %v3436_v54, %v3436_v54  ;;  %v3216_v21 = vrot.slane %v9372_v48, %v8502_v32  ;;  %v3256_v29 = vrot.slane %v3176_v51, %v8502_v32 }
 0x30a   : > { %6948 = vmatpush3.bf16.msra.mxu0 %v7679_v9  ;;  %v3644_v18 = vrot.slane %v3602_v57, 1  ;;  %v3291_v25 = vpack.c.bf16 %v3236_v20, %v3236_v20  ;;  %v3486_v17 = vpack.c.bf16 %v3416_v0, %v3416_v0  ;;  %v4499_v13 = vrot.slane %v9372_v48, %v9202_v3 }
 0x30b   : > { %6949 = vmatprep.subr.bf16.mxu0 %v7681_v55  ;;  %v3496_v11 = vpack.c.bf16 %v3456_v23, %v3456_v23  ;;  %v3612_v26 = vunpack.c.l.b16 %v3491_v31  ;;  %v3286_v14 = vpack.c.bf16 %v3216_v21, %v3216_v21  ;;  %v3296_v5 = vpack.c.bf16 %v3256_v29, %v3256_v29 }
 0x30c   : > { %v4054_v19 = vunpack.c.l.b16 %v3291_v25  ;;  %v4539_v27 = vrot.slane %v3176_v51, %v9202_v3  ;;  %v3607_v28 = vunpack.c.l.b16 %v3486_v17  ;;  %v4569_v33 = vpack.c.bf16 %v4499_v13, %v4499_v13 }
 0x30d   : > { %v3617_v30 = vunpack.c.l.b16 %v3496_v11  ;;  %v3646_v1 = vrot.slane %v3612_v26, 7  ;;  %v4049_v35 = vunpack.c.l.b16 %v3286_v14  ;;  %v4059_v38 = vunpack.c.l.b16 %v3296_v5 }
 0x30e   : > { %6950 = vmatpush3.bf16.msra.mxu0 %v7683_v10  ;;  %v4086_v40 = vrot.slane %v4054_v19, 6  ;;  %v4574_v41 = vpack.c.bf16 %v4519_v60, %v4519_v60  ;;  %v3645_v46 = vsel %vm3619_vm3, %v3607_v28, %v3644_v18  ;;  %v4579_v16 = vpack.c.bf16 %v4539_v27, %v4539_v27 }
 0x30f   : > { %7119 = vmatprep.subr.bf16.mxu0 %v7936_v2  ;;  %v3648_v24 = vrot.slane %v3617_v30, 6  ;;  %v4690_v49 = vunpack.c.l.b16 %v4569_v33  ;;  %v4044_v50 = vunpack.c.l.b16 %v3281_v53  ;;  %v3647_v9 = vsel %vm505_vm1, %v3646_v1, %v3645_v46 }
 0x310   : > { %v4084_v20 = vrot.slane %v4049_v35, 7  ;;  %v4088_v54 = vrot.slane %v4059_v38, 5  ;;  %v4700_v57 = vunpack.c.l.b16 %v4579_v16  ;;  %v4725_v0 = vrot.slane %v4685_v58, 2 }
 0x311   : > { %v9411_v55 = vsel %vm3624_vm4, %v3648_v24, %v3647_v9  ;;  %v4726_v23 = vrot.slane %v4690_v49, 1  ;;  %v4695_v31 = vunpack.c.l.b16 %v4574_v41  ;;  %v5141_v10 = vrot.slane %v9372_v48, %v9210_v6 }
 0x312   : > { %v4085_v60 = vsel %vm3619_vm3, %v4084_v20, %v4044_v50  ;;  %v5181_v18 = vrot.slane %v3176_v51, %v9210_v6  ;;  %v4729_v29 = vrot.slane %v4700_v57, 7  ;;  %v5216_v25 = vpack.c.bf16 %v5161_v61, %v5161_v61 }
 0x313   : > { %v4087_v53 = vsel %vm505_vm1, %v4086_v40, %v4085_v60  ;;  %v4727_v21 = vsel %vm3619_vm3, %v4726_v23, %v4725_v0  ;;  %v5327_v17 = vunpack.c.l.b16 %v5206_v59  ;;  %v5211_v26 = vpack.c.bf16 %v5141_v10, %v5141_v10 }
 0x314   : > { %v9420_v11 = vsel %vm3624_vm4, %v4088_v54, %v4087_v53  ;;  %v4728_v58 = vsel %vm505_vm1, %v4695_v31, %v4727_v21  ;;  %v5221_v14 = vpack.c.bf16 %v5181_v18, %v5181_v18  ;;  %v5337_v48 = vunpack.c.l.b16 %v5216_v25 }
 0x315   : > { %v9424_v13 = vsel %vm3624_vm4, %v4729_v29, %v4728_v58  ;;  %v5220_v51 = vpack.c.bf16 %v9370_v47, %v9370_v47  ;;  %v3099_v5 = vrot.slane %v9207_v4, %v8508_v36  ;;  %v5332_v19 = vunpack.c.l.b16 %v5211_v26 }
 0x316   : > { %v5370_v61 = vrot.slane %v5337_v48, 1  ;;  %v5361_v59 = vrot.slane %v9377_v62, 3  ;;  %v5362_v27 = vrot.slane %v9382_v52, 2  ;;  %v5364_v28 = vrot.slane %v9389_v56, 1 }
 0x317   : > { %v5367_v1 = vrot.slane %v5327_v17, 3  ;;  %v5368_v33 = vrot.slane %v5332_v19, 2  ;;  %v5342_v40 = vunpack.c.l.b16 %v5221_v14  ;;  %v5341_v41 = vunpack.c.l.b16 %v5220_v51 }
 0x318   : > { %v2987_v30 = vpop.f32.mrb[0].mxu1  ;;  %v5363_v47 = vsel %vm3619_vm3, %v5362_v27, %v5361_v59  ;;  %v9439_v52 = vrot.slane %v9227_v15, %v9210_v6  ;;  %v9455_v18 = vrot.slane %v9229_v39, %v9210_v6  ;;  %v9459_v21 = vrot.slane %v9234_v43, %v9210_v6 }
 0x319   : > { %v3117_v35 = vadd.f32 %v9354_v37, %v2987_v30  ;;  %v2989_v38 = vpop.f32.mrb[1].mxu1  ;;  %v5369_v24 = vsel %vm3619_vm3, %v5368_v33, %v5367_v1  ;;  %v5365_v62 = vsel %vm505_vm1, %v5364_v28, %v5363_v47  ;;  %v9463_v29 = vrot.slane %v9236_v44, %v9210_v6 }
 0x31a   : > { %v3118_v46 = vadd.f32 %v3099_v5, %v2989_v38  ;;  %v2991_v4 = vpop.f32.mrb[2].mxu1  ;;  %v5371_v50 = vsel %vm505_vm1, %v5370_v61, %v5369_v24  ;;  %v9447_v60 = vsel %vm3624_vm4, %v5341_v41, %v5365_v62  ;;  %v5204_v25 = vpack.c.bf16 %v9439_v52, %v9439_v52 }
 0x31b   : > { %vm3127_vm7 = vcmp.gt.f32.partialorder %v3117_v35, 0.0  ;;  %v3137_v56 = vmul.f32 0.01, %v3117_v35  ;;  %v3122_v16 = vadd.f32 %v9354_v37, %v2991_v4  ;;  %v2993_v49 = vpop.f32.mrb[3].mxu1  ;;  %v9444_v54 = vsel %vm3624_vm4, %v5342_v40, %v5371_v50 }
 0x31c   : > { %vm3128_vm8 = vcmp.gt.f32.partialorder %v3118_v46, 0.0  ;;  %v3138_v9 = vmul.f32 0.01, %v3118_v46  ;;  %v3123_v20 = vadd.f32 %v3099_v5, %v2993_v49 }
 0x31d   : > { %v3147_v57 = vsel %vm3127_vm7, %v3117_v35, %v3137_v56  ;;  %vm3132_vm9 = vcmp.gt.f32.partialorder %v3122_v16, 0.0  ;;  %v3142_v0 = vmul.f32 0.01, %v3122_v16 }
 0x31e   : > { %v3148_v23 = vsel %vm3128_vm8, %v3118_v46, %v3138_v9  ;;  %vm3133_vm10 = vcmp.gt.f32.partialorder %v3123_v20, 0.0  ;;  %v3143_v15 = vmul.f32 0.01, %v3123_v20 }
 0x31f   : > { %v9449_v31 = vcombine.low %v3147_v57, %v3148_v23  ;;  %v9451_v37 = vcombine.high %v3147_v57, %v3148_v23  ;;  %v3152_v10 = vsel %vm3132_vm9, %v3122_v16, %v3142_v0 }
 0x320   : > { %v3153_v53 = vsel %vm3133_vm10, %v3123_v20, %v3143_v15 }
 0x321   : > { %v9467_v17 = vcombine.low %v3152_v10, %v3153_v53  ;;  %v9469_v58 = vcombine.high %v3152_v10, %v3153_v53  ;;  %v3384_v39 = vrot.slane %v9449_v31, %v9217_v12  ;;  %v3404_v26 = vrot.slane %v9451_v37, %v9217_v12 }
 0x322   : > { %v3184_v43 = vrot.slane %v9449_v31, %v9222_v34  ;;  %v3204_v44 = vrot.slane %v9451_v37, %v9222_v34  ;;  %v3380_v14 = vrot.slane %v9449_v31, %v8508_v36  ;;  %v3400_v48 = vrot.slane %v9451_v37, %v8508_v36 }
 0x323   : > { %v3424_v51 = vrot.slane %v9467_v17, %v9217_v12  ;;  %v3444_v5 = vrot.slane %v9469_v58, %v9217_v12  ;;  %v3478_v19 = vpack.c.bf16 %v3384_v39, %v3384_v39  ;;  %v3483_v61 = vpack.c.bf16 %v3404_v26, %v3404_v26 }
 0x324   : > { %v3224_v59 = vrot.slane %v9467_v17, %v9222_v34  ;;  %v3244_v27 = vrot.slane %v9469_v58, %v9222_v34  ;;  %v3278_v28 = vpack.c.bf16 %v3184_v43, %v3184_v43  ;;  %v3283_v30 = vpack.c.bf16 %v3204_v44, %v3204_v44 }
 0x325   : > { %v3488_v1 = vpack.c.bf16 %v3424_v51, %v3424_v51  ;;  %v3493_v33 = vpack.c.bf16 %v3444_v5, %v3444_v5  ;;  %v3599_v35 = vunpack.c.l.b16 %v3478_v19  ;;  %v3604_v38 = vunpack.c.l.b16 %v3483_v61 }
 0x326   : > { %v3288_v40 = vpack.c.bf16 %v3224_v59, %v3224_v59  ;;  %v3293_v41 = vpack.c.bf16 %v3244_v27, %v3244_v27  ;;  %v4041_v47 = vunpack.c.l.b16 %v3278_v28  ;;  %v4046_v46 = vunpack.c.l.b16 %v3283_v30 }
 0x327   : > { %v3609_v4 = vunpack.c.l.b16 %v3488_v1  ;;  %v3614_v12 = vunpack.c.l.b16 %v3493_v33  ;;  %v3626_v24 = vrot.slane %v3599_v35, 1  ;;  %v3420_v62 = vrot.slane %v9467_v17, %v8508_v36 }
 0x328   : > { %v4051_v56 = vunpack.c.l.b16 %v3288_v40  ;;  %v4056_v16 = vunpack.c.l.b16 %v3293_v41  ;;  %v4066_v49 = vrot.slane %v4046_v46, 7  ;;  %v3440_v34 = vrot.slane %v9469_v58, %v8508_v36 }
 0x329   : > { %v3627_v50 = vsel %vm3619_vm3, %v3604_v38, %v3626_v24  ;;  %v3628_v9 = vrot.slane %v3609_v4, 7  ;;  %v3630_v20 = vrot.slane %v3614_v12, 6  ;;  %v3477_v57 = vpack.c.bf16 %v3380_v14, %v3380_v14 }
 0x32a   : > { %v4067_v0 = vsel %vm3619_vm3, %v4066_v49, %v4041_v47  ;;  %v4068_v23 = vrot.slane %v4051_v56, 6  ;;  %v4070_v15 = vrot.slane %v4056_v16, 5  ;;  %v3482_v10 = vpack.c.bf16 %v3400_v48, %v3400_v48 }
 0x32b   : > { %v3629_v53 = vsel %vm505_vm1, %v3628_v9, %v3627_v50  ;;  %v3487_v39 = vpack.c.bf16 %v3420_v62, %v3420_v62  ;;  %v3492_v26 = vpack.c.bf16 %v3440_v34, %v3440_v34  ;;  %v3598_v43 = vunpack.c.l.b16 %v3477_v57 }
 0x32c   : > { %v3631_v44 = vsel %vm3624_vm4, %v3630_v20, %v3629_v53  ;;  %v4069_v51 = vsel %vm505_vm1, %v4068_v23, %v4067_v0  ;;  %v3603_v36 = vunpack.c.l.b16 %v3482_v10  ;;  %v3180_v5 = vrot.slane %v9449_v31, %v8502_v32 }
 0x32d   : > { %v3651_v19 = vpack.c.b16 %v3631_v44, %v3631_v44  ;;  %v4071_v14 = vsel %vm3624_vm4, %v4070_v15, %v4069_v51  ;;  %v3608_v61 = vunpack.c.l.b16 %v3487_v39  ;;  %v3613_v59 = vunpack.c.l.b16 %v3492_v26  ;;  %v7686_v51 = vld [vmem:[%s10061_s5 + $0x248] sm:$0xff]  }
 0x32e   : > { %v4091_v27 = vpack.c.b16 %v4071_v14, %v4071_v14  ;;  %v3618_v48 = vrot.slane %v3598_v43, 1  ;;  %v3200_v28 = vrot.slane %v9451_v37, %v8502_v32  ;;  %v3220_v30 = vrot.slane %v9467_v17, %v8502_v32 }
 0x32f   : > { %3932 = vmatprep.mubr.bf16.mxu1 %v3651_v19  ;;  %v3621_v1 = vrot.slane %v3608_v61, 7  ;;  %v3623_v33 = vrot.slane %v3613_v59, 6  ;;  %v3240_v35 = vrot.slane %v9469_v58, %v8502_v32  ;;  %v3277_v38 = vpack.c.bf16 %v3180_v5, %v3180_v5  ;;  %v7684_v32 = vld [vmem:[%s10061_s5 + $0x240] sm:$0xff]  }
 0x330   : > { %4372 = vmatprep.mubr.bf16.mxu0 %v4091_v27  ;;  %v3620_v40 = vsel %vm3619_vm3, %v3603_v36, %v3618_v48  ;;  %v3282_v41 = vpack.c.bf16 %v3200_v28, %v3200_v28  ;;  %v3287_v47 = vpack.c.bf16 %v3220_v30, %v3220_v30  ;;  %v4467_v46 = vrot.slane %v9449_v31, %v9232_v42  ;;  %v7685_v48 = vld [vmem:[%s10061_s5 + $0x100] sm:$0xff]  }
 0x331   : > { %v3622_v4 = vsel %vm505_vm1, %v3621_v1, %v3620_v40  ;;  %v3292_v12 = vpack.c.bf16 %v3240_v35, %v3240_v35  ;;  %v4040_v24 = vunpack.c.l.b16 %v3277_v38  ;;  %v4487_v62 = vrot.slane %v9451_v37, %v9232_v42 }
 0x332   : > { %v3625_v56 = vsel %vm3624_vm4, %v3623_v33, %v3622_v4  ;;  %v4045_v16 = vunpack.c.l.b16 %v3282_v41  ;;  %v4050_v49 = vunpack.c.l.b16 %v3287_v47  ;;  %v4507_v34 = vrot.slane %v9467_v17, %v9232_v42  ;;  %v7688_v41 = vld [vmem:[%s10061_s5 + $0x250] sm:$0xff]  }
 0x333   : > { %v3650_v50 = vpack.c.b16 %v3625_v56, %v3625_v56  ;;  %v4055_v9 = vunpack.c.l.b16 %v3292_v12  ;;  %v4527_v20 = vrot.slane %v9469_v58, %v9232_v42  ;;  %v4561_v57 = vpack.c.bf16 %v4467_v46, %v4467_v46 }
 0x334   : > { %v4060_v0 = vrot.slane %v4045_v16, 7  ;;  %v4062_v23 = vrot.slane %v4050_v49, 6  ;;  %v4566_v15 = vpack.c.bf16 %v4487_v62, %v4487_v62  ;;  %v4571_v10 = vpack.c.bf16 %v4507_v34, %v4507_v34 }
 0x335   : > { %3933 = vmatmul.mubr.bf16.vlgmr.msra.gmra.mrb[12].mxu1 %v3650_v50  ;;  %v4064_v53 = vrot.slane %v4055_v9, 5  ;;  %v4576_v39 = vpack.c.bf16 %v4527_v20, %v4527_v20  ;;  %v4682_v26 = vunpack.c.l.b16 %v4561_v57  ;;  %v5109_v43 = vrot.slane %v9449_v31, %v9300_v22 }
 0x336   : > { %7100 = vmatpush3.bf16.msra.mxu1 %v7684_v32  ;;  %v4061_v44 = vsel %vm3619_vm3, %v4060_v0, %v4040_v24  ;;  %7115 = vmatprep.mubr.msk.bf16.mxu1 %vm7937_vm11, %v7936_v2  ;;  %v4687_v42 = vunpack.c.l.b16 %v4566_v15  ;;  %v4692_v36 = vunpack.c.l.b16 %v4571_v10  ;;  %v5129_v5 = vrot.slane %v9451_v37, %v9300_v22  ;;  %v7687_v32 = vld [vmem:[%s10061_s5 + $0x108] sm:$0xff]  }
 0x337   : > { %v4063_v19 = vsel %vm505_vm1, %v4062_v23, %v4061_v44  ;;  %7101 = vmatprep.subr.bf16.mxu1 %v7936_v2  ;;  %v4697_v14 = vunpack.c.l.b16 %v4576_v39  ;;  %v4707_v61 = vrot.slane %v4682_v26, 2  ;;  %v5149_v59 = vrot.slane %v9467_v17, %v9300_v22  ;;  %v7690_v23 = vld [vmem:[%s10061_s5 + $0x258] sm:$0xff]   ;;  %v7689_v44 = vld [vmem:[%s10061_s5 + $0x110] sm:$0xff]  }
 0x338   : > { %v4065_v27 = vsel %vm3624_vm4, %v4064_v53, %v4063_v19  ;;  %v4708_v28 = vrot.slane %v4687_v42, 1  ;;  %v5169_v30 = vrot.slane %v9469_v58, %v9300_v22  ;;  %v5203_v1 = vpack.c.bf16 %v5109_v43, %v5109_v43 }
 0x339   : > { %v4090_v33 = vpack.c.b16 %v4065_v27, %v4065_v27  ;;  %v4711_v35 = vrot.slane %v4697_v14, 7  ;;  %v5208_v38 = vpack.c.bf16 %v5129_v5, %v5129_v5  ;;  %v5213_v40 = vpack.c.bf16 %v5149_v59, %v5149_v59  ;;  %v7692_v14 = vld [vmem:[%s10061_s5 + $0x260] sm:$0xff]  }
 0x33a   : > { %7102 = vmatpush3.bf16.msra.mxu1 %v7686_v51  ;;  %v4709_v47 = vsel %vm3619_vm3, %v4708_v28, %v4707_v61  ;;  %v5218_v46 = vpack.c.bf16 %v5169_v30, %v5169_v30  ;;  %v5324_v4 = vunpack.c.l.b16 %v5203_v1  ;;  %v4463_v12 = vrot.slane %v9449_v31, %v9202_v3 }
 0x33b   : > { %4373 = vmatmul.mubr.bf16.vlgmr.msra.gmra.mrb[28].mxu0 %v4090_v33  ;;  %7103 = vmatprep.subr.bf16.mxu1 %v7936_v2  ;;  %v4710_v22 = vsel %vm505_vm1, %v4692_v36, %v4709_v47  ;;  %v5329_v24 = vunpack.c.l.b16 %v5208_v38  ;;  %v5334_v62 = vunpack.c.l.b16 %v5213_v40  ;;  %v4483_v56 = vrot.slane %v9451_v37, %v9202_v3 }
 0x33c   : > { %7120 = vmatpush3.bf16.msra.mxu0 %v7685_v48  ;;  %7135 = vmatprep.mubr.msk.bf16.mxu0 %vm7937_vm11, %v7936_v2  ;;  %v9559_v16 = vsel %vm3624_vm4, %v4711_v35, %v4710_v22  ;;  %v5349_v49 = vrot.slane %v5324_v4, 3  ;;  %v4503_v34 = vrot.slane %v9467_v17, %v9202_v3  ;;  %v5209_v50 = vpack.c.bf16 %v9455_v18, %v9455_v18  ;;  %v7694_v4 = vld [vmem:[%s10061_s5 + $0x268] sm:$0xff]  }
 0x33d   : > { %7121 = vmatprep.subr.bf16.mxu0 %v7936_v2  ;;  %v5339_v9 = vunpack.c.l.b16 %v5218_v46  ;;  %v5350_v20 = vrot.slane %v5329_v24, 2  ;;  %v5352_v57 = vrot.slane %v5334_v62, 1  ;;  %v4523_v0 = vrot.slane %v9469_v58, %v9202_v3 }
 0x33e   : > { %7104 = vmatpush3.bf16.msra.mxu1 %v7688_v41  ;;  %v4560_v15 = vpack.c.bf16 %v4463_v12, %v4463_v12  ;;  %v4565_v10 = vpack.c.bf16 %v4483_v56, %v4483_v56  ;;  %v4570_v53 = vpack.c.bf16 %v4503_v34, %v4503_v34  ;;  %v5105_v39 = vrot.slane %v9449_v31, %v9210_v6 }
 0x33f   : > { %7105 = vmatprep.subr.bf16.mxu1 %v7936_v2  ;;  %v5351_v18 = vsel %vm3619_vm3, %v5350_v20, %v5349_v49  ;;  %v4575_v26 = vpack.c.bf16 %v4523_v0, %v4523_v0  ;;  %v5125_v43 = vrot.slane %v9451_v37, %v9210_v6  ;;  %v5145_v3 = vrot.slane %v9467_v17, %v9210_v6  ;;  %v7696_v20 = vld [vmem:[%s10061_s5 + $0x270] sm:$0xff]  }
 0x340   : > { %7122 = vmatpush3.bf16.msra.mxu0 %v7687_v32  ;;  %v5353_v51 = vsel %vm505_vm1, %v5352_v57, %v5351_v18  ;;  %v4681_v42 = vunpack.c.l.b16 %v4560_v15  ;;  %v4686_v31 = vunpack.c.l.b16 %v4565_v10  ;;  %v4691_v36 = vunpack.c.l.b16 %v4570_v53  ;;  %v7695_v15 = vld [vmem:[%s10061_s5 + $0x128] sm:$0xff]   ;;  %v7698_v10 = vld [vmem:[%s10061_s5 + $0x278] sm:$0xff]   ;;  %v7700_v53 = vld [vmem:[%s10061_s5 + $0xc0] sm:$0xff]  }
 0x341   : > { %7123 = vmatprep.subr.bf16.mxu0 %v7936_v2  ;;  %v9585_v5 = vsel %vm3624_vm4, %v5339_v9, %v5353_v51  ;;  %v4696_v19 = vunpack.c.l.b16 %v4575_v26  ;;  %v5165_v37 = vrot.slane %v9469_v58, %v9210_v6  ;;  %v5202_v17 = vpack.c.bf16 %v5105_v39, %v5105_v39  ;;  %v7691_v6 = vld [vmem:[%s10061_s5 + $0x118] sm:$0xff]   ;;  %v7697_v39 = vld [vmem:[%s10061_s5 + $0x130] sm:$0xff]   ;;  %v7702_v18 = vld [vmem:[%s10061_s5 + $0x80] sm:$0xff]  }
 0x342   : > { %7106 = vmatpush3.bf16.msra.mxu1 %v7690_v23  ;;  %v4701_v61 = vrot.slane %v4681_v42, 2  ;;  %v4702_v59 = vrot.slane %v4686_v31, 1  ;;  %v5207_v27 = vpack.c.bf16 %v5125_v43, %v5125_v43  ;;  %v5214_v48 = vpack.c.bf16 %v9459_v21, %v9459_v21  ;;  %v7704_v43 = vld [vmem:[%s10061_s5 + $0xc8] sm:$0xff]   ;;  %v7708_v42 = vld [vmem:[%s10061_s5 + $0xd0] sm:$0xff]  }
 0x343   : > { %7107 = vmatprep.subr.bf16.mxu1 %v7936_v2  ;;  %v4705_v28 = vrot.slane %v4696_v19, 7  ;;  %v5212_v30 = vpack.c.bf16 %v5145_v3, %v5145_v3  ;;  %v5217_v1 = vpack.c.bf16 %v5165_v37, %v5165_v37  ;;  %v5323_v33 = vunpack.c.l.b16 %v5202_v17  ;;  %v7699_v3 = vld [vmem:[%s10061_s5 + $0x138] sm:$0xff]   ;;  %v7706_v51 = vld [vmem:[%s10061_s5 + $0x88] sm:$0xff]   ;;  %v7710_v37 = vld [vmem:[%s10061_s5 + $0x90] sm:$0xff]  }
 0x344   : > { %7124 = vmatpush3.bf16.msra.mxu0 %v7689_v44  ;;  %v4703_v58 = vsel %vm3619_vm3, %v4702_v59, %v4701_v61  ;;  %v5328_v35 = vunpack.c.l.b16 %v5207_v27  ;;  %v5325_v38 = vunpack.c.l.b16 %v5204_v25  ;;  %v5330_v40 = vunpack.c.l.b16 %v5209_v50  ;;  %v7712_v17 = vld [vmem:[%s10061_s5 + $0xd8] sm:$0xff]   ;;  %v7716_v61 = vld [vmem:[%s10061_s5 + $0xe0] sm:$0xff]   ;;  %v7711_v59 = vld [vmem:[%s10061_s5 + $0x310] sm:$0xff]  }
 0x345   : > { %7125 = vmatprep.subr.bf16.mxu0 %v7936_v2  ;;  %v4704_v21 = vsel %vm505_vm1, %v4691_v36, %v4703_v58  ;;  %v5333_v41 = vunpack.c.l.b16 %v5212_v30  ;;  %v5343_v47 = vrot.slane %v5323_v33, 3  ;;  %v5219_v46 = vpack.c.bf16 %v9463_v29, %v9463_v29  ;;  %v7693_v29 = vld [vmem:[%s10061_s5 + $0x120] sm:$0xff]   ;;  %v7705_v36 = vld [vmem:[%s10061_s5 + $0x348] sm:$0xff]   ;;  %v7713_v27 = vld [vmem:[%s10061_s5 + $0x358] sm:$0xff]  }
 0x346   : > { %7108 = vmatpush3.bf16.msra.mxu1 %v7692_v14  ;;  %v9610_v12 = vsel %vm3624_vm4, %v4705_v28, %v4704_v21  ;;  %v5344_v52 = vrot.slane %v5328_v35, 2  ;;  %v5335_v25 = vunpack.c.l.b16 %v5214_v48  ;;  %v5355_v24 = vrot.slane %v5325_v38, 3  ;;  %v7714_v14 = vld [vmem:[%s10061_s5 + $0x98] sm:$0xff]   ;;  %v7718_v48 = vld [vmem:[%s10061_s5 + $0xa0] sm:$0xff]   ;;  %v7720_v28 = vld [vmem:[%s10061_s5 + $0xe8] sm:$0xff]  }
 0x347   : > { %7109 = vmatprep.subr.bf16.mxu1 %v7936_v2  ;;  %v5346_v22 = vrot.slane %v5333_v41, 1  ;;  %v5356_v62 = vrot.slane %v5330_v40, 2  ;;  %v5338_v56 = vunpack.c.l.b16 %v5217_v1  ;;  %v5340_v50 = vunpack.c.l.b16 %v5219_v46  ;;  %v7715_v30 = vld [vmem:[%s10061_s5 + $0x318] sm:$0xff]   ;;  %v7717_v1 = vld [vmem:[%s10061_s5 + $0x360] sm:$0xff]   ;;  %v7722_v33 = vld [vmem:[%s10061_s5 + $0xa8] sm:$0xff]  }
 0x348   : > { %7126 = vmatpush3.bf16.msra.mxu0 %v7691_v6  ;;  %v5345_v32 = vsel %vm3619_vm3, %v5344_v52, %v5343_v47  ;;  %v5358_v49 = vrot.slane %v5335_v25, 1  ;;  %v3654_v26 = vpack.c.b16 %v9411_v55, %v9411_v55  ;;  %v4093_v44 = vpack.c.b16 %v9295_v63, %v9295_v63  ;;  %v7701_v55 = vld [vmem:[%s10061_s5 + $0x340] sm:$0xff]   ;;  %v7724_v6 = vld [vmem:[%s10061_s5 + $0xf0] sm:$0xff]   ;;  %v7721_v35 = vld [vmem:[%s10061_s5 + $0x368] sm:$0xff]  }
 0x349   : > { %7127 = vmatprep.subr.bf16.mxu0 %v7936_v2  ;;  %v5347_v34 = vsel %vm505_vm1, %v5346_v22, %v5345_v32  ;;  %v5357_v9 = vsel %vm3619_vm3, %v5356_v62, %v5355_v24  ;;  %v7703_v63 = vld [vmem:[%s10061_s5 + $0x300] sm:$0xff]   ;;  %v4094_v31 = vpack.c.b16 %v9420_v11, %v9420_v11  ;;  %v4734_v19 = vpack.c.b16 %v9321_v45, %v9321_v45  ;;  %v7707_v11 = vld [vmem:[%s10061_s5 + $0x308] sm:$0xff]   ;;  %v7709_v45 = vld [vmem:[%s10061_s5 + $0x350] sm:$0xff]  }
 0x34a   : > { %7110 = vmatpush3.bf16.msra.mxu1 %v7694_v4  ;;  %v9624_v57 = vsel %vm3624_vm4, %v5338_v56, %v5347_v34  ;;  %v5359_v0 = vsel %vm505_vm1, %v5358_v49, %v5357_v9  ;;  %v7719_v58 = vld [vmem:[%s10061_s5 + $0x320] sm:$0xff]   ;;  %v7726_v38 = vld [vmem:[%s10061_s5 + $0xb0] sm:$0xff]   ;;  %v7728_v40 = vld [vmem:[%s10061_s5 + $0xf8] sm:$0xff]   ;;  %v4092_v22 = vpack.c.b16 %v9337_v7, %v9337_v7  ;;  %v4733_v49 = vpack.c.b16 %v9360_v8, %v9360_v8 }
 0x34b   : > { %7111 = vmatprep.subr.bf16.mxu1 %v7936_v2  ;;  %v9629_v23 = vsel %vm3624_vm4, %v5340_v50, %v5359_v0  ;;  %v7723_v21 = vld [vmem:[%s10061_s5 + $0x328] sm:$0xff]   ;;  %v7725_v41 = vld [vmem:[%s10061_s5 + $0x370] sm:$0xff]   ;;  %v7730_v47 = vld [vmem:[%s10061_s5 + $0xb8] sm:$0xff]   ;;  %v5374_v50 = vpack.c.b16 %v9585_v5, %v9585_v5  ;;  %vm5793_vm1 = vcmask 523264  }
 0x34c   : > { %7128 = vmatpush3.bf16.msra.mxu0 %v7693_v29  ;;  %v7732_v46 = vld [vmem:[%s10061_s5 + $0x2c0] sm:$0xff]   ;;  %v7727_v4 = vld [vmem:[%s10061_s5 + $0x330] sm:$0xff]   ;;  %v7729_v52 = vld [vmem:[%s10061_s5 + $0x378] sm:$0xff]   ;;  %v4732_v29 = vpack.c.b16 %v9559_v16, %v9559_v16 }
 0x34d   : > { %7129 = vmatprep.subr.bf16.mxu0 %v7936_v2  ;;  %v7734_v25 = vld [vmem:[%s10061_s5 + $0x280] sm:$0xff]   ;;  %v7736_v24 = vld [vmem:[%s10061_s5 + $0x2c8] sm:$0xff]   ;;  %v7731_v62 = vld [vmem:[%s10061_s5 + $0x338] sm:$0xff]  }
 0x34e   : > { %7112 = vmatpush3.bf16.msra.mxu1 %v7696_v20  ;;  %v7733_v56 = vld [vmem:[%s10061_s5 + $0x400] sm:$0xff]   ;;  %v7738_v7 = vld [vmem:[%s10061_s5 + $0x288] sm:$0xff]   ;;  %v7740_v32 = vld [vmem:[%s10061_s5 + $0x2d0] sm:$0xff]  }
 0x34f   : > { %7113 = vmatprep.subr.bf16.mxu1 %v7936_v2  ;;  %v7735_v16 = vld [vmem:[%s10061_s5 + $0x3c0] sm:$0xff]   ;;  %v7737_v34 = vld [vmem:[%s10061_s5 + $0x408] sm:$0xff]   ;;  %v7742_v9 = vld [vmem:[%s10061_s5 + $0x290] sm:$0xff]  }
 0x350   : > { %7130 = vmatpush3.bf16.msra.mxu0 %v7695_v15  ;;  %v7744_v20 = vld [vmem:[%s10061_s5 + $0x2d8] sm:$0xff]   ;;  %v7739_v8 = vld [vmem:[%s10061_s5 + $0x3c8] sm:$0xff]   ;;  %v7741_v5 = vld [vmem:[%s10061_s5 + $0x410] sm:$0xff]  }
 0x351   : > { %7131 = vmatprep.subr.bf16.mxu0 %v7936_v2  ;;  %v7746_v0 = vld [vmem:[%s10061_s5 + $0x298] sm:$0xff]   ;;  %v7748_v15 = vld [vmem:[%s10061_s5 + $0x2e0] sm:$0xff]  }
 0x352   : > { %7114 = vmatpush3.bf16.msra.mxu1 %v7698_v10  ;;  %v7743_v10 = vld [vmem:[%s10061_s5 + $0x3d0] sm:$0xff]  }
 0x353   : > { %6957 = vmatprep.subr.bf16.mxu1 %v7700_v53  ;;  %v7745_v53 = vld [vmem:[%s10061_s5 + $0x418] sm:$0xff]  }
 0x354   : > { %7132 = vmatpush3.bf16.msra.mxu0 %v7697_v39  ;;  %v7750_v39 = vld [vmem:[%s10061_s5 + $0x2a0] sm:$0xff]  }
 0x355   : > { %7133 = vmatprep.subr.bf16.mxu0 %v7936_v2  ;;  %7116 = vmatmul.mubr.bf16.vlgmr.msra.gmra.mrb[16].mxu1 %v3654_v26  ;;  %v7747_v26 = vld [vmem:[%s10061_s5 + $0x3d8] sm:$0xff]  }
 0x356   : > { %6958 = vmatpush3.bf16.msra.mxu1 %v7702_v18  ;;  %4412 = vmatprep.mubr.bf16.mxu1 %v4093_v44  ;;  %v7752_v18 = vld [vmem:[%s10061_s5 + $0x2e8] sm:$0xff]   ;;  %v7756_v44 = vld [vmem:[%s10061_s5 + $0x2f0] sm:$0xff]  }
 0x357   : > { %6959 = vmatprep.subr.bf16.mxu1 %v7704_v43  ;;  %v7749_v43 = vld [vmem:[%s10061_s5 + $0x420] sm:$0xff]  }
 0x358   : > { %7134 = vmatpush3.bf16.msra.mxu0 %v7699_v3  ;;  %v7754_v3 = vld [vmem:[%s10061_s5 + $0x2a8] sm:$0xff]  }
 0x359   : > { %7010 = vmatprep.subr.bf16.mxu0 %v7701_v55  ;;  %v7751_v55 = vld [vmem:[%s10061_s5 + $0x3e0] sm:$0xff]  }
 0x35a   : > { %6960 = vmatpush3.bf16.msra.mxu1 %v7706_v51  ;;  %v7753_v51 = vld [vmem:[%s10061_s5 + $0x428] sm:$0xff]  }
 0x35b   : > { %7136 = vmatmul.mubr.bf16.vlgmr.msra.gmra.mrb[32].mxu0 %v4094_v31  ;;  %6961 = vmatprep.subr.bf16.mxu1 %v7708_v42  ;;  %v7758_v42 = vld [vmem:[%s10061_s5 + $0x2b0] sm:$0xff]   ;;  %v7755_v31 = vld [vmem:[%s10061_s5 + $0x3e8] sm:$0xff]  }
 0x35c   : > { %7011 = vmatpush3.bf16.msra.mxu0 %v7703_v63  ;;  %5053 = vmatprep.mubr.bf16.mxu0 %v4734_v19  ;;  %v7760_v63 = vld [vmem:[%s10061_s5 + $0x2f8] sm:$0xff]  }
 0x35d   : > { %7012 = vmatprep.subr.bf16.mxu0 %v7705_v36  ;;  %v7757_v36 = vld [vmem:[%s10061_s5 + $0x430] sm:$0xff]   ;;  %v7762_v19 = vld [vmem:[%s10061_s5 + $0x2b8] sm:$0xff]  }
 0x35e   : > { %6962 = vmatpush3.bf16.msra.mxu1 %v7710_v37  ;;  %v7759_v37 = vld [vmem:[%s10061_s5 + $0x3f0] sm:$0xff]  }
 0x35f   : > { %6963 = vmatprep.subr.bf16.mxu1 %v7712_v17  ;;  %v7761_v17 = vld [vmem:[%s10061_s5 + $0x438] sm:$0xff]  }
 0x360   : > { %7013 = vmatpush3.bf16.msra.mxu0 %v7707_v11  ;;  %v7764_v11 = vld [vmem:[%s10061_s5 + $0x380] sm:$0xff]  }
 0x361   : > { %7014 = vmatprep.subr.bf16.mxu0 %v7709_v45  ;;  %v4731_v45 = vpack.c.b16 %v9610_v12, %v9610_v12  ;;  %v7765_v12 = vld [vmem:[%s10061_s5 + $0x4c0] sm:$0xff]  }
 0x362   : > { %6964 = vmatpush3.bf16.msra.mxu1 %v7714_v14  ;;  %v7763_v14 = vld [vmem:[%s10061_s5 + $0x3f8] sm:$0xff]  }
 0x363   : > { %6965 = vmatprep.subr.bf16.mxu1 %v7716_v61  ;;  %v7766_v61 = vld [vmem:[%s10061_s5 + $0x388] sm:$0xff]  }
 0x364   : > { %7015 = vmatpush3.bf16.msra.mxu0 %v7711_v59  ;;  %v5373_v59 = vpack.c.b16 %v9624_v57, %v9624_v57  ;;  %v7770_v57 = vld [vmem:[%s10061_s5 + $0x398] sm:$0xff]  }
 0x365   : > { %7016 = vmatprep.subr.bf16.mxu0 %v7713_v27  ;;  %v7768_v27 = vld [vmem:[%s10061_s5 + $0x390] sm:$0xff]  }
 0x366   : > { %6966 = vmatpush3.bf16.msra.mxu1 %v7718_v48  ;;  %v7767_v48 = vld [vmem:[%s10061_s5 + $0x4c8] sm:$0xff]  }
 0x367   : > { %6967 = vmatprep.subr.bf16.mxu1 %v7720_v28  ;;  %v7769_v28 = vld [vmem:[%s10061_s5 + $0x4d0] sm:$0xff]  }
 0x368   : > { %7017 = vmatpush3.bf16.msra.mxu0 %v7715_v30  ;;  %v7772_v30 = vld [vmem:[%s10061_s5 + $0x3a0] sm:$0xff]  }
 0x369   : > { %7018 = vmatprep.subr.bf16.mxu0 %v7717_v1  ;;  %v7771_v1 = vld [vmem:[%s10061_s5 + $0x4d8] sm:$0xff]  }
 0x36a   : > { %6968 = vmatpush3.bf16.msra.mxu1 %v7722_v33  ;;  %v7774_v33 = vld [vmem:[%s10061_s5 + $0x3a8] sm:$0xff]  }
 0x36b   : > { %6969 = vmatprep.subr.bf16.mxu1 %v7724_v6  ;;  %v7773_v6 = vld [vmem:[%s10061_s5 + $0x4e0] sm:$0xff]  }
 0x36c   : > { %7019 = vmatpush3.bf16.msra.mxu0 %v7719_v58  ;;  %v7776_v58 = vld [vmem:[%s10061_s5 + $0x3b0] sm:$0xff]  }
 0x36d   : > { %7020 = vmatprep.subr.bf16.mxu0 %v7721_v35  ;;  %v7775_v35 = vld [vmem:[%s10061_s5 + $0x4e8] sm:$0xff]  }
 0x36e   : > { %6970 = vmatpush3.bf16.msra.mxu1 %v7726_v38  ;;  %v7778_v38 = vld [vmem:[%s10061_s5 + $0x3b8] sm:$0xff]  }
 0x36f   : > { %6971 = vmatprep.subr.bf16.mxu1 %v7728_v40  ;;  %v7780_v40 = vld [vmem:[%s10061_s5 + $0x480] sm:$0xff]  }
 0x370   : > { %7021 = vmatpush3.bf16.msra.mxu0 %v7723_v21  ;;  %v7777_v21 = vld [vmem:[%s10061_s5 + $0x4f0] sm:$0xff]  }
 0x371   : > { %7022 = vmatprep.subr.bf16.mxu0 %v7725_v41  ;;  %v7781_v41 = vld [vmem:[%s10061_s5 + $0x440] sm:$0xff]  }
 0x372   : > { %6972 = vmatpush3.bf16.msra.mxu1 %v7730_v47  ;;  %v4735_v47 = vpack.c.b16 %v9424_v13, %v9424_v13  ;;  %v7783_v13 = vld [vmem:[%s10061_s5 + $0x448] sm:$0xff]  }
 0x373   : > { %6988 = vmatprep.subr.bf16.mxu1 %v7732_v46  ;;  %v7782_v46 = vld [vmem:[%s10061_s5 + $0x488] sm:$0xff]  }
 0x374   : > { %7023 = vmatpush3.bf16.msra.mxu0 %v7727_v4  ;;  %v7779_v4 = vld [vmem:[%s10061_s5 + $0x4f8] sm:$0xff]  }
 0x375   : > { %7024 = vmatprep.subr.bf16.mxu0 %v7729_v52  ;;  %4413 = vmatmul.mubr.bf16.vlgmr.msra.gmra.mrb[20].mxu1 %v4092_v22  ;;  %v5376_v52 = vpack.c.b16 %v9447_v60, %v9447_v60  ;;  %v5377_v22 = vpack.c.b16 %v9444_v54, %v9444_v54  ;;  %v7785_v60 = vld [vmem:[%s10061_s5 + $0x450] sm:$0xff]   ;;  %v7788_v54 = vld [vmem:[%s10061_s5 + $0x4a0] sm:$0xff]  }
 0x376   : > { %6989 = vmatpush3.bf16.msra.mxu1 %v7734_v25  ;;  %5013 = vmatprep.mubr.bf16.mxu1 %v4732_v29  ;;  %v7784_v25 = vld [vmem:[%s10061_s5 + $0x490] sm:$0xff]   ;;  %v7789_v29 = vld [vmem:[%s10061_s5 + $0x460] sm:$0xff]  }
 0x377   : > { %6990 = vmatprep.subr.bf16.mxu1 %v7736_v24  ;;  %v7786_v24 = vld [vmem:[%s10061_s5 + $0x498] sm:$0xff]  }
 0x378   : > { %7025 = vmatpush3.bf16.msra.mxu0 %v7731_v62  ;;  %v7787_v62 = vld [vmem:[%s10061_s5 + $0x458] sm:$0xff]  }
 0x379   : > { %7041 = vmatprep.subr.bf16.mxu0 %v7733_v56  ;;  %v7790_v56 = vld [vmem:[%s10061_s5 + $0x4a8] sm:$0xff]  }
 0x37a   : > { %6991 = vmatpush3.bf16.msra.mxu1 %v7738_v7 }
 0x37b   : > { %5054 = vmatmul.mubr.bf16.vlgmr.msra.gmra.mrb[36].mxu0 %v4733_v49  ;;  %6992 = vmatprep.subr.bf16.mxu1 %v7740_v32  ;;  %v7791_v49 = vld [vmem:[%s10061_s5 + $0x468] sm:$0xff]  }
 0x37c   : > { %7042 = vmatpush3.bf16.msra.mxu0 %v7735_v16  ;;  %5655 = vmatprep.mubr.bf16.mxu0 %v5374_v50 }
 0x37d   : > { %7043 = vmatprep.subr.bf16.mxu0 %v7737_v34 }
 0x37e   : > { %6993 = vmatpush3.bf16.msra.mxu1 %v7742_v9  ;;  %v7792_v9 = vld [vmem:[%s10061_s5 + $0x4b0] sm:$0xff]  }
 0x37f   : > { %6994 = vmatprep.subr.bf16.mxu1 %v7744_v20  ;;  %v7793_v20 = vld [vmem:[%s10061_s5 + $0x470] sm:$0xff]  }
 0x380   : > { %7044 = vmatpush3.bf16.msra.mxu0 %v7739_v8  ;;  %v7794_v8 = vld [vmem:[%s10061_s5 + $0x4b8] sm:$0xff]  }
 0x381   : > { %7045 = vmatprep.subr.bf16.mxu0 %v7741_v5  ;;  %v7795_v5 = vld [vmem:[%s10061_s5 + $0x478] sm:$0xff]  }
 0x382   : > { %6995 = vmatpush3.bf16.msra.mxu1 %v7746_v0  ;;  %v5375_v0 = vpack.c.b16 %v9629_v23, %v9629_v23 }
 0x383   : > { %6996 = vmatprep.subr.bf16.mxu1 %v7748_v15 }
 0x384   : > { %7046 = vmatpush3.bf16.msra.mxu0 %v7743_v10 }
 0x385   : > { %7047 = vmatprep.subr.bf16.mxu0 %v7745_v53 }
 0x386   : > { %6997 = vmatpush3.bf16.msra.mxu1 %v7750_v39 }
 0x387   : > { %6998 = vmatprep.subr.bf16.mxu1 %v7752_v18 }
 0x388   : > { %7048 = vmatpush3.bf16.msra.mxu0 %v7747_v26 }
 0x389   : > { %7049 = vmatprep.subr.bf16.mxu0 %v7749_v43 }
 0x38a   : > { %6999 = vmatpush3.bf16.msra.mxu1 %v7754_v3 }
 0x38b   : > { %7000 = vmatprep.subr.bf16.mxu1 %v7756_v44 }
 0x38c   : > { %7050 = vmatpush3.bf16.msra.mxu0 %v7751_v55 }
 0x38d   : > { %7051 = vmatprep.subr.bf16.mxu0 %v7753_v51 }
 0x38e   : > { %7001 = vmatpush3.bf16.msra.mxu1 %v7758_v42 }
 0x38f   : > { %7002 = vmatprep.subr.bf16.mxu1 %v7760_v63 }
 0x390   : > { %7052 = vmatpush3.bf16.msra.mxu0 %v7755_v31 }
 0x391   : > { %7053 = vmatprep.subr.bf16.mxu0 %v7757_v36 }
 0x392   : > { %7003 = vmatpush3.bf16.msra.mxu1 %v7762_v19 }
 0x393   : > { %7139 = vmatprep.subr.bf16.mxu1 %v7936_v2 }
 0x394   : > { %7054 = vmatpush3.bf16.msra.mxu0 %v7759_v37 }
 0x395   : > { %7055 = vmatprep.subr.bf16.mxu0 %v7761_v17  ;;  %5014 = vmatmul.mubr.bf16.vlgmr.msra.gmra.mrb[24].mxu1 %v4731_v45 }
 0x396   : > { %7140 = vmatpush3.bf16.msra.mxu1 %v7764_v11  ;;  %7155 = vmatprep.mubr.msk.bf16.mxu1 %vm7937_vm11, %v7936_v2 }
 0x397   : > { %7141 = vmatprep.subr.bf16.mxu1 %v7936_v2 }
 0x398   : > { %7056 = vmatpush3.bf16.msra.mxu0 %v7763_v14  ;;  %v7796_v14 = vld [vmem:[%s10063_s7] sm:$0xff]  }
 0x399   : > { %7159 = vmatprep.subr.bf16.mxu0 %v7936_v2 }
 0x39a   : > { %7142 = vmatpush3.bf16.msra.mxu1 %v7766_v61  ;;  %v7797_v61 = vld [vmem:[%s10063_s7 + $0x8] sm:$0xff]  }
 0x39b   : > { %5656 = vmatmul.mubr.bf16.vlgmr.msra.gmra.mrb[40].mxu0 %v5373_v59  ;;  %7143 = vmatprep.subr.bf16.mxu1 %v7936_v2  ;;  %v7799_v59 = vld [vmem:[%s10063_s7 + $0x18] sm:$0xff]  }
 0x39c   : > { %7160 = vmatpush3.bf16.msra.mxu0 %v7765_v12  ;;  %7175 = vmatprep.mubr.msk.bf16.mxu0 %vm7937_vm11, %v7936_v2  ;;  %v7798_v12 = vld [vmem:[%s10063_s7 + $0x10] sm:$0xff]  }
 0x39d   : > { %7161 = vmatprep.subr.bf16.mxu0 %v7936_v2 }
 0x39e   : > { %7144 = vmatpush3.bf16.msra.mxu1 %v7768_v27 }
 0x39f   : > { %7145 = vmatprep.subr.bf16.mxu1 %v7936_v2 }
 0x3a0   : > { %7162 = vmatpush3.bf16.msra.mxu0 %v7767_v48 }
 0x3a1   : > { %7163 = vmatprep.subr.bf16.mxu0 %v7936_v2 }
 0x3a2   : > { %7146 = vmatpush3.bf16.msra.mxu1 %v7770_v57 }
 0x3a3   : > { %7147 = vmatprep.subr.bf16.mxu1 %v7936_v2 }
 0x3a4   : > { %7164 = vmatpush3.bf16.msra.mxu0 %v7769_v28 }
 0x3a5   : > { %7165 = vmatprep.subr.bf16.mxu0 %v7936_v2 }
 0x3a6   : > { %7148 = vmatpush3.bf16.msra.mxu1 %v7772_v30 }
 0x3a7   : > { %7149 = vmatprep.subr.bf16.mxu1 %v7936_v2 }
 0x3a8   : > { %7166 = vmatpush3.bf16.msra.mxu0 %v7771_v1 }
 0x3a9   : > { %7167 = vmatprep.subr.bf16.mxu0 %v7936_v2 }
 0x3aa   : > { %7150 = vmatpush3.bf16.msra.mxu1 %v7774_v33 }
 0x3ab   : > { %7151 = vmatprep.subr.bf16.mxu1 %v7936_v2 }
 0x3ac   : > { %7168 = vmatpush3.bf16.msra.mxu0 %v7773_v6 }
 0x3ad   : > { %7169 = vmatprep.subr.bf16.mxu0 %v7936_v2 }
 0x3ae   : > { %7152 = vmatpush3.bf16.msra.mxu1 %v7776_v58 }
 0x3af   : > { %7153 = vmatprep.subr.bf16.mxu1 %v7936_v2 }
 0x3b0   : > { %7170 = vmatpush3.bf16.msra.mxu0 %v7775_v35 }
 0x3b1   : > { %7171 = vmatprep.subr.bf16.mxu0 %v7936_v2 }
 0x3b2   : > { %7154 = vmatpush3.bf16.msra.mxu1 %v7778_v38 }
 0x3b3   : > { %7063 = vmatprep.subr.bf16.mxu1 %v7780_v40 }
 0x3b4   : > { %7172 = vmatpush3.bf16.msra.mxu0 %v7777_v21 }
 0x3b5   : > { %7173 = vmatprep.subr.bf16.mxu0 %v7936_v2  ;;  %7156 = vmatmul.mubr.bf16.vlgmr.msra.gmra.mrb[28].mxu1 %v4735_v47 }
 0x3b6   : > { %7064 = vmatpush3.bf16.msra.mxu1 %v7781_v41  ;;  %5695 = vmatprep.mubr.bf16.mxu1 %v5376_v52 }
 0x3b7   : > { %7065 = vmatprep.subr.bf16.mxu1 %v7782_v46 }
 0x3b8   : > { %7174 = vmatpush3.bf16.msra.mxu0 %v7779_v4 }
 0x3ba   : > { %7066 = vmatpush3.bf16.msra.mxu1 %v7783_v13 }
 0x3bb   : > { %7176 = vmatmul.mubr.bf16.vlgmr.msra.gmra.mrb[44].mxu0 %v5377_v22  ;;  %7067 = vmatprep.subr.bf16.mxu1 %v7784_v25 }
 0x3be   : > { %7068 = vmatpush3.bf16.msra.mxu1 %v7785_v60 }
 0x3bf   : > { %7069 = vmatprep.subr.bf16.mxu1 %v7786_v24 }
 0x3c2   : > { %7070 = vmatpush3.bf16.msra.mxu1 %v7787_v62 }
 0x3c3   : > { %7071 = vmatprep.subr.bf16.mxu1 %v7788_v54 }
 0x3c4   : > { %v6920_v7 = vpop.f32.mrb[24].mxu0 }
 0x3c5   : > { %v6921_v32 = vpop.f32.mrb[25].mxu0 }
 0x3c6   : > { %7072 = vmatpush3.bf16.msra.mxu1 %v7789_v29  ;;  %v6922_v16 = vadd.f32 %v6921_v32, %v6920_v7  ;;  %v6923_v34 = vpop.f32.mrb[26].mxu0 }
 0x3c7   : > { %7073 = vmatprep.subr.bf16.mxu1 %v7790_v56  ;;  %v6924_v50 = vpop.f32.mrb[27].mxu0 }
 0x3ca   : > { %7074 = vmatpush3.bf16.msra.mxu1 %v7791_v49 }
 0x3cb   : > { %7075 = vmatprep.subr.bf16.mxu1 %v7792_v9 }
 0x3ce   : > { %7076 = vmatpush3.bf16.msra.mxu1 %v7793_v20 }
 0x3cf   : > { %7077 = vmatprep.subr.bf16.mxu1 %v7794_v8 }
 0x3d2   : > { %7078 = vmatpush3.bf16.msra.mxu1 %v7795_v5 }
 0x3d3   : > { %7179 = vmatprep.subr.bf16.mxu1 %v7936_v2 }
 0x3d5   : > { %5696 = vmatmul.mubr.bf16.vlgmr.msra.gmra.mrb[32].mxu1 %v5375_v0 }
 0x3d6   : > { %7187 = vmatprep.mubr.msk.bf16.mxu1 %vm7937_vm11, %v7936_v2  ;;  %7180 = vmatpush3.bf16.msra.mxu1 %v7796_v14 }
 0x3d7   : > { %7181 = vmatprep.subr.bf16.mxu1 %v7936_v2 }
 0x3da   : > { %7182 = vmatpush3.bf16.msra.mxu1 %v7797_v61 }
 0x3db   : > { %7183 = vmatprep.subr.bf16.mxu1 %v7936_v2 }
 0x3de   : > { %7184 = vmatpush3.bf16.msra.mxu1 %v7798_v12 }
 0x3df   : > { %7185 = vmatprep.subr.bf16.mxu1 %v7936_v2 }
 0x3e2   : > { %7186 = vmatpush3.bf16.msra.mxu1 %v7799_v59 }
 0x408   : > { %v6898_v15 = vpop.f32.mrb[12].mxu1 }
 0x409   : > { %v6899_v10 = vpop.f32.mrb[13].mxu1 }
 0x40a   : > { %v6900_v53 = vadd.f32 %v6899_v10, %v6898_v15  ;;  %v6901_v39 = vpop.f32.mrb[14].mxu1  ;;  %v6804_v10 = vld [vmem:[%s10062_s6] ss:$0 sm:$0xff] }
 0x40b   : > { %v6902_v18 = vpop.f32.mrb[15].mxu1 }
 0x40c   : > { %v3975_v26 = vadd.f32 %v6922_v16, %v6900_v53 }
 0x40e   : > { %v6951_v43 = vpop.f32.mrb[28].mxu0 }
 0x40f   : > { %v6952_v3 = vpop.f32.mrb[29].mxu0 }
 0x410   : > { %v6953_v44 = vadd.f32 %v6952_v3, %v6951_v43  ;;  %v6954_v55 = vpop.f32.mrb[30].mxu0  ;;  %v6805_v43 = vld [vmem:[%s10064_s8] ss:$0 sm:$0xff] }
 0x411   : > { %v6955_v51 = vpop.f32.mrb[31].mxu0 }
 0x428   : > { %v4014_v42 = vpop.f32.mrb[16].mxu1 }
 0x429   : > { %v4015_v63 = vadd.f32 %v4014_v42, %v3975_v26  ;;  %v7117_v23 = vpop.f32.mrb[17].mxu1 }
 0x42a   : > { %v4017_v31 = vpop.f32.mrb[18].mxu1 }
 0x42b   : > { %v4375_v36 = vadd.f32 %v6953_v44, %v4015_v63  ;;  %v7118_v19 = vpop.f32.mrb[19].mxu1 }
 0x42e   : > { %v4454_v37 = vpop.f32.mrb[32].mxu0 }
 0x42f   : > { %v7137_v17 = vpop.f32.mrb[33].mxu0 }
 0x430   : > { %v4457_v11 = vpop.f32.mrb[34].mxu0 }
 0x431   : > { %v7138_v45 = vpop.f32.mrb[35].mxu0 }
 0x448   : > { %v6973_v27 = vpop.f32.mrb[20].mxu1 }
 0x449   : > { %v6974_v48 = vpop.f32.mrb[21].mxu1 }
 0x44a   : > { %v6975_v57 = vadd.f32 %v6974_v48, %v6973_v27  ;;  %v6976_v28 = vpop.f32.mrb[22].mxu1 }
 0x44b   : > { %v6977_v30 = vpop.f32.mrb[23].mxu1 }
 0x44c   : > { %v4415_v1 = vadd.f32 %v6975_v57, %v4375_v36 }
 0x44e   : > { %v7026_v33 = vpop.f32.mrb[36].mxu0  ;;  %v4455_v6 = vadd.f32 %v4454_v37, %v4415_v1 }
 0x44f   : > { %v7027_v58 = vpop.f32.mrb[37].mxu0 }
 0x450   : > { %v7028_v35 = vadd.f32 %v7027_v58, %v7026_v33  ;;  %v7029_v38 = vpop.f32.mrb[38].mxu0 }
 0x451   : > { %v7030_v40 = vpop.f32.mrb[39].mxu0 }
 0x468   : > { %v7004_v21 = vpop.f32.mrb[24].mxu1 }
 0x469   : > { %v7005_v41 = vpop.f32.mrb[25].mxu1 }
 0x46a   : > { %v7006_v47 = vadd.f32 %v7005_v41, %v7004_v21  ;;  %v7007_v46 = vpop.f32.mrb[26].mxu1 }
 0x46b   : > { %v7008_v4 = vpop.f32.mrb[27].mxu1 }
 0x46c   : > { %v5056_v52 = vadd.f32 %v7028_v35, %v7006_v47 }
 0x46e   : > { %v7057_v2 = vpop.f32.mrb[40].mxu0 }
 0x46f   : > { %v7058_v13 = vpop.f32.mrb[41].mxu0 }
 0x470   : > { %v7059_v25 = vadd.f32 %v7058_v13, %v7057_v2  ;;  %v7060_v22 = vpop.f32.mrb[42].mxu0 }
 0x471   : > { %v7061_v60 = vpop.f32.mrb[43].mxu0 }
 0x488   : > { %v5095_v24 = vpop.f32.mrb[28].mxu1 }
 0x489   : > { %v5096_v62 = vadd.f32 %v5095_v24, %v5056_v52  ;;  %v7157_v54 = vpop.f32.mrb[29].mxu1 }
 0x48a   : > { %v5098_v29 = vpop.f32.mrb[30].mxu1 }
 0x48b   : > { %v5101_v56 = vadd.f32 %v5096_v62, %v4455_v6  ;;  %v7158_v7 = vpop.f32.mrb[31].mxu1 }
 0x48e   : > { %v5737_v32 = vpop.f32.mrb[44].mxu0 }
 0x48f   : > { %v7177_v16 = vpop.f32.mrb[45].mxu0 }
 0x490   : > { %v5740_v49 = vpop.f32.mrb[46].mxu0 }
 0x491   : > { %v7178_v34 = vpop.f32.mrb[47].mxu0 }
 0x4a8   : > { %v7079_v50 = vpop.f32.mrb[32].mxu1 }
 0x4a9   : > { %v7080_v9 = vpop.f32.mrb[33].mxu1 }
 0x4aa   : > { %v7081_v20 = vadd.f32 %v7080_v9, %v7079_v50  ;;  %v7082_v8 = vpop.f32.mrb[34].mxu1 }
 0x4ab   : > { %v7083_v5 = vpop.f32.mrb[35].mxu1 }
 0x4ac   : > { %v5698_v0 = vadd.f32 %v7081_v20, %v7059_v25 }
 0x4ae   : > { %v5738_v15 = vadd.f32 %v5737_v32, %v5698_v0 }
 0x4b0   : > { %v5743_v53 = vadd.f32 %v5738_v15, %v5101_v56 }
 0x4b2   : > { %v5751_v39 = vadd.f32 %v6804_v10, %v5743_v53 }
 0x4b4   : > { %v5752_v18 = vmax.f32 %v5751_v39, 0.0 }
 0x4b6   : > { %v5753_v26 = vpack.c.bf16 %v5752_v18, %v5752_v18 }
 0x4b8   : > { %7188 = vmatmul.mubr.msk.bf16.vlgmr.msra.gmra.mrb[36].mxu1 %vm5793_vm1, %v5753_v26 }
 0x58b   : > { %v5831_v3 = vpop.f32.mrb[36].mxu1 }
 0x58c   : > { %v5832_v44 = vadd.f32 %v6805_v43, %v5831_v3  ;;  %v7189_v55 = vpop.f32.mrb[37].mxu1 }
 0x58d   : > { %v5834_v51 = vpop.f32.mrb[38].mxu1 }
 0x58e   : > { %v7190_v42 = vpop.f32.mrb[39].mxu1  ;;  %5838 = vst.msk [vmem:[%s365_s16] sm:$0xf] %vm5837_vm12, %v5832_v44 }
 0x58f   : > { %7871 = shalt.err (!%p7868_p7)
}
 0x590   : > { %s7872_s14 = scalar_lea.hbm %s10012_s26, 64  ;;  %s7876_s19 = scalar_lea.hbm %s10065_s9, 128 }
 0x591   : > { %p7873_p9 = scmp.ne.s32.totalorder %s10012_s26, %s7872_s14  ;;  %p7877_p5 = scmp.lt.u32.totalorder %s10012_s26, %s10065_s9 }
 0x592   : > { %p7878_p11 = scmp.lt.u32.totalorder %s7876_s19, %s7872_s14  ;;  %p7880_p4 = scmp.lt.u32.totalorder %s7872_s14, %s10012_s26 }
 0x593   : > { %p7874_p1 = pnand %p7873_p9, %p8083_p12 }
 0x594   : > { %p7879_p2 = por %p7878_p11, %p7877_p5 }
 0x595   : > { %p7875_p0 = pneg %p7874_p1 }
 0x596   : > { %p7881_p6 = por %p7880_p4, %p7879_p2 }
 0x598   : > { %p7882_p8 = pnand %p7881_p6, %p7875_p0 }
 0x59a   : > { %7885 = shalt.err (!%p7882_p8)
}
 0x59b   : > { %7221 = dma.vmem_to_hbm [thread:$0]  (%p8083_p12), %s10014_s15, 64, %s10012_s26, %s5840_s13  }
 0x59c PF: > { %s10089_s17 = sld [smem:[#allocation11_spill]]  ;;  %s5865_s25 = sand.u32 1, %s7916_s30  }
 0x59d   : > { %p10091_p13 = scmp.ge.s32.totalorder %s7928_s12, 2  ;;  %s5866_s22 = scalar_lea.sflag [#allocation4], %s5865_s25 }
 0x5a2   : > { %p10090_p10 = scmp.ne.s32.totalorder %s10089_s17, 0 }
 0x5a4   : > { %p7232_p3 = pnand %p10091_p13, %p10090_p10 }
 0x5a6   : > { %7911 = dma.done.wait (!%p7232_p3), %s5866_s22, 64  }
 0x5a7   : > { %7913 = vsyncadd (!%p7232_p3), %s5866_s22, 4294967232  ;;  %s10092_s12 = sld [smem:[#allocation12_spill]]  ;;  %s10093_s30 = smov %s7920_s10 }
 0x5a8   : > { %s10094_s10 = smov %s7924_s11  ;;  %s10095_s11 = smov %s8079_s28 }
 0x5ad   : > { %p23_p7 = scmp.ge.s32.totalorder %s10092_s12, 4  }
 0x5af   :  { %25 = sbr.rel (!%p23_p7) target bundleno = 6 (0x6), region = 112 }
 0x5b6   :  { %5871 = vsyncpa [#allocation3], 1 }
 0x5b7   :  { %5873 = vsyncpa [#allocation3 + $0x1], 1 }
 0x5b8   :  { %5874 = vsyncpa [#allocation6], 1 }
 0x5b9   :  { %5875 = vsyncpa [#allocation4], 1 }
 0x5ba   :  { %5877 = vsyncpa [#allocation4 + $0x1], 1 }

</bundles_post_ra>
